<compile_context>
chip_gen: v7x
topology: tpu7x:2x2x1
jax: 0.10.0
libtpu: 0.0.40
codegen_flags: <defaults>
</compile_context>

<pallas_src>
import functools

import jax
import jax.numpy as jnp
from jax import lax
from jax.experimental import pallas as pl
from jax.experimental.pallas import tpu as pltpu

DIM_TAG = 194
DIM_COM = 20
H = 32            # DIM_LSTM_HIDDEN
T = 8             # sequence length (small example)
B = 2             # batch size (small example)

# ---- slab row offsets (blocks 8-row aligned so loads are tile aligned) ----
# wmain slab, width 8H = 256
M_W0 = 0            # folded pre+wih0 : [DIM_TAG, 8H]
M_WHH0 = 200        # [H, 8H]
M_WIH1 = 232        # [2H, 8H]
M_WHH1 = 296        # [H, 8H]
M_B0 = 328          # [1, 8H]   (bpre@wih0 + b_ih + b_hh, fwd|bwd)
M_B1 = 336          # [1, 8H]
M_ROWS = 344

# wpost slab, width 128
P_W1 = 0            # [276, 128]
P_W2 = 280          # [128, 128]
P_BM1 = 408         # [1, 128]
P_BM2 = 416         # [1, 128]
P_ROWS = 424

# wattn slab, width 16
A_WHC = 0           # [H, 8]  (attn_dense_h_1..4 | attn_dense_c_1..4) in cols 0:8
A_BHC = 32          # [1, 8]
A_AWIH = 40         # [2H, 16]  attn_rnn input weights, gate-major across heads
A_AWHH = 104        # [1, 16]
A_AB = 112          # [1, 16]
A_W3 = 120          # [128, 16]
A_BM3 = 248         # [1, 16]
A_ROWS = 256


# ---------------------------------------------------------------------------
# Pallas kernel
# ---------------------------------------------------------------------------
def bilstm_mh_attn_kernel(x_ref,       # [T*B, DIM_TAG]  time-major flattened x_tag
                          xcom_ref,    # [B, DIM_COM]
                          wmain_ref,   # [M_ROWS, 8H]
                          wpost_ref,   # [P_ROWS, 128]
                          wattn_ref,   # [A_ROWS, 16]
                          out_ref,     # [B, 16]
                          xsel_s,      # VMEM [T*2B, 4H]  per-step fused gate inputs
                          h0_s,        # VMEM [T*B, 2H]   layer-0 outputs (fwd|bwd lanes)
                          h1_s):       # VMEM [T*B, 2H]   layer-1 outputs (fwd|bwd lanes)
    f32 = jnp.float32
    bf16 = jnp.bfloat16
    H2, H3, H4, H8 = 2 * H, 3 * H, 4 * H, 8 * H
    B2 = 2 * B

    # Rows 0:B of the fused state are the forward direction, B:2B the backward one.
    is_fwd = lax.broadcasted_iota(jnp.int32, (B2, H4), 0) < B

    def fill_xsel(xp):
        """xp: [T*B, 8H] hoisted input projection (+bias); cols 0:4H fwd, 4H:8H bwd.
        Writes the direction/time-selected per-step gate inputs (off the serial chain)."""
        for s in range(T):
            xsel_s[s * B2:s * B2 + B, :] = xp[s * B:(s + 1) * B, 0:H4]              # fwd @ t=s
            xsel_s[s * B2 + B:(s + 1) * B2, :] = xp[(T - 1 - s) * B:(T - s) * B, H4:H8]  # bwd @ t=T-1-s

    def run_bilstm(whh_bf16, out_s):
        """Fused fwd+bwd LSTM layer: one bf16 MXU matmul per step.
        Writes per-time outputs into out_s ([T*B, 2H], cols 0:H fwd / H:2H bwd)."""
        h2 = jnp.zeros((B2, H), f32)
        c2 = jnp.zeros((B2, H), f32)
        for s in range(T):
            rec = jnp.dot(h2.astype(bf16), whh_bf16,
                          preferred_element_type=f32)                       # [2B, 8H]
            g = xsel_s[s * B2:(s + 1) * B2, :] + jnp.where(
                is_fwd, rec[:, 0:H4], rec[:, H4:H8])                        # [2B, 4H]
            # gates packed (i, f, o, g): one sigmoid over [2B,3H], one tanh over [2B,H]
            sfo = jax.nn.sigmoid(g[:, 0:H3])
            gg = jnp.tanh(g[:, H3:H4])
            c2 = sfo[:, H:H2] * c2 + sfo[:, 0:H] * gg
            h2 = sfo[:, H2:H3] * jnp.tanh(c2)
            out_s[s * B:(s + 1) * B, 0:H] = h2[0:B, :]                      # fwd out @ t=s
            out_s[(T - 1 - s) * B:(T - s) * B, H:H2] = h2[B:B2, :]          # bwd out @ t=T-1-s
        return h2, c2

    # -------- layer 0: `pre` Linear already folded into W0'/b0' at pack time --------
    xp0 = (jnp.dot(x_ref[...], wmain_ref[M_W0:M_W0 + DIM_TAG, :],
                   preferred_element_type=f32)
           + wmain_ref[M_B0:M_B0 + 1, :])                                   # [T*B, 8H]
    fill_xsel(xp0)
    run_bilstm(wmain_ref[M_WHH0:M_WHH0 + H, :].astype(bf16), h0_s)

    # -------- layer 1: single full-K input projection from the [T*B, 2H] scratch ----
    xp1 = (jnp.dot(h0_s[...], wmain_ref[M_WIH1:M_WIH1 + H2, :],
                   preferred_element_type=f32)
           + wmain_ref[M_B1:M_B1 + 1, :])                                   # [T*B, 8H]
    fill_xsel(xp1)
    h2f, c2f = run_bilstm(wmain_ref[M_WHH1:M_WHH1 + H, :].astype(bf16), h1_s)
    # h2f/c2f rows 0:B = hn[-2]/cn[-2] (last-layer fwd final), B:2B = hn[-1]/cn[-1] (bwd)

    # -------- per-head initial (h0, c0) for the 4 attention LSTMs (one fused dense) --
    whc = wattn_ref[A_WHC:A_WHC + H, 0:8]                                   # [H, 8]
    bhc = wattn_ref[A_BHC:A_BHC + 1, 0:8]                                   # [1, 8]
    s4 = jnp.concatenate([h2f, c2f], axis=0)                                # [4B, H]
    proj = jnp.dot(s4, whc, preferred_element_type=f32) + bhc               # [4B, 8]
    # heads 1,2 read hn[-1]/cn[-1] (bwd); heads 3,4 read hn[-2]/cn[-2] (fwd)
    h0a = jnp.concatenate([proj[B:B2, 0:2], proj[0:B, 2:4]], axis=1)            # [B, 4]
    c0a = jnp.concatenate([proj[3 * B:4 * B, 4:6], proj[B2:3 * B, 6:8]], axis=1)  # [B, 4]

    # -------- 4 attention heads: one input-proj matmul, VPU-only recurrence ---------
    awhh = wattn_ref[A_AWHH:A_AWHH + 1, :]                                  # [1, 16]
    xpa = (jnp.dot(h1_s[...], wattn_ref[A_AWIH:A_AWIH + H2, :],
                   preferred_element_type=f32)
           + wattn_ref[A_AB:A_AB + 1, :])                                   # [T*B, 16]
    whh_i, whh_f, whh_o, whh_g = (awhh[:, 0:4], awhh[:, 4:8],
                                  awhh[:, 8:12], awhh[:, 12:16])
    h = h0a
    c = c0a
    scores = []
    for t in range(T):
        xt = xpa[t * B:(t + 1) * B, :]
        i = jax.nn.sigmoid(xt[:, 0:4] + h * whh_i)
        f = jax.nn.sigmoid(xt[:, 4:8] + h * whh_f)
        o = jax.nn.sigmoid(xt[:, 8:12] + h * whh_o)
        gg = jnp.tanh(xt[:, 12:16] + h * whh_g)
        c = f * c + i * gg
        h = o * jnp.tanh(c)
        scores.append(h)                                                    # [B, 4]

    # softmax over time, per head; tree-reduced max / sum to shorten the chain
    def tree_reduce(vals, op):
        while len(vals) > 1:
            nxt = [op(vals[i], vals[i + 1]) for i in range(0, len(vals) - 1, 2)]
            if len(vals) % 2:
                nxt.append(vals[-1])
            vals = nxt
        return vals[0]

    m = tree_reduce(list(scores), jnp.maximum)
    es = [jnp.exp(s - m) for s in scores]
    denom = tree_reduce(list(es), lambda a, b: a + b)
    inv = 1.0 / denom        # exact reciprocal: negligible cost at [B,4], tight validation
    wts = [e * inv for e in es]

    # per-head attention-weighted sums over time; h_tag rows come from the h1 scratch
    acc = [jnp.zeros((B, H2), f32) for _ in range(4)]
    for t in range(T):
        ht = h1_s[t * B:(t + 1) * B, :]                                     # [B, 2H]
        for k in range(4):
            acc[k] = acc[k] + wts[t][:, k:k + 1] * ht

    # -------- post MLP: one lane-concat + 3 dense layers -------------------
    hcat = jnp.concatenate(acc + [xcom_ref[...]], axis=1)                   # [B, 276]
    z = jnp.maximum(
        jnp.dot(hcat, wpost_ref[P_W1:P_W1 + 8 * H + DIM_COM, :],
                preferred_element_type=f32) + wpost_ref[P_BM1:P_BM1 + 1, :], 0.0)
    z = jnp.maximum(
        jnp.dot(z, wpost_ref[P_W2:P_W2 + 128, :],
                preferred_element_type=f32) + wpost_ref[P_BM2:P_BM2 + 1, :], 0.0)
    z = jax.nn.sigmoid(
        jnp.dot(z, wattn_ref[A_W3:A_W3 + 128, :],
                preferred_element_type=f32) + wattn_ref[A_BM3:A_BM3 + 1, :])
    out_ref[...] = z.astype(out_ref.dtype)


# ---------------------------------------------------------------------------
# Canonical (PyTorch-style, gate order i,f,g,o) parameters + slab packing
# ---------------------------------------------------------------------------
def init_canonical_params(key):
    keys = iter(jax.random.split(key, 64))

    def u(shape, fan_in):
        k = 1.0 / jnp.sqrt(jnp.float32(fan_in))
        return jax.random.uniform(next(keys), shape, jnp.float32, -k, k)

    def lstm(din, hid):
        wih = u((din, 4 * hid), hid)                        # transposed weight_ih
        whh = u((hid, 4 * hid), hid)                        # transposed weight_hh
        b = u((1, 4 * hid), hid) + u((1, 4 * hid), hid)     # b_ih + b_hh
        return wih, whh, b

    d_in = 8 * H + DIM_COM                                  # 276
    return {
        "wpre": u((DIM_TAG, H), DIM_TAG), "bpre": u((1, H), DIM_TAG),
        "l0f": lstm(H, H), "l0b": lstm(H, H),
        "l1f": lstm(2 * H, H), "l1b": lstm(2 * H, H),
        "wh": u((H, 4), H), "bh": u((1, 4), H),             # attn_dense_h_1..4
        "wc": u((H, 4), H), "bc": u((1, 4), H),             # attn_dense_c_1..4
        "attn": [lstm(2 * H, 1) for _ in range(4)],         # attn_rnn_1..4 (hidden=1)
        "w1": u((d_in, 128), d_in), "bm1": u((1, 128), d_in),
        "w2": u((128, 128), 128), "bm2": u((1, 128), 128),
        "w3": u((128, 16), 128), "bm3": u((1, 16), 128),
    }


def pack_params(cp):
    f32 = jnp.float32
    HP = jax.lax.Precision.HIGHEST

    def reorder(w):                     # gate cols (i,f,g,o) -> (i,f,o,g)
        hid = w.shape[-1] // 4
        return jnp.concatenate(
            [w[..., 0:2 * hid], w[..., 3 * hid:4 * hid], w[..., 2 * hid:3 * hid]], axis=-1)

    def cat_dirs(pf, pb):               # fwd | bwd on the last axis, gates reordered
        return tuple(jnp.concatenate([reorder(a), reorder(b)], axis=-1)
                     for a, b in zip(pf, pb))

    wih0, whh0, b0 = cat_dirs(cp["l0f"], cp["l0b"])         # [H,8H],[H,8H],[1,8H]
    wih1, whh1, b1 = cat_dirs(cp["l1f"], cp["l1b"])         # [2H,8H],[H,8H],[1,8H]

    # fold the `pre` Linear into the layer-0 input projection
    w0p = jnp.dot(cp["wpre"], wih0, precision=HP)           # [DIM_TAG, 8H]
    b0p = jnp.dot(cp["bpre"], wih0, precision=HP) + b0      # [1, 8H]

    wmain = jnp.zeros((M_ROWS, 8 * H), f32)
    wmain = wmain.at[M_W0:M_W0 + DIM_TAG].set(w0p)
    wmain = wmain.at[M_WHH0:M_WHH0 + H].set(whh0)
    wmain = wmain.at[M_WIH1:M_WIH1 + 2 * H].set(wih1)
    wmain = wmain.at[M_WHH1:M_WHH1 + H].set(whh1)
    wmain = wmain.at[M_B0:M_B0 + 1].set(b0p)
    wmain = wmain.at[M_B1:M_B1 + 1].set(b1)

    wpost = jnp.zeros((P_ROWS, 128), f32)
    wpost = wpost.at[P_W1:P_W1 + 8 * H + DIM_COM].set(cp["w1"])
    wpost = wpost.at[P_W2:P_W2 + 128].set(cp["w2"])
    wpost = wpost.at[P_BM1:P_BM1 + 1].set(cp["bm1"])
    wpost = wpost.at[P_BM2:P_BM2 + 1].set(cp["bm2"])

    # attention rnn params, gate-major across heads, gates in (i,f,o,g) order:
    # packed column = gate_index*4 + head
    gate_perm = (0, 1, 3, 2)            # (i,f,o,g) positions in canonical (i,f,g,o)
    def pack_heads(idx):
        mats = [cp["attn"][k][idx] for k in range(4)]       # each [rows, 4]
        cols = [mats[k][:, gate_perm[gi]:gate_perm[gi] + 1]
                for gi in range(4) for k in range(4)]
        return jnp.concatenate(cols, axis=1)                # [rows, 16]

    awih = pack_heads(0)                                    # [2H, 16]
    awhh = pack_heads(1)                                    # [1, 16]
    ab = pack_heads(2)                                      # [1, 16]
    whc = jnp.concatenate([cp["wh"], cp["wc"]], axis=1)     # [H, 8]
    bhc = jnp.concatenate([cp["bh"], cp["bc"]], axis=1)     # [1, 8]

    wattn = jnp.zeros((A_ROWS, 16), f32)
    wattn = wattn.at[A_WHC:A_WHC + H, 0:8].set(whc)
    wattn = wattn.at[A_BHC:A_BHC + 1, 0:8].set(bhc)
    wattn = wattn.at[A_AWIH:A_AWIH + 2 * H].set(awih)
    wattn = wattn.at[A_AWHH:A_AWHH + 1].set(awhh)
    wattn = wattn.at[A_AB:A_AB + 1].set(ab)
    wattn = wattn.at[A_W3:A_W3 + 128].set(cp["w3"])
    wattn = wattn.at[A_BM3:A_BM3 + 1].set(cp["bm3"])

    return wmain, wpost, wattn


# ---------------------------------------------------------------------------
# Wrapper
# ---------------------------------------------------------------------------
@jax.jit
def bilstm_mh_attn(x_tag, x_com, slabs):
    wmain, wpost, wattn = slabs
    bb, tt, _ = x_tag.shape
    assert (bb, tt) == (B, T)
    # batch-first [B,T,DIM_TAG] -> time-major rows [T*B, DIM_TAG] (row t*B + b)
    x_flat = jnp.transpose(x_tag, (1, 0, 2)).reshape(tt * bb, DIM_TAG).astype(jnp.float32)
    args = (x_flat, x_com.astype(jnp.float32), wmain, wpost, wattn)
    return pl.pallas_call(
        bilstm_mh_attn_kernel,
        out_shape=jax.ShapeDtypeStruct((bb, 16), jnp.float32),
        in_specs=[pl.BlockSpec(memory_space=pltpu.MemorySpace.VMEM)] * len(args),
        out_specs=pl.BlockSpec(memory_space=pltpu.MemorySpace.VMEM),
        scratch_shapes=[
            pltpu.VMEM((T * 2 * B, 4 * H), jnp.float32),   # per-step fused gate inputs
            pltpu.VMEM((T * B, 2 * H), jnp.float32),       # layer-0 outputs (fwd|bwd)
            pltpu.VMEM((T * B, 2 * H), jnp.float32),       # layer-1 outputs (fwd|bwd)
        ],
    )(*args)


# ---------------------------------------------------------------------------
# Pure-JAX reference (naive, per-direction / per-head, PyTorch-style).
# rec_dtype lets us mirror the kernel's bf16 recurrent matmul for a tight check.
# ---------------------------------------------------------------------------
@functools.partial(jax.jit, static_argnums=(3,))
def reference_forward(x_tag, x_com, cp, rec_dtype):
    f32 = jnp.float32
    bb, tt, _ = x_tag.shape
    x_tag = x_tag.astype(f32)
    x_com = x_com.astype(f32)

    def lstm_dir(xs, wih, whh, b, reverse):
        h = jnp.zeros((bb, H), f32)
        c = jnp.zeros((bb, H), f32)
        outs = [None] * tt
        order = range(tt - 1, -1, -1) if reverse else range(tt)
        for t in order:
            rec = jnp.dot(h.astype(rec_dtype), whh.astype(rec_dtype),
                          preferred_element_type=f32)
            g = jnp.dot(xs[t], wih) + rec + b
            i = jax.nn.sigmoid(g[:, 0:H])
            f = jax.nn.sigmoid(g[:, H:2 * H])
            gg = jnp.tanh(g[:, 2 * H:3 * H])
            o = jax.nn.sigmoid(g[:, 3 * H:4 * H])
            c = f * c + i * gg
            h = o * jnp.tanh(c)
            outs[t] = h
        return outs, h, c

    xs = [jnp.dot(x_tag[:, t, :], cp["wpre"]) + cp["bpre"] for t in range(tt)]
    f0, _, _ = lstm_dir(xs, *cp["l0f"], False)
    r0, _, _ = lstm_dir(xs, *cp["l0b"], True)
    x1 = [jnp.concatenate([f0[t], r0[t]], axis=1) for t in range(tt)]
    f1, hF, cF = lstm_dir(x1, *cp["l1f"], False)
    r1, hB, cB = lstm_dir(x1, *cp["l1b"], True)
    htag = [jnp.concatenate([f1[t], r1[t]], axis=1) for t in range(tt)]

    heads = []
    for k in range(4):
        src_h, src_c = (hB, cB) if k < 2 else (hF, cF)       # heads 1,2: hn[-1]; 3,4: hn[-2]
        h0 = jnp.dot(src_h, cp["wh"][:, k:k + 1]) + cp["bh"][:, k:k + 1]
        c0 = jnp.dot(src_c, cp["wc"][:, k:k + 1]) + cp["bc"][:, k:k + 1]
        awih_k, awhh_k, ab_k = cp["attn"][k]                 # [2H,4],[1,4],[1,4] (i,f,g,o)
        ha, ca = h0, c0
        sc = []
        for t in range(tt):
            g = jnp.dot(htag[t], awih_k) + ha * awhh_k + ab_k
            i = jax.nn.sigmoid(g[:, 0:1])
            f = jax.nn.sigmoid(g[:, 1:2])
            gg = jnp.tanh(g[:, 2:3])
            o = jax.nn.sigmoid(g[:, 3:4])
            ca = f * ca + i * gg
            ha = o * jnp.tanh(ca)
            sc.append(ha)
        sc = jnp.concatenate(sc, axis=1)                     # [B, T]
        w = jax.nn.softmax(sc, axis=1)
        heads.append(sum(w[:, t:t + 1] * htag[t] for t in range(tt)))

    hcat = jnp.concatenate(heads + [x_com], axis=1)          # [B, 276]
    z = jnp.maximum(jnp.dot(hcat, cp["w1"]) + cp["bm1"], 0.0)
    z = jnp.maximum(jnp.dot(z, cp["w2"]) + cp["bm2"], 0.0)
    return jax.nn.sigmoid(jnp.dot(z, cp["w3"]) + cp["bm3"])


if __name__ == "__main__":
    key = jax.random.PRNGKey(0)
    kx, kc, kp = jax.random.split(key, 3)
    x_tag = jax.random.normal(kx, (B, T, DIM_TAG), jnp.float32)
    x_com = jax.random.normal(kc, (B, DIM_COM), jnp.float32)
    cparams = init_canonical_params(kp)
    slabs = pack_params(cparams)

    out = jax.block_until_ready(bilstm_mh_attn(x_tag, x_com, slabs))

    assert out.shape == (B, 16), out.shape
    assert bool(jnp.all(jnp.isfinite(out)))
    assert bool(jnp.all(out >= 0.0)) and bool(jnp.all(out <= 1.0))   # sigmoid output

    # Tight check: reference mirrors the kernel's bf16 recurrent-matmul precision,
    # so packing / indexing / restructuring errors show up far above this tolerance.
    ref_bf16 = jax.block_until_ready(reference_forward(x_tag, x_com, cparams, jnp.bfloat16))
    err_tight = float(jnp.max(jnp.abs(out - ref_bf16)))
    assert err_tight < 1e-2, f"tight check vs bf16-mirrored reference: {err_tight}"

    # Loose check: pure-f32 PyTorch-faithful reference; bounds the end-to-end effect
    # of running the 16 serial recurrent matmuls in bf16.
    ref_f32 = jax.block_until_ready(reference_forward(x_tag, x_com, cparams, jnp.float32))
    err_loose = float(jnp.max(jnp.abs(out - ref_f32)))
    assert err_loose < 5e-2, f"loose check vs f32 reference: {err_loose}"

    print("KERNEL_OK")
</pallas_src>

<mosaic_0001>
module attributes {stable_mosaic.version = 11 : i64} {
  func.func @bilstm_mh_attn_kernel(%arg0: memref<16x194xf32, #tpu.memory_space<vmem>>, %arg1: memref<2x20xf32, #tpu.memory_space<vmem>>, %arg2: memref<344x256xf32, #tpu.memory_space<vmem>>, %arg3: memref<424x128xf32, #tpu.memory_space<vmem>>, %arg4: memref<256x16xf32, #tpu.memory_space<vmem>>, %arg5: memref<2x16xf32, #tpu.memory_space<vmem>>, %arg6: memref<32x128xf32, #tpu.memory_space<vmem>>, %arg7: memref<16x64xf32, #tpu.memory_space<vmem>>, %arg8: memref<16x64xf32, #tpu.memory_space<vmem>>) attributes {dimension_semantics = [], scalar_prefetch = 0 : i64, scratch_operands = 3 : i64, tpu.core_type = #tpu.core_type<tc>} {
    %0 = tpu.iota {dimensions = array<i32: 0>} : vector<4x128xi32>
    %c2_i32 = arith.constant 2 : i32
    %1 = vector.broadcast %c2_i32 : i32 to vector<4x128xi32>
    %2 = arith.cmpi slt, %0, %1 : vector<4x128xi32>
    %c0 = arith.constant 0 : index
    %c0_0 = arith.constant 0 : index
    %3 = vector.load %arg0[%c0, %c0_0] : memref<16x194xf32, #tpu.memory_space<vmem>>, vector<16x194xf32>
    %c0_1 = arith.constant 0 : index
    %c0_2 = arith.constant 0 : index
    %4 = vector.load %arg2[%c0_1, %c0_2] : memref<344x256xf32, #tpu.memory_space<vmem>>, vector<194x256xf32>
    %cst = arith.constant dense<0.000000e+00> : vector<16x256xf32>
    %5 = tpu.matmul %3, %4, %cst {dimension_numbers = #tpu.dot_dimension_numbers<[1], [0], [0], [1], [0, 0, 1, 1], [], []>} : vector<16x194xf32>, vector<194x256xf32>, vector<16x256xf32> -> vector<16x256xf32>
    %c328 = arith.constant 328 : index
    %c0_3 = arith.constant 0 : index
    %6 = vector.load %arg2[%c328, %c0_3] : memref<344x256xf32, #tpu.memory_space<vmem>>, vector<1x256xf32>
    %7 = vector.broadcast %6 : vector<1x256xf32> to vector<16x256xf32>
    %8 = arith.addf %5, %7 : vector<16x256xf32>
    %9 = vector.extract_strided_slice %8 {offsets = [0, 0], sizes = [2, 128], strides = [1, 1]} : vector<16x256xf32> to vector<2x128xf32>
    %c0_4 = arith.constant 0 : index
    %c0_5 = arith.constant 0 : index
    %10 = vector.load %arg6[%c0_4, %c0_5] : memref<32x128xf32, #tpu.memory_space<vmem>>, vector<2x128xf32>
    tpu.vector_store %arg6[%c0_4, %c0_5], %9 {strides = array<i32>} : memref<32x128xf32, #tpu.memory_space<vmem>>, vector<2x128xf32>,
    %11 = vector.extract_strided_slice %8 {offsets = [14, 128], sizes = [2, 128], strides = [1, 1]} : vector<16x256xf32> to vector<2x128xf32>
    %c2 = arith.constant 2 : index
    %c0_6 = arith.constant 0 : index
    %12 = vector.load %arg6[%c2, %c0_6] : memref<32x128xf32, #tpu.memory_space<vmem>>, vector<2x128xf32>
    tpu.vector_store %arg6[%c2, %c0_6], %11 {strides = array<i32>} : memref<32x128xf32, #tpu.memory_space<vmem>>, vector<2x128xf32>,
    %13 = vector.extract_strided_slice %8 {offsets = [2, 0], sizes = [2, 128], strides = [1, 1]} : vector<16x256xf32> to vector<2x128xf32>
    %c4 = arith.constant 4 : index
    %c0_7 = arith.constant 0 : index
    %14 = vector.load %arg6[%c4, %c0_7] : memref<32x128xf32, #tpu.memory_space<vmem>>, vector<2x128xf32>
    tpu.vector_store %arg6[%c4, %c0_7], %13 {strides = array<i32>} : memref<32x128xf32, #tpu.memory_space<vmem>>, vector<2x128xf32>,
    %15 = vector.extract_strided_slice %8 {offsets = [12, 128], sizes = [2, 128], strides = [1, 1]} : vector<16x256xf32> to vector<2x128xf32>
    %c6 = arith.constant 6 : index
    %c0_8 = arith.constant 0 : index
    %16 = vector.load %arg6[%c6, %c0_8] : memref<32x128xf32, #tpu.memory_space<vmem>>, vector<2x128xf32>
    tpu.vector_store %arg6[%c6, %c0_8], %15 {strides = array<i32>} : memref<32x128xf32, #tpu.memory_space<vmem>>, vector<2x128xf32>,
    %17 = vector.extract_strided_slice %8 {offsets = [4, 0], sizes = [2, 128], strides = [1, 1]} : vector<16x256xf32> to vector<2x128xf32>
    %c8 = arith.constant 8 : index
    %c0_9 = arith.constant 0 : index
    %18 = vector.load %arg6[%c8, %c0_9] : memref<32x128xf32, #tpu.memory_space<vmem>>, vector<2x128xf32>
    tpu.vector_store %arg6[%c8, %c0_9], %17 {strides = array<i32>} : memref<32x128xf32, #tpu.memory_space<vmem>>, vector<2x128xf32>,
    %19 = vector.extract_strided_slice %8 {offsets = [10, 128], sizes = [2, 128], strides = [1, 1]} : vector<16x256xf32> to vector<2x128xf32>
    %c10 = arith.constant 10 : index
    %c0_10 = arith.constant 0 : index
    %20 = vector.load %arg6[%c10, %c0_10] : memref<32x128xf32, #tpu.memory_space<vmem>>, vector<2x128xf32>
    tpu.vector_store %arg6[%c10, %c0_10], %19 {strides = array<i32>} : memref<32x128xf32, #tpu.memory_space<vmem>>, vector<2x128xf32>,
    %21 = vector.extract_strided_slice %8 {offsets = [6, 0], sizes = [2, 128], strides = [1, 1]} : vector<16x256xf32> to vector<2x128xf32>
    %c12 = arith.constant 12 : index
    %c0_11 = arith.constant 0 : index
    %22 = vector.load %arg6[%c12, %c0_11] : memref<32x128xf32, #tpu.memory_space<vmem>>, vector<2x128xf32>
    tpu.vector_store %arg6[%c12, %c0_11], %21 {strides = array<i32>} : memref<32x128xf32, #tpu.memory_space<vmem>>, vector<2x128xf32>,
    %23 = vector.extract_strided_slice %8 {offsets = [8, 128], sizes = [2, 128], strides = [1, 1]} : vector<16x256xf32> to vector<2x128xf32>
    %c14 = arith.constant 14 : index
    %c0_12 = arith.constant 0 : index
    %24 = vector.load %arg6[%c14, %c0_12] : memref<32x128xf32, #tpu.memory_space<vmem>>, vector<2x128xf32>
    tpu.vector_store %arg6[%c14, %c0_12], %23 {strides = array<i32>} : memref<32x128xf32, #tpu.memory_space<vmem>>, vector<2x128xf32>,
    %25 = vector.extract_strided_slice %8 {offsets = [8, 0], sizes = [2, 128], strides = [1, 1]} : vector<16x256xf32> to vector<2x128xf32>
    %c16 = arith.constant 16 : index
    %c0_13 = arith.constant 0 : index
    %26 = vector.load %arg6[%c16, %c0_13] : memref<32x128xf32, #tpu.memory_space<vmem>>, vector<2x128xf32>
    tpu.vector_store %arg6[%c16, %c0_13], %25 {strides = array<i32>} : memref<32x128xf32, #tpu.memory_space<vmem>>, vector<2x128xf32>,
    %27 = vector.extract_strided_slice %8 {offsets = [6, 128], sizes = [2, 128], strides = [1, 1]} : vector<16x256xf32> to vector<2x128xf32>
    %c18 = arith.constant 18 : index
    %c0_14 = arith.constant 0 : index
    %28 = vector.load %arg6[%c18, %c0_14] : memref<32x128xf32, #tpu.memory_space<vmem>>, vector<2x128xf32>
    tpu.vector_store %arg6[%c18, %c0_14], %27 {strides = array<i32>} : memref<32x128xf32, #tpu.memory_space<vmem>>, vector<2x128xf32>,
    %29 = vector.extract_strided_slice %8 {offsets = [10, 0], sizes = [2, 128], strides = [1, 1]} : vector<16x256xf32> to vector<2x128xf32>
    %c20 = arith.constant 20 : index
    %c0_15 = arith.constant 0 : index
    %30 = vector.load %arg6[%c20, %c0_15] : memref<32x128xf32, #tpu.memory_space<vmem>>, vector<2x128xf32>
    tpu.vector_store %arg6[%c20, %c0_15], %29 {strides = array<i32>} : memref<32x128xf32, #tpu.memory_space<vmem>>, vector<2x128xf32>,
    %31 = vector.extract_strided_slice %8 {offsets = [4, 128], sizes = [2, 128], strides = [1, 1]} : vector<16x256xf32> to vector<2x128xf32>
    %c22 = arith.constant 22 : index
    %c0_16 = arith.constant 0 : index
    %32 = vector.load %arg6[%c22, %c0_16] : memref<32x128xf32, #tpu.memory_space<vmem>>, vector<2x128xf32>
    tpu.vector_store %arg6[%c22, %c0_16], %31 {strides = array<i32>} : memref<32x128xf32, #tpu.memory_space<vmem>>, vector<2x128xf32>,
    %33 = vector.extract_strided_slice %8 {offsets = [12, 0], sizes = [2, 128], strides = [1, 1]} : vector<16x256xf32> to vector<2x128xf32>
    %c24 = arith.constant 24 : index
    %c0_17 = arith.constant 0 : index
    %34 = vector.load %arg6[%c24, %c0_17] : memref<32x128xf32, #tpu.memory_space<vmem>>, vector<2x128xf32>
    tpu.vector_store %arg6[%c24, %c0_17], %33 {strides = array<i32>} : memref<32x128xf32, #tpu.memory_space<vmem>>, vector<2x128xf32>,
    %35 = vector.extract_strided_slice %8 {offsets = [2, 128], sizes = [2, 128], strides = [1, 1]} : vector<16x256xf32> to vector<2x128xf32>
    %c26 = arith.constant 26 : index
    %c0_18 = arith.constant 0 : index
    %36 = vector.load %arg6[%c26, %c0_18] : memref<32x128xf32, #tpu.memory_space<vmem>>, vector<2x128xf32>
    tpu.vector_store %arg6[%c26, %c0_18], %35 {strides = array<i32>} : memref<32x128xf32, #tpu.memory_space<vmem>>, vector<2x128xf32>,
    %37 = vector.extract_strided_slice %8 {offsets = [14, 0], sizes = [2, 128], strides = [1, 1]} : vector<16x256xf32> to vector<2x128xf32>
    %c28 = arith.constant 28 : index
    %c0_19 = arith.constant 0 : index
    %38 = vector.load %arg6[%c28, %c0_19] : memref<32x128xf32, #tpu.memory_space<vmem>>, vector<2x128xf32>
    tpu.vector_store %arg6[%c28, %c0_19], %37 {strides = array<i32>} : memref<32x128xf32, #tpu.memory_space<vmem>>, vector<2x128xf32>,
    %39 = vector.extract_strided_slice %8 {offsets = [0, 128], sizes = [2, 128], strides = [1, 1]} : vector<16x256xf32> to vector<2x128xf32>
    %c30 = arith.constant 30 : index
    %c0_20 = arith.constant 0 : index
    %40 = vector.load %arg6[%c30, %c0_20] : memref<32x128xf32, #tpu.memory_space<vmem>>, vector<2x128xf32>
    tpu.vector_store %arg6[%c30, %c0_20], %39 {strides = array<i32>} : memref<32x128xf32, #tpu.memory_space<vmem>>, vector<2x128xf32>,
    %c200 = arith.constant 200 : index
    %c0_21 = arith.constant 0 : index
    %41 = vector.load %arg2[%c200, %c0_21] : memref<344x256xf32, #tpu.memory_space<vmem>>, vector<32x256xf32>
    %42 = arith.truncf %41 : vector<32x256xf32> to vector<32x256xbf16>
    %cst_22 = arith.constant 0.000000e+00 : f32
    %43 = vector.broadcast %cst_22 : f32 to vector<4x32xf32>
    %cst_23 = arith.constant 0.000000e+00 : f32
    %44 = vector.broadcast %cst_23 : f32 to vector<4x32xf32>
    %45 = arith.truncf %43 : vector<4x32xf32> to vector<4x32xbf16>
    %cst_24 = arith.constant dense<0.000000e+00> : vector<4x256xf32>
    %46 = tpu.matmul %45, %42, %cst_24 {dimension_numbers = #tpu.dot_dimension_numbers<[1], [0], [0], [1], [0, 0, 1, 1], [], []>} : vector<4x32xbf16>, vector<32x256xbf16>, vector<4x256xf32> -> vector<4x256xf32>
    %c0_25 = arith.constant 0 : index
    %c0_26 = arith.constant 0 : index
    %47 = vector.load %arg6[%c0_25, %c0_26] : memref<32x128xf32, #tpu.memory_space<vmem>>, vector<4x128xf32>
    %48 = vector.extract_strided_slice %46 {offsets = [0, 0], sizes = [4, 128], strides = [1, 1]} : vector<4x256xf32> to vector<4x128xf32>
    %49 = vector.extract_strided_slice %46 {offsets = [0, 128], sizes = [4, 128], strides = [1, 1]} : vector<4x256xf32> to vector<4x128xf32>
    %50 = arith.select %2, %48, %49 : vector<4x128xi1>, vector<4x128xf32>
    %51 = arith.addf %47, %50 : vector<4x128xf32>
    %52 = vector.extract_strided_slice %51 {offsets = [0, 0], sizes = [4, 96], strides = [1, 1]} : vector<4x128xf32> to vector<4x96xf32>
    %53 = arith.negf %52 : vector<4x96xf32>
    %54 = math.exp %53 : vector<4x96xf32>
    %cst_27 = arith.constant 1.000000e+00 : f32
    %55 = vector.broadcast %cst_27 : f32 to vector<4x96xf32>
    %56 = arith.addf %55, %54 : vector<4x96xf32>
    %57 = arith.divf %55, %56 : vector<4x96xf32>
    %58 = vector.extract_strided_slice %51 {offsets = [0, 96], sizes = [4, 32], strides = [1, 1]} : vector<4x128xf32> to vector<4x32xf32>
    %59 = math.tanh %58 : vector<4x32xf32>
    %60 = vector.extract_strided_slice %57 {offsets = [0, 32], sizes = [4, 32], strides = [1, 1]} : vector<4x96xf32> to vector<4x32xf32>
    %61 = arith.mulf %60, %44 : vector<4x32xf32>
    %62 = vector.extract_strided_slice %57 {offsets = [0, 0], sizes = [4, 32], strides = [1, 1]} : vector<4x96xf32> to vector<4x32xf32>
    %63 = arith.mulf %62, %59 : vector<4x32xf32>
    %64 = arith.addf %61, %63 : vector<4x32xf32>
    %65 = vector.extract_strided_slice %57 {offsets = [0, 64], sizes = [4, 32], strides = [1, 1]} : vector<4x96xf32> to vector<4x32xf32>
    %66 = math.tanh %64 : vector<4x32xf32>
    %67 = arith.mulf %65, %66 : vector<4x32xf32>
    %68 = vector.extract_strided_slice %67 {offsets = [0, 0], sizes = [2, 32], strides = [1, 1]} : vector<4x32xf32> to vector<2x32xf32>
    %c0_28 = arith.constant 0 : index
    %c0_29 = arith.constant 0 : index
    %69 = vector.load %arg7[%c0_28, %c0_29] : memref<16x64xf32, #tpu.memory_space<vmem>>, vector<2x32xf32>
    tpu.vector_store %arg7[%c0_28, %c0_29], %68 {strides = array<i32>} : memref<16x64xf32, #tpu.memory_space<vmem>>, vector<2x32xf32>,
    %70 = vector.extract_strided_slice %67 {offsets = [2, 0], sizes = [2, 32], strides = [1, 1]} : vector<4x32xf32> to vector<2x32xf32>
    %c14_30 = arith.constant 14 : index
    %c32 = arith.constant 32 : index
    %71 = vector.load %arg7[%c14_30, %c32] : memref<16x64xf32, #tpu.memory_space<vmem>>, vector<2x32xf32>
    tpu.vector_store %arg7[%c14_30, %c32], %70 {strides = array<i32>} : memref<16x64xf32, #tpu.memory_space<vmem>>, vector<2x32xf32>,
    %72 = arith.truncf %67 : vector<4x32xf32> to vector<4x32xbf16>
    %cst_31 = arith.constant dense<0.000000e+00> : vector<4x256xf32>
    %73 = tpu.matmul %72, %42, %cst_31 {dimension_numbers = #tpu.dot_dimension_numbers<[1], [0], [0], [1], [0, 0, 1, 1], [], []>} : vector<4x32xbf16>, vector<32x256xbf16>, vector<4x256xf32> -> vector<4x256xf32>
    %c4_32 = arith.constant 4 : index
    %c0_33 = arith.constant 0 : index
    %74 = vector.load %arg6[%c4_32, %c0_33] : memref<32x128xf32, #tpu.memory_space<vmem>>, vector<4x128xf32>
    %75 = vector.extract_strided_slice %73 {offsets = [0, 0], sizes = [4, 128], strides = [1, 1]} : vector<4x256xf32> to vector<4x128xf32>
    %76 = vector.extract_strided_slice %73 {offsets = [0, 128], sizes = [4, 128], strides = [1, 1]} : vector<4x256xf32> to vector<4x128xf32>
    %77 = arith.select %2, %75, %76 : vector<4x128xi1>, vector<4x128xf32>
    %78 = arith.addf %74, %77 : vector<4x128xf32>
    %79 = vector.extract_strided_slice %78 {offsets = [0, 0], sizes = [4, 96], strides = [1, 1]} : vector<4x128xf32> to vector<4x96xf32>
    %80 = arith.negf %79 : vector<4x96xf32>
    %81 = math.exp %80 : vector<4x96xf32>
    %cst_34 = arith.constant 1.000000e+00 : f32
    %82 = vector.broadcast %cst_34 : f32 to vector<4x96xf32>
    %83 = arith.addf %82, %81 : vector<4x96xf32>
    %84 = arith.divf %82, %83 : vector<4x96xf32>
    %85 = vector.extract_strided_slice %78 {offsets = [0, 96], sizes = [4, 32], strides = [1, 1]} : vector<4x128xf32> to vector<4x32xf32>
    %86 = math.tanh %85 : vector<4x32xf32>
    %87 = vector.extract_strided_slice %84 {offsets = [0, 32], sizes = [4, 32], strides = [1, 1]} : vector<4x96xf32> to vector<4x32xf32>
    %88 = arith.mulf %87, %64 : vector<4x32xf32>
    %89 = vector.extract_strided_slice %84 {offsets = [0, 0], sizes = [4, 32], strides = [1, 1]} : vector<4x96xf32> to vector<4x32xf32>
    %90 = arith.mulf %89, %86 : vector<4x32xf32>
    %91 = arith.addf %88, %90 : vector<4x32xf32>
    %92 = vector.extract_strided_slice %84 {offsets = [0, 64], sizes = [4, 32], strides = [1, 1]} : vector<4x96xf32> to vector<4x32xf32>
    %93 = math.tanh %91 : vector<4x32xf32>
    %94 = arith.mulf %92, %93 : vector<4x32xf32>
    %95 = vector.extract_strided_slice %94 {offsets = [0, 0], sizes = [2, 32], strides = [1, 1]} : vector<4x32xf32> to vector<2x32xf32>
    %c2_35 = arith.constant 2 : index
    %c0_36 = arith.constant 0 : index
    %96 = vector.load %arg7[%c2_35, %c0_36] : memref<16x64xf32, #tpu.memory_space<vmem>>, vector<2x32xf32>
    tpu.vector_store %arg7[%c2_35, %c0_36], %95 {strides = array<i32>} : memref<16x64xf32, #tpu.memory_space<vmem>>, vector<2x32xf32>,
    %97 = vector.extract_strided_slice %94 {offsets = [2, 0], sizes = [2, 32], strides = [1, 1]} : vector<4x32xf32> to vector<2x32xf32>
    %c12_37 = arith.constant 12 : index
    %c32_38 = arith.constant 32 : index
    %98 = vector.load %arg7[%c12_37, %c32_38] : memref<16x64xf32, #tpu.memory_space<vmem>>, vector<2x32xf32>
    tpu.vector_store %arg7[%c12_37, %c32_38], %97 {strides = array<i32>} : memref<16x64xf32, #tpu.memory_space<vmem>>, vector<2x32xf32>,
    %99 = arith.truncf %94 : vector<4x32xf32> to vector<4x32xbf16>
    %cst_39 = arith.constant dense<0.000000e+00> : vector<4x256xf32>
    %100 = tpu.matmul %99, %42, %cst_39 {dimension_numbers = #tpu.dot_dimension_numbers<[1], [0], [0], [1], [0, 0, 1, 1], [], []>} : vector<4x32xbf16>, vector<32x256xbf16>, vector<4x256xf32> -> vector<4x256xf32>
    %c8_40 = arith.constant 8 : index
    %c0_41 = arith.constant 0 : index
    %101 = vector.load %arg6[%c8_40, %c0_41] : memref<32x128xf32, #tpu.memory_space<vmem>>, vector<4x128xf32>
    %102 = vector.extract_strided_slice %100 {offsets = [0, 0], sizes = [4, 128], strides = [1, 1]} : vector<4x256xf32> to vector<4x128xf32>
    %103 = vector.extract_strided_slice %100 {offsets = [0, 128], sizes = [4, 128], strides = [1, 1]} : vector<4x256xf32> to vector<4x128xf32>
    %104 = arith.select %2, %102, %103 : vector<4x128xi1>, vector<4x128xf32>
    %105 = arith.addf %101, %104 : vector<4x128xf32>
    %106 = vector.extract_strided_slice %105 {offsets = [0, 0], sizes = [4, 96], strides = [1, 1]} : vector<4x128xf32> to vector<4x96xf32>
    %107 = arith.negf %106 : vector<4x96xf32>
    %108 = math.exp %107 : vector<4x96xf32>
    %cst_42 = arith.constant 1.000000e+00 : f32
    %109 = vector.broadcast %cst_42 : f32 to vector<4x96xf32>
    %110 = arith.addf %109, %108 : vector<4x96xf32>
    %111 = arith.divf %109, %110 : vector<4x96xf32>
    %112 = vector.extract_strided_slice %105 {offsets = [0, 96], sizes = [4, 32], strides = [1, 1]} : vector<4x128xf32> to vector<4x32xf32>
    %113 = math.tanh %112 : vector<4x32xf32>
    %114 = vector.extract_strided_slice %111 {offsets = [0, 32], sizes = [4, 32], strides = [1, 1]} : vector<4x96xf32> to vector<4x32xf32>
    %115 = arith.mulf %114, %91 : vector<4x32xf32>
    %116 = vector.extract_strided_slice %111 {offsets = [0, 0], sizes = [4, 32], strides = [1, 1]} : vector<4x96xf32> to vector<4x32xf32>
    %117 = arith.mulf %116, %113 : vector<4x32xf32>
    %118 = arith.addf %115, %117 : vector<4x32xf32>
    %119 = vector.extract_strided_slice %111 {offsets = [0, 64], sizes = [4, 32], strides = [1, 1]} : vector<4x96xf32> to vector<4x32xf32>
    %120 = math.tanh %118 : vector<4x32xf32>
    %121 = arith.mulf %119, %120 : vector<4x32xf32>
    %122 = vector.extract_strided_slice %121 {offsets = [0, 0], sizes = [2, 32], strides = [1, 1]} : vector<4x32xf32> to vector<2x32xf32>
    %c4_43 = arith.constant 4 : index
    %c0_44 = arith.constant 0 : index
    %123 = vector.load %arg7[%c4_43, %c0_44] : memref<16x64xf32, #tpu.memory_space<vmem>>, vector<2x32xf32>
    tpu.vector_store %arg7[%c4_43, %c0_44], %122 {strides = array<i32>} : memref<16x64xf32, #tpu.memory_space<vmem>>, vector<2x32xf32>,
    %124 = vector.extract_strided_slice %121 {offsets = [2, 0], sizes = [2, 32], strides = [1, 1]} : vector<4x32xf32> to vector<2x32xf32>
    %c10_45 = arith.constant 10 : index
    %c32_46 = arith.constant 32 : index
    %125 = vector.load %arg7[%c10_45, %c32_46] : memref<16x64xf32, #tpu.memory_space<vmem>>, vector<2x32xf32>
    tpu.vector_store %arg7[%c10_45, %c32_46], %124 {strides = array<i32>} : memref<16x64xf32, #tpu.memory_space<vmem>>, vector<2x32xf32>,
    %126 = arith.truncf %121 : vector<4x32xf32> to vector<4x32xbf16>
    %cst_47 = arith.constant dense<0.000000e+00> : vector<4x256xf32>
    %127 = tpu.matmul %126, %42, %cst_47 {dimension_numbers = #tpu.dot_dimension_numbers<[1], [0], [0], [1], [0, 0, 1, 1], [], []>} : vector<4x32xbf16>, vector<32x256xbf16>, vector<4x256xf32> -> vector<4x256xf32>
    %c12_48 = arith.constant 12 : index
    %c0_49 = arith.constant 0 : index
    %128 = vector.load %arg6[%c12_48, %c0_49] : memref<32x128xf32, #tpu.memory_space<vmem>>, vector<4x128xf32>
    %129 = vector.extract_strided_slice %127 {offsets = [0, 0], sizes = [4, 128], strides = [1, 1]} : vector<4x256xf32> to vector<4x128xf32>
    %130 = vector.extract_strided_slice %127 {offsets = [0, 128], sizes = [4, 128], strides = [1, 1]} : vector<4x256xf32> to vector<4x128xf32>
    %131 = arith.select %2, %129, %130 : vector<4x128xi1>, vector<4x128xf32>
    %132 = arith.addf %128, %131 : vector<4x128xf32>
    %133 = vector.extract_strided_slice %132 {offsets = [0, 0], sizes = [4, 96], strides = [1, 1]} : vector<4x128xf32> to vector<4x96xf32>
    %134 = arith.negf %133 : vector<4x96xf32>
    %135 = math.exp %134 : vector<4x96xf32>
    %cst_50 = arith.constant 1.000000e+00 : f32
    %136 = vector.broadcast %cst_50 : f32 to vector<4x96xf32>
    %137 = arith.addf %136, %135 : vector<4x96xf32>
    %138 = arith.divf %136, %137 : vector<4x96xf32>
    %139 = vector.extract_strided_slice %132 {offsets = [0, 96], sizes = [4, 32], strides = [1, 1]} : vector<4x128xf32> to vector<4x32xf32>
    %140 = math.tanh %139 : vector<4x32xf32>
    %141 = vector.extract_strided_slice %138 {offsets = [0, 32], sizes = [4, 32], strides = [1, 1]} : vector<4x96xf32> to vector<4x32xf32>
    %142 = arith.mulf %141, %118 : vector<4x32xf32>
    %143 = vector.extract_strided_slice %138 {offsets = [0, 0], sizes = [4, 32], strides = [1, 1]} : vector<4x96xf32> to vector<4x32xf32>
    %144 = arith.mulf %143, %140 : vector<4x32xf32>
    %145 = arith.addf %142, %144 : vector<4x32xf32>
    %146 = vector.extract_strided_slice %138 {offsets = [0, 64], sizes = [4, 32], strides = [1, 1]} : vector<4x96xf32> to vector<4x32xf32>
    %147 = math.tanh %145 : vector<4x32xf32>
    %148 = arith.mulf %146, %147 : vector<4x32xf32>
    %149 = vector.extract_strided_slice %148 {offsets = [0, 0], sizes = [2, 32], strides = [1, 1]} : vector<4x32xf32> to vector<2x32xf32>
    %c6_51 = arith.constant 6 : index
    %c0_52 = arith.constant 0 : index
    %150 = vector.load %arg7[%c6_51, %c0_52] : memref<16x64xf32, #tpu.memory_space<vmem>>, vector<2x32xf32>
    tpu.vector_store %arg7[%c6_51, %c0_52], %149 {strides = array<i32>} : memref<16x64xf32, #tpu.memory_space<vmem>>, vector<2x32xf32>,
    %151 = vector.extract_strided_slice %148 {offsets = [2, 0], sizes = [2, 32], strides = [1, 1]} : vector<4x32xf32> to vector<2x32xf32>
    %c8_53 = arith.constant 8 : index
    %c32_54 = arith.constant 32 : index
    %152 = vector.load %arg7[%c8_53, %c32_54] : memref<16x64xf32, #tpu.memory_space<vmem>>, vector<2x32xf32>
    tpu.vector_store %arg7[%c8_53, %c32_54], %151 {strides = array<i32>} : memref<16x64xf32, #tpu.memory_space<vmem>>, vector<2x32xf32>,
    %153 = arith.truncf %148 : vector<4x32xf32> to vector<4x32xbf16>
    %cst_55 = arith.constant dense<0.000000e+00> : vector<4x256xf32>
    %154 = tpu.matmul %153, %42, %cst_55 {dimension_numbers = #tpu.dot_dimension_numbers<[1], [0], [0], [1], [0, 0, 1, 1], [], []>} : vector<4x32xbf16>, vector<32x256xbf16>, vector<4x256xf32> -> vector<4x256xf32>
    %c16_56 = arith.constant 16 : index
    %c0_57 = arith.constant 0 : index
    %155 = vector.load %arg6[%c16_56, %c0_57] : memref<32x128xf32, #tpu.memory_space<vmem>>, vector<4x128xf32>
    %156 = vector.extract_strided_slice %154 {offsets = [0, 0], sizes = [4, 128], strides = [1, 1]} : vector<4x256xf32> to vector<4x128xf32>
    %157 = vector.extract_strided_slice %154 {offsets = [0, 128], sizes = [4, 128], strides = [1, 1]} : vector<4x256xf32> to vector<4x128xf32>
    %158 = arith.select %2, %156, %157 : vector<4x128xi1>, vector<4x128xf32>
    %159 = arith.addf %155, %158 : vector<4x128xf32>
    %160 = vector.extract_strided_slice %159 {offsets = [0, 0], sizes = [4, 96], strides = [1, 1]} : vector<4x128xf32> to vector<4x96xf32>
    %161 = arith.negf %160 : vector<4x96xf32>
    %162 = math.exp %161 : vector<4x96xf32>
    %cst_58 = arith.constant 1.000000e+00 : f32
    %163 = vector.broadcast %cst_58 : f32 to vector<4x96xf32>
    %164 = arith.addf %163, %162 : vector<4x96xf32>
    %165 = arith.divf %163, %164 : vector<4x96xf32>
    %166 = vector.extract_strided_slice %159 {offsets = [0, 96], sizes = [4, 32], strides = [1, 1]} : vector<4x128xf32> to vector<4x32xf32>
    %167 = math.tanh %166 : vector<4x32xf32>
    %168 = vector.extract_strided_slice %165 {offsets = [0, 32], sizes = [4, 32], strides = [1, 1]} : vector<4x96xf32> to vector<4x32xf32>
    %169 = arith.mulf %168, %145 : vector<4x32xf32>
    %170 = vector.extract_strided_slice %165 {offsets = [0, 0], sizes = [4, 32], strides = [1, 1]} : vector<4x96xf32> to vector<4x32xf32>
    %171 = arith.mulf %170, %167 : vector<4x32xf32>
    %172 = arith.addf %169, %171 : vector<4x32xf32>
    %173 = vector.extract_strided_slice %165 {offsets = [0, 64], sizes = [4, 32], strides = [1, 1]} : vector<4x96xf32> to vector<4x32xf32>
    %174 = math.tanh %172 : vector<4x32xf32>
    %175 = arith.mulf %173, %174 : vector<4x32xf32>
    %176 = vector.extract_strided_slice %175 {offsets = [0, 0], sizes = [2, 32], strides = [1, 1]} : vector<4x32xf32> to vector<2x32xf32>
    %c8_59 = arith.constant 8 : index
    %c0_60 = arith.constant 0 : index
    %177 = vector.load %arg7[%c8_59, %c0_60] : memref<16x64xf32, #tpu.memory_space<vmem>>, vector<2x32xf32>
    tpu.vector_store %arg7[%c8_59, %c0_60], %176 {strides = array<i32>} : memref<16x64xf32, #tpu.memory_space<vmem>>, vector<2x32xf32>,
    %178 = vector.extract_strided_slice %175 {offsets = [2, 0], sizes = [2, 32], strides = [1, 1]} : vector<4x32xf32> to vector<2x32xf32>
    %c6_61 = arith.constant 6 : index
    %c32_62 = arith.constant 32 : index
    %179 = vector.load %arg7[%c6_61, %c32_62] : memref<16x64xf32, #tpu.memory_space<vmem>>, vector<2x32xf32>
    tpu.vector_store %arg7[%c6_61, %c32_62], %178 {strides = array<i32>} : memref<16x64xf32, #tpu.memory_space<vmem>>, vector<2x32xf32>,
    %180 = arith.truncf %175 : vector<4x32xf32> to vector<4x32xbf16>
    %cst_63 = arith.constant dense<0.000000e+00> : vector<4x256xf32>
    %181 = tpu.matmul %180, %42, %cst_63 {dimension_numbers = #tpu.dot_dimension_numbers<[1], [0], [0], [1], [0, 0, 1, 1], [], []>} : vector<4x32xbf16>, vector<32x256xbf16>, vector<4x256xf32> -> vector<4x256xf32>
    %c20_64 = arith.constant 20 : index
    %c0_65 = arith.constant 0 : index
    %182 = vector.load %arg6[%c20_64, %c0_65] : memref<32x128xf32, #tpu.memory_space<vmem>>, vector<4x128xf32>
    %183 = vector.extract_strided_slice %181 {offsets = [0, 0], sizes = [4, 128], strides = [1, 1]} : vector<4x256xf32> to vector<4x128xf32>
    %184 = vector.extract_strided_slice %181 {offsets = [0, 128], sizes = [4, 128], strides = [1, 1]} : vector<4x256xf32> to vector<4x128xf32>
    %185 = arith.select %2, %183, %184 : vector<4x128xi1>, vector<4x128xf32>
    %186 = arith.addf %182, %185 : vector<4x128xf32>
    %187 = vector.extract_strided_slice %186 {offsets = [0, 0], sizes = [4, 96], strides = [1, 1]} : vector<4x128xf32> to vector<4x96xf32>
    %188 = arith.negf %187 : vector<4x96xf32>
    %189 = math.exp %188 : vector<4x96xf32>
    %cst_66 = arith.constant 1.000000e+00 : f32
    %190 = vector.broadcast %cst_66 : f32 to vector<4x96xf32>
    %191 = arith.addf %190, %189 : vector<4x96xf32>
    %192 = arith.divf %190, %191 : vector<4x96xf32>
    %193 = vector.extract_strided_slice %186 {offsets = [0, 96], sizes = [4, 32], strides = [1, 1]} : vector<4x128xf32> to vector<4x32xf32>
    %194 = math.tanh %193 : vector<4x32xf32>
    %195 = vector.extract_strided_slice %192 {offsets = [0, 32], sizes = [4, 32], strides = [1, 1]} : vector<4x96xf32> to vector<4x32xf32>
    %196 = arith.mulf %195, %172 : vector<4x32xf32>
    %197 = vector.extract_strided_slice %192 {offsets = [0, 0], sizes = [4, 32], strides = [1, 1]} : vector<4x96xf32> to vector<4x32xf32>
    %198 = arith.mulf %197, %194 : vector<4x32xf32>
    %199 = arith.addf %196, %198 : vector<4x32xf32>
    %200 = vector.extract_strided_slice %192 {offsets = [0, 64], sizes = [4, 32], strides = [1, 1]} : vector<4x96xf32> to vector<4x32xf32>
    %201 = math.tanh %199 : vector<4x32xf32>
    %202 = arith.mulf %200, %201 : vector<4x32xf32>
    %203 = vector.extract_strided_slice %202 {offsets = [0, 0], sizes = [2, 32], strides = [1, 1]} : vector<4x32xf32> to vector<2x32xf32>
    %c10_67 = arith.constant 10 : index
    %c0_68 = arith.constant 0 : index
    %204 = vector.load %arg7[%c10_67, %c0_68] : memref<16x64xf32, #tpu.memory_space<vmem>>, vector<2x32xf32>
    tpu.vector_store %arg7[%c10_67, %c0_68], %203 {strides = array<i32>} : memref<16x64xf32, #tpu.memory_space<vmem>>, vector<2x32xf32>,
    %205 = vector.extract_strided_slice %202 {offsets = [2, 0], sizes = [2, 32], strides = [1, 1]} : vector<4x32xf32> to vector<2x32xf32>
    %c4_69 = arith.constant 4 : index
    %c32_70 = arith.constant 32 : index
    %206 = vector.load %arg7[%c4_69, %c32_70] : memref<16x64xf32, #tpu.memory_space<vmem>>, vector<2x32xf32>
    tpu.vector_store %arg7[%c4_69, %c32_70], %205 {strides = array<i32>} : memref<16x64xf32, #tpu.memory_space<vmem>>, vector<2x32xf32>,
    %207 = arith.truncf %202 : vector<4x32xf32> to vector<4x32xbf16>
    %cst_71 = arith.constant dense<0.000000e+00> : vector<4x256xf32>
    %208 = tpu.matmul %207, %42, %cst_71 {dimension_numbers = #tpu.dot_dimension_numbers<[1], [0], [0], [1], [0, 0, 1, 1], [], []>} : vector<4x32xbf16>, vector<32x256xbf16>, vector<4x256xf32> -> vector<4x256xf32>
    %c24_72 = arith.constant 24 : index
    %c0_73 = arith.constant 0 : index
    %209 = vector.load %arg6[%c24_72, %c0_73] : memref<32x128xf32, #tpu.memory_space<vmem>>, vector<4x128xf32>
    %210 = vector.extract_strided_slice %208 {offsets = [0, 0], sizes = [4, 128], strides = [1, 1]} : vector<4x256xf32> to vector<4x128xf32>
    %211 = vector.extract_strided_slice %208 {offsets = [0, 128], sizes = [4, 128], strides = [1, 1]} : vector<4x256xf32> to vector<4x128xf32>
    %212 = arith.select %2, %210, %211 : vector<4x128xi1>, vector<4x128xf32>
    %213 = arith.addf %209, %212 : vector<4x128xf32>
    %214 = vector.extract_strided_slice %213 {offsets = [0, 0], sizes = [4, 96], strides = [1, 1]} : vector<4x128xf32> to vector<4x96xf32>
    %215 = arith.negf %214 : vector<4x96xf32>
    %216 = math.exp %215 : vector<4x96xf32>
    %cst_74 = arith.constant 1.000000e+00 : f32
    %217 = vector.broadcast %cst_74 : f32 to vector<4x96xf32>
    %218 = arith.addf %217, %216 : vector<4x96xf32>
    %219 = arith.divf %217, %218 : vector<4x96xf32>
    %220 = vector.extract_strided_slice %213 {offsets = [0, 96], sizes = [4, 32], strides = [1, 1]} : vector<4x128xf32> to vector<4x32xf32>
    %221 = math.tanh %220 : vector<4x32xf32>
    %222 = vector.extract_strided_slice %219 {offsets = [0, 32], sizes = [4, 32], strides = [1, 1]} : vector<4x96xf32> to vector<4x32xf32>
    %223 = arith.mulf %222, %199 : vector<4x32xf32>
    %224 = vector.extract_strided_slice %219 {offsets = [0, 0], sizes = [4, 32], strides = [1, 1]} : vector<4x96xf32> to vector<4x32xf32>
    %225 = arith.mulf %224, %221 : vector<4x32xf32>
    %226 = arith.addf %223, %225 : vector<4x32xf32>
    %227 = vector.extract_strided_slice %219 {offsets = [0, 64], sizes = [4, 32], strides = [1, 1]} : vector<4x96xf32> to vector<4x32xf32>
    %228 = math.tanh %226 : vector<4x32xf32>
    %229 = arith.mulf %227, %228 : vector<4x32xf32>
    %230 = vector.extract_strided_slice %229 {offsets = [0, 0], sizes = [2, 32], strides = [1, 1]} : vector<4x32xf32> to vector<2x32xf32>
    %c12_75 = arith.constant 12 : index
    %c0_76 = arith.constant 0 : index
    %231 = vector.load %arg7[%c12_75, %c0_76] : memref<16x64xf32, #tpu.memory_space<vmem>>, vector<2x32xf32>
    tpu.vector_store %arg7[%c12_75, %c0_76], %230 {strides = array<i32>} : memref<16x64xf32, #tpu.memory_space<vmem>>, vector<2x32xf32>,
    %232 = vector.extract_strided_slice %229 {offsets = [2, 0], sizes = [2, 32], strides = [1, 1]} : vector<4x32xf32> to vector<2x32xf32>
    %c2_77 = arith.constant 2 : index
    %c32_78 = arith.constant 32 : index
    %233 = vector.load %arg7[%c2_77, %c32_78] : memref<16x64xf32, #tpu.memory_space<vmem>>, vector<2x32xf32>
    tpu.vector_store %arg7[%c2_77, %c32_78], %232 {strides = array<i32>} : memref<16x64xf32, #tpu.memory_space<vmem>>, vector<2x32xf32>,
    %234 = arith.truncf %229 : vector<4x32xf32> to vector<4x32xbf16>
    %cst_79 = arith.constant dense<0.000000e+00> : vector<4x256xf32>
    %235 = tpu.matmul %234, %42, %cst_79 {dimension_numbers = #tpu.dot_dimension_numbers<[1], [0], [0], [1], [0, 0, 1, 1], [], []>} : vector<4x32xbf16>, vector<32x256xbf16>, vector<4x256xf32> -> vector<4x256xf32>
    %c28_80 = arith.constant 28 : index
    %c0_81 = arith.constant 0 : index
    %236 = vector.load %arg6[%c28_80, %c0_81] : memref<32x128xf32, #tpu.memory_space<vmem>>, vector<4x128xf32>
    %237 = vector.extract_strided_slice %235 {offsets = [0, 0], sizes = [4, 128], strides = [1, 1]} : vector<4x256xf32> to vector<4x128xf32>
    %238 = vector.extract_strided_slice %235 {offsets = [0, 128], sizes = [4, 128], strides = [1, 1]} : vector<4x256xf32> to vector<4x128xf32>
    %239 = arith.select %2, %237, %238 : vector<4x128xi1>, vector<4x128xf32>
    %240 = arith.addf %236, %239 : vector<4x128xf32>
    %241 = vector.extract_strided_slice %240 {offsets = [0, 0], sizes = [4, 96], strides = [1, 1]} : vector<4x128xf32> to vector<4x96xf32>
    %242 = arith.negf %241 : vector<4x96xf32>
    %243 = math.exp %242 : vector<4x96xf32>
    %cst_82 = arith.constant 1.000000e+00 : f32
    %244 = vector.broadcast %cst_82 : f32 to vector<4x96xf32>
    %245 = arith.addf %244, %243 : vector<4x96xf32>
    %246 = arith.divf %244, %245 : vector<4x96xf32>
    %247 = vector.extract_strided_slice %240 {offsets = [0, 96], sizes = [4, 32], strides = [1, 1]} : vector<4x128xf32> to vector<4x32xf32>
    %248 = math.tanh %247 : vector<4x32xf32>
    %249 = vector.extract_strided_slice %246 {offsets = [0, 32], sizes = [4, 32], strides = [1, 1]} : vector<4x96xf32> to vector<4x32xf32>
    %250 = arith.mulf %249, %226 : vector<4x32xf32>
    %251 = vector.extract_strided_slice %246 {offsets = [0, 0], sizes = [4, 32], strides = [1, 1]} : vector<4x96xf32> to vector<4x32xf32>
    %252 = arith.mulf %251, %248 : vector<4x32xf32>
    %253 = arith.addf %250, %252 : vector<4x32xf32>
    %254 = vector.extract_strided_slice %246 {offsets = [0, 64], sizes = [4, 32], strides = [1, 1]} : vector<4x96xf32> to vector<4x32xf32>
    %255 = math.tanh %253 : vector<4x32xf32>
    %256 = arith.mulf %254, %255 : vector<4x32xf32>
    %257 = vector.extract_strided_slice %256 {offsets = [0, 0], sizes = [2, 32], strides = [1, 1]} : vector<4x32xf32> to vector<2x32xf32>
    %c14_83 = arith.constant 14 : index
    %c0_84 = arith.constant 0 : index
    %258 = vector.load %arg7[%c14_83, %c0_84] : memref<16x64xf32, #tpu.memory_space<vmem>>, vector<2x32xf32>
    tpu.vector_store %arg7[%c14_83, %c0_84], %257 {strides = array<i32>} : memref<16x64xf32, #tpu.memory_space<vmem>>, vector<2x32xf32>,
    %259 = vector.extract_strided_slice %256 {offsets = [2, 0], sizes = [2, 32], strides = [1, 1]} : vector<4x32xf32> to vector<2x32xf32>
    %c0_85 = arith.constant 0 : index
    %c32_86 = arith.constant 32 : index
    %260 = vector.load %arg7[%c0_85, %c32_86] : memref<16x64xf32, #tpu.memory_space<vmem>>, vector<2x32xf32>
    tpu.vector_store %arg7[%c0_85, %c32_86], %259 {strides = array<i32>} : memref<16x64xf32, #tpu.memory_space<vmem>>, vector<2x32xf32>,
    %c0_87 = arith.constant 0 : index
    %c0_88 = arith.constant 0 : index
    %261 = vector.load %arg7[%c0_87, %c0_88] : memref<16x64xf32, #tpu.memory_space<vmem>>, vector<16x64xf32>
    %c232 = arith.constant 232 : index
    %c0_89 = arith.constant 0 : index
    %262 = vector.load %arg2[%c232, %c0_89] : memref<344x256xf32, #tpu.memory_space<vmem>>, vector<64x256xf32>
    %cst_90 = arith.constant dense<0.000000e+00> : vector<16x256xf32>
    %263 = tpu.matmul %261, %262, %cst_90 {dimension_numbers = #tpu.dot_dimension_numbers<[1], [0], [0], [1], [0, 0, 1, 1], [], []>} : vector<16x64xf32>, vector<64x256xf32>, vector<16x256xf32> -> vector<16x256xf32>
    %c336 = arith.constant 336 : index
    %c0_91 = arith.constant 0 : index
    %264 = vector.load %arg2[%c336, %c0_91] : memref<344x256xf32, #tpu.memory_space<vmem>>, vector<1x256xf32>
    %265 = vector.broadcast %264 : vector<1x256xf32> to vector<16x256xf32>
    %266 = arith.addf %263, %265 : vector<16x256xf32>
    %267 = vector.extract_strided_slice %266 {offsets = [0, 0], sizes = [2, 128], strides = [1, 1]} : vector<16x256xf32> to vector<2x128xf32>
    %c0_92 = arith.constant 0 : index
    %c0_93 = arith.constant 0 : index
    %268 = vector.load %arg6[%c0_92, %c0_93] : memref<32x128xf32, #tpu.memory_space<vmem>>, vector<2x128xf32>
    tpu.vector_store %arg6[%c0_92, %c0_93], %267 {strides = array<i32>} : memref<32x128xf32, #tpu.memory_space<vmem>>, vector<2x128xf32>,
    %269 = vector.extract_strided_slice %266 {offsets = [14, 128], sizes = [2, 128], strides = [1, 1]} : vector<16x256xf32> to vector<2x128xf32>
    %c2_94 = arith.constant 2 : index
    %c0_95 = arith.constant 0 : index
    %270 = vector.load %arg6[%c2_94, %c0_95] : memref<32x128xf32, #tpu.memory_space<vmem>>, vector<2x128xf32>
    tpu.vector_store %arg6[%c2_94, %c0_95], %269 {strides = array<i32>} : memref<32x128xf32, #tpu.memory_space<vmem>>, vector<2x128xf32>,
    %271 = vector.extract_strided_slice %266 {offsets = [2, 0], sizes = [2, 128], strides = [1, 1]} : vector<16x256xf32> to vector<2x128xf32>
    %c4_96 = arith.constant 4 : index
    %c0_97 = arith.constant 0 : index
    %272 = vector.load %arg6[%c4_96, %c0_97] : memref<32x128xf32, #tpu.memory_space<vmem>>, vector<2x128xf32>
    tpu.vector_store %arg6[%c4_96, %c0_97], %271 {strides = array<i32>} : memref<32x128xf32, #tpu.memory_space<vmem>>, vector<2x128xf32>,
    %273 = vector.extract_strided_slice %266 {offsets = [12, 128], sizes = [2, 128], strides = [1, 1]} : vector<16x256xf32> to vector<2x128xf32>
    %c6_98 = arith.constant 6 : index
    %c0_99 = arith.constant 0 : index
    %274 = vector.load %arg6[%c6_98, %c0_99] : memref<32x128xf32, #tpu.memory_space<vmem>>, vector<2x128xf32>
    tpu.vector_store %arg6[%c6_98, %c0_99], %273 {strides = array<i32>} : memref<32x128xf32, #tpu.memory_space<vmem>>, vector<2x128xf32>,
    %275 = vector.extract_strided_slice %266 {offsets = [4, 0], sizes = [2, 128], strides = [1, 1]} : vector<16x256xf32> to vector<2x128xf32>
    %c8_100 = arith.constant 8 : index
    %c0_101 = arith.constant 0 : index
    %276 = vector.load %arg6[%c8_100, %c0_101] : memref<32x128xf32, #tpu.memory_space<vmem>>, vector<2x128xf32>
    tpu.vector_store %arg6[%c8_100, %c0_101], %275 {strides = array<i32>} : memref<32x128xf32, #tpu.memory_space<vmem>>, vector<2x128xf32>,
    %277 = vector.extract_strided_slice %266 {offsets = [10, 128], sizes = [2, 128], strides = [1, 1]} : vector<16x256xf32> to vector<2x128xf32>
    %c10_102 = arith.constant 10 : index
    %c0_103 = arith.constant 0 : index
    %278 = vector.load %arg6[%c10_102, %c0_103] : memref<32x128xf32, #tpu.memory_space<vmem>>, vector<2x128xf32>
    tpu.vector_store %arg6[%c10_102, %c0_103], %277 {strides = array<i32>} : memref<32x128xf32, #tpu.memory_space<vmem>>, vector<2x128xf32>,
    %279 = vector.extract_strided_slice %266 {offsets = [6, 0], sizes = [2, 128], strides = [1, 1]} : vector<16x256xf32> to vector<2x128xf32>
    %c12_104 = arith.constant 12 : index
    %c0_105 = arith.constant 0 : index
    %280 = vector.load %arg6[%c12_104, %c0_105] : memref<32x128xf32, #tpu.memory_space<vmem>>, vector<2x128xf32>
    tpu.vector_store %arg6[%c12_104, %c0_105], %279 {strides = array<i32>} : memref<32x128xf32, #tpu.memory_space<vmem>>, vector<2x128xf32>,
    %281 = vector.extract_strided_slice %266 {offsets = [8, 128], sizes = [2, 128], strides = [1, 1]} : vector<16x256xf32> to vector<2x128xf32>
    %c14_106 = arith.constant 14 : index
    %c0_107 = arith.constant 0 : index
    %282 = vector.load %arg6[%c14_106, %c0_107] : memref<32x128xf32, #tpu.memory_space<vmem>>, vector<2x128xf32>
    tpu.vector_store %arg6[%c14_106, %c0_107], %281 {strides = array<i32>} : memref<32x128xf32, #tpu.memory_space<vmem>>, vector<2x128xf32>,
    %283 = vector.extract_strided_slice %266 {offsets = [8, 0], sizes = [2, 128], strides = [1, 1]} : vector<16x256xf32> to vector<2x128xf32>
    %c16_108 = arith.constant 16 : index
    %c0_109 = arith.constant 0 : index
    %284 = vector.load %arg6[%c16_108, %c0_109] : memref<32x128xf32, #tpu.memory_space<vmem>>, vector<2x128xf32>
    tpu.vector_store %arg6[%c16_108, %c0_109], %283 {strides = array<i32>} : memref<32x128xf32, #tpu.memory_space<vmem>>, vector<2x128xf32>,
    %285 = vector.extract_strided_slice %266 {offsets = [6, 128], sizes = [2, 128], strides = [1, 1]} : vector<16x256xf32> to vector<2x128xf32>
    %c18_110 = arith.constant 18 : index
    %c0_111 = arith.constant 0 : index
    %286 = vector.load %arg6[%c18_110, %c0_111] : memref<32x128xf32, #tpu.memory_space<vmem>>, vector<2x128xf32>
    tpu.vector_store %arg6[%c18_110, %c0_111], %285 {strides = array<i32>} : memref<32x128xf32, #tpu.memory_space<vmem>>, vector<2x128xf32>,
    %287 = vector.extract_strided_slice %266 {offsets = [10, 0], sizes = [2, 128], strides = [1, 1]} : vector<16x256xf32> to vector<2x128xf32>
    %c20_112 = arith.constant 20 : index
    %c0_113 = arith.constant 0 : index
    %288 = vector.load %arg6[%c20_112, %c0_113] : memref<32x128xf32, #tpu.memory_space<vmem>>, vector<2x128xf32>
    tpu.vector_store %arg6[%c20_112, %c0_113], %287 {strides = array<i32>} : memref<32x128xf32, #tpu.memory_space<vmem>>, vector<2x128xf32>,
    %289 = vector.extract_strided_slice %266 {offsets = [4, 128], sizes = [2, 128], strides = [1, 1]} : vector<16x256xf32> to vector<2x128xf32>
    %c22_114 = arith.constant 22 : index
    %c0_115 = arith.constant 0 : index
    %290 = vector.load %arg6[%c22_114, %c0_115] : memref<32x128xf32, #tpu.memory_space<vmem>>, vector<2x128xf32>
    tpu.vector_store %arg6[%c22_114, %c0_115], %289 {strides = array<i32>} : memref<32x128xf32, #tpu.memory_space<vmem>>, vector<2x128xf32>,
    %291 = vector.extract_strided_slice %266 {offsets = [12, 0], sizes = [2, 128], strides = [1, 1]} : vector<16x256xf32> to vector<2x128xf32>
    %c24_116 = arith.constant 24 : index
    %c0_117 = arith.constant 0 : index
    %292 = vector.load %arg6[%c24_116, %c0_117] : memref<32x128xf32, #tpu.memory_space<vmem>>, vector<2x128xf32>
    tpu.vector_store %arg6[%c24_116, %c0_117], %291 {strides = array<i32>} : memref<32x128xf32, #tpu.memory_space<vmem>>, vector<2x128xf32>,
    %293 = vector.extract_strided_slice %266 {offsets = [2, 128], sizes = [2, 128], strides = [1, 1]} : vector<16x256xf32> to vector<2x128xf32>
    %c26_118 = arith.constant 26 : index
    %c0_119 = arith.constant 0 : index
    %294 = vector.load %arg6[%c26_118, %c0_119] : memref<32x128xf32, #tpu.memory_space<vmem>>, vector<2x128xf32>
    tpu.vector_store %arg6[%c26_118, %c0_119], %293 {strides = array<i32>} : memref<32x128xf32, #tpu.memory_space<vmem>>, vector<2x128xf32>,
    %295 = vector.extract_strided_slice %266 {offsets = [14, 0], sizes = [2, 128], strides = [1, 1]} : vector<16x256xf32> to vector<2x128xf32>
    %c28_120 = arith.constant 28 : index
    %c0_121 = arith.constant 0 : index
    %296 = vector.load %arg6[%c28_120, %c0_121] : memref<32x128xf32, #tpu.memory_space<vmem>>, vector<2x128xf32>
    tpu.vector_store %arg6[%c28_120, %c0_121], %295 {strides = array<i32>} : memref<32x128xf32, #tpu.memory_space<vmem>>, vector<2x128xf32>,
    %297 = vector.extract_strided_slice %266 {offsets = [0, 128], sizes = [2, 128], strides = [1, 1]} : vector<16x256xf32> to vector<2x128xf32>
    %c30_122 = arith.constant 30 : index
    %c0_123 = arith.constant 0 : index
    %298 = vector.load %arg6[%c30_122, %c0_123] : memref<32x128xf32, #tpu.memory_space<vmem>>, vector<2x128xf32>
    tpu.vector_store %arg6[%c30_122, %c0_123], %297 {strides = array<i32>} : memref<32x128xf32, #tpu.memory_space<vmem>>, vector<2x128xf32>,
    %c296 = arith.constant 296 : index
    %c0_124 = arith.constant 0 : index
    %299 = vector.load %arg2[%c296, %c0_124] : memref<344x256xf32, #tpu.memory_space<vmem>>, vector<32x256xf32>
    %300 = arith.truncf %299 : vector<32x256xf32> to vector<32x256xbf16>
    %cst_125 = arith.constant 0.000000e+00 : f32
    %301 = vector.broadcast %cst_125 : f32 to vector<4x32xf32>
    %cst_126 = arith.constant 0.000000e+00 : f32
    %302 = vector.broadcast %cst_126 : f32 to vector<4x32xf32>
    %303 = arith.truncf %301 : vector<4x32xf32> to vector<4x32xbf16>
    %cst_127 = arith.constant dense<0.000000e+00> : vector<4x256xf32>
    %304 = tpu.matmul %303, %300, %cst_127 {dimension_numbers = #tpu.dot_dimension_numbers<[1], [0], [0], [1], [0, 0, 1, 1], [], []>} : vector<4x32xbf16>, vector<32x256xbf16>, vector<4x256xf32> -> vector<4x256xf32>
    %c0_128 = arith.constant 0 : index
    %c0_129 = arith.constant 0 : index
    %305 = vector.load %arg6[%c0_128, %c0_129] : memref<32x128xf32, #tpu.memory_space<vmem>>, vector<4x128xf32>
    %306 = vector.extract_strided_slice %304 {offsets = [0, 0], sizes = [4, 128], strides = [1, 1]} : vector<4x256xf32> to vector<4x128xf32>
    %307 = vector.extract_strided_slice %304 {offsets = [0, 128], sizes = [4, 128], strides = [1, 1]} : vector<4x256xf32> to vector<4x128xf32>
    %308 = arith.select %2, %306, %307 : vector<4x128xi1>, vector<4x128xf32>
    %309 = arith.addf %305, %308 : vector<4x128xf32>
    %310 = vector.extract_strided_slice %309 {offsets = [0, 0], sizes = [4, 96], strides = [1, 1]} : vector<4x128xf32> to vector<4x96xf32>
    %311 = arith.negf %310 : vector<4x96xf32>
    %312 = math.exp %311 : vector<4x96xf32>
    %cst_130 = arith.constant 1.000000e+00 : f32
    %313 = vector.broadcast %cst_130 : f32 to vector<4x96xf32>
    %314 = arith.addf %313, %312 : vector<4x96xf32>
    %315 = arith.divf %313, %314 : vector<4x96xf32>
    %316 = vector.extract_strided_slice %309 {offsets = [0, 96], sizes = [4, 32], strides = [1, 1]} : vector<4x128xf32> to vector<4x32xf32>
    %317 = math.tanh %316 : vector<4x32xf32>
    %318 = vector.extract_strided_slice %315 {offsets = [0, 32], sizes = [4, 32], strides = [1, 1]} : vector<4x96xf32> to vector<4x32xf32>
    %319 = arith.mulf %318, %302 : vector<4x32xf32>
    %320 = vector.extract_strided_slice %315 {offsets = [0, 0], sizes = [4, 32], strides = [1, 1]} : vector<4x96xf32> to vector<4x32xf32>
    %321 = arith.mulf %320, %317 : vector<4x32xf32>
    %322 = arith.addf %319, %321 : vector<4x32xf32>
    %323 = vector.extract_strided_slice %315 {offsets = [0, 64], sizes = [4, 32], strides = [1, 1]} : vector<4x96xf32> to vector<4x32xf32>
    %324 = math.tanh %322 : vector<4x32xf32>
    %325 = arith.mulf %323, %324 : vector<4x32xf32>
    %326 = vector.extract_strided_slice %325 {offsets = [0, 0], sizes = [2, 32], strides = [1, 1]} : vector<4x32xf32> to vector<2x32xf32>
    %c0_131 = arith.constant 0 : index
    %c0_132 = arith.constant 0 : index
    %327 = vector.load %arg8[%c0_131, %c0_132] : memref<16x64xf32, #tpu.memory_space<vmem>>, vector<2x32xf32>
    tpu.vector_store %arg8[%c0_131, %c0_132], %326 {strides = array<i32>} : memref<16x64xf32, #tpu.memory_space<vmem>>, vector<2x32xf32>,
    %328 = vector.extract_strided_slice %325 {offsets = [2, 0], sizes = [2, 32], strides = [1, 1]} : vector<4x32xf32> to vector<2x32xf32>
    %c14_133 = arith.constant 14 : index
    %c32_134 = arith.constant 32 : index
    %329 = vector.load %arg8[%c14_133, %c32_134] : memref<16x64xf32, #tpu.memory_space<vmem>>, vector<2x32xf32>
    tpu.vector_store %arg8[%c14_133, %c32_134], %328 {strides = array<i32>} : memref<16x64xf32, #tpu.memory_space<vmem>>, vector<2x32xf32>,
    %330 = arith.truncf %325 : vector<4x32xf32> to vector<4x32xbf16>
    %cst_135 = arith.constant dense<0.000000e+00> : vector<4x256xf32>
    %331 = tpu.matmul %330, %300, %cst_135 {dimension_numbers = #tpu.dot_dimension_numbers<[1], [0], [0], [1], [0, 0, 1, 1], [], []>} : vector<4x32xbf16>, vector<32x256xbf16>, vector<4x256xf32> -> vector<4x256xf32>
    %c4_136 = arith.constant 4 : index
    %c0_137 = arith.constant 0 : index
    %332 = vector.load %arg6[%c4_136, %c0_137] : memref<32x128xf32, #tpu.memory_space<vmem>>, vector<4x128xf32>
    %333 = vector.extract_strided_slice %331 {offsets = [0, 0], sizes = [4, 128], strides = [1, 1]} : vector<4x256xf32> to vector<4x128xf32>
    %334 = vector.extract_strided_slice %331 {offsets = [0, 128], sizes = [4, 128], strides = [1, 1]} : vector<4x256xf32> to vector<4x128xf32>
    %335 = arith.select %2, %333, %334 : vector<4x128xi1>, vector<4x128xf32>
    %336 = arith.addf %332, %335 : vector<4x128xf32>
    %337 = vector.extract_strided_slice %336 {offsets = [0, 0], sizes = [4, 96], strides = [1, 1]} : vector<4x128xf32> to vector<4x96xf32>
    %338 = arith.negf %337 : vector<4x96xf32>
    %339 = math.exp %338 : vector<4x96xf32>
    %cst_138 = arith.constant 1.000000e+00 : f32
    %340 = vector.broadcast %cst_138 : f32 to vector<4x96xf32>
    %341 = arith.addf %340, %339 : vector<4x96xf32>
    %342 = arith.divf %340, %341 : vector<4x96xf32>
    %343 = vector.extract_strided_slice %336 {offsets = [0, 96], sizes = [4, 32], strides = [1, 1]} : vector<4x128xf32> to vector<4x32xf32>
    %344 = math.tanh %343 : vector<4x32xf32>
    %345 = vector.extract_strided_slice %342 {offsets = [0, 32], sizes = [4, 32], strides = [1, 1]} : vector<4x96xf32> to vector<4x32xf32>
    %346 = arith.mulf %345, %322 : vector<4x32xf32>
    %347 = vector.extract_strided_slice %342 {offsets = [0, 0], sizes = [4, 32], strides = [1, 1]} : vector<4x96xf32> to vector<4x32xf32>
    %348 = arith.mulf %347, %344 : vector<4x32xf32>
    %349 = arith.addf %346, %348 : vector<4x32xf32>
    %350 = vector.extract_strided_slice %342 {offsets = [0, 64], sizes = [4, 32], strides = [1, 1]} : vector<4x96xf32> to vector<4x32xf32>
    %351 = math.tanh %349 : vector<4x32xf32>
    %352 = arith.mulf %350, %351 : vector<4x32xf32>
    %353 = vector.extract_strided_slice %352 {offsets = [0, 0], sizes = [2, 32], strides = [1, 1]} : vector<4x32xf32> to vector<2x32xf32>
    %c2_139 = arith.constant 2 : index
    %c0_140 = arith.constant 0 : index
    %354 = vector.load %arg8[%c2_139, %c0_140] : memref<16x64xf32, #tpu.memory_space<vmem>>, vector<2x32xf32>
    tpu.vector_store %arg8[%c2_139, %c0_140], %353 {strides = array<i32>} : memref<16x64xf32, #tpu.memory_space<vmem>>, vector<2x32xf32>,
    %355 = vector.extract_strided_slice %352 {offsets = [2, 0], sizes = [2, 32], strides = [1, 1]} : vector<4x32xf32> to vector<2x32xf32>
    %c12_141 = arith.constant 12 : index
    %c32_142 = arith.constant 32 : index
    %356 = vector.load %arg8[%c12_141, %c32_142] : memref<16x64xf32, #tpu.memory_space<vmem>>, vector<2x32xf32>
    tpu.vector_store %arg8[%c12_141, %c32_142], %355 {strides = array<i32>} : memref<16x64xf32, #tpu.memory_space<vmem>>, vector<2x32xf32>,
    %357 = arith.truncf %352 : vector<4x32xf32> to vector<4x32xbf16>
    %cst_143 = arith.constant dense<0.000000e+00> : vector<4x256xf32>
    %358 = tpu.matmul %357, %300, %cst_143 {dimension_numbers = #tpu.dot_dimension_numbers<[1], [0], [0], [1], [0, 0, 1, 1], [], []>} : vector<4x32xbf16>, vector<32x256xbf16>, vector<4x256xf32> -> vector<4x256xf32>
    %c8_144 = arith.constant 8 : index
    %c0_145 = arith.constant 0 : index
    %359 = vector.load %arg6[%c8_144, %c0_145] : memref<32x128xf32, #tpu.memory_space<vmem>>, vector<4x128xf32>
    %360 = vector.extract_strided_slice %358 {offsets = [0, 0], sizes = [4, 128], strides = [1, 1]} : vector<4x256xf32> to vector<4x128xf32>
    %361 = vector.extract_strided_slice %358 {offsets = [0, 128], sizes = [4, 128], strides = [1, 1]} : vector<4x256xf32> to vector<4x128xf32>
    %362 = arith.select %2, %360, %361 : vector<4x128xi1>, vector<4x128xf32>
    %363 = arith.addf %359, %362 : vector<4x128xf32>
    %364 = vector.extract_strided_slice %363 {offsets = [0, 0], sizes = [4, 96], strides = [1, 1]} : vector<4x128xf32> to vector<4x96xf32>
    %365 = arith.negf %364 : vector<4x96xf32>
    %366 = math.exp %365 : vector<4x96xf32>
    %cst_146 = arith.constant 1.000000e+00 : f32
    %367 = vector.broadcast %cst_146 : f32 to vector<4x96xf32>
    %368 = arith.addf %367, %366 : vector<4x96xf32>
    %369 = arith.divf %367, %368 : vector<4x96xf32>
    %370 = vector.extract_strided_slice %363 {offsets = [0, 96], sizes = [4, 32], strides = [1, 1]} : vector<4x128xf32> to vector<4x32xf32>
    %371 = math.tanh %370 : vector<4x32xf32>
    %372 = vector.extract_strided_slice %369 {offsets = [0, 32], sizes = [4, 32], strides = [1, 1]} : vector<4x96xf32> to vector<4x32xf32>
    %373 = arith.mulf %372, %349 : vector<4x32xf32>
    %374 = vector.extract_strided_slice %369 {offsets = [0, 0], sizes = [4, 32], strides = [1, 1]} : vector<4x96xf32> to vector<4x32xf32>
    %375 = arith.mulf %374, %371 : vector<4x32xf32>
    %376 = arith.addf %373, %375 : vector<4x32xf32>
    %377 = vector.extract_strided_slice %369 {offsets = [0, 64], sizes = [4, 32], strides = [1, 1]} : vector<4x96xf32> to vector<4x32xf32>
    %378 = math.tanh %376 : vector<4x32xf32>
    %379 = arith.mulf %377, %378 : vector<4x32xf32>
    %380 = vector.extract_strided_slice %379 {offsets = [0, 0], sizes = [2, 32], strides = [1, 1]} : vector<4x32xf32> to vector<2x32xf32>
    %c4_147 = arith.constant 4 : index
    %c0_148 = arith.constant 0 : index
    %381 = vector.load %arg8[%c4_147, %c0_148] : memref<16x64xf32, #tpu.memory_space<vmem>>, vector<2x32xf32>
    tpu.vector_store %arg8[%c4_147, %c0_148], %380 {strides = array<i32>} : memref<16x64xf32, #tpu.memory_space<vmem>>, vector<2x32xf32>,
    %382 = vector.extract_strided_slice %379 {offsets = [2, 0], sizes = [2, 32], strides = [1, 1]} : vector<4x32xf32> to vector<2x32xf32>
    %c10_149 = arith.constant 10 : index
    %c32_150 = arith.constant 32 : index
    %383 = vector.load %arg8[%c10_149, %c32_150] : memref<16x64xf32, #tpu.memory_space<vmem>>, vector<2x32xf32>
    tpu.vector_store %arg8[%c10_149, %c32_150], %382 {strides = array<i32>} : memref<16x64xf32, #tpu.memory_space<vmem>>, vector<2x32xf32>,
    %384 = arith.truncf %379 : vector<4x32xf32> to vector<4x32xbf16>
    %cst_151 = arith.constant dense<0.000000e+00> : vector<4x256xf32>
    %385 = tpu.matmul %384, %300, %cst_151 {dimension_numbers = #tpu.dot_dimension_numbers<[1], [0], [0], [1], [0, 0, 1, 1], [], []>} : vector<4x32xbf16>, vector<32x256xbf16>, vector<4x256xf32> -> vector<4x256xf32>
    %c12_152 = arith.constant 12 : index
    %c0_153 = arith.constant 0 : index
    %386 = vector.load %arg6[%c12_152, %c0_153] : memref<32x128xf32, #tpu.memory_space<vmem>>, vector<4x128xf32>
    %387 = vector.extract_strided_slice %385 {offsets = [0, 0], sizes = [4, 128], strides = [1, 1]} : vector<4x256xf32> to vector<4x128xf32>
    %388 = vector.extract_strided_slice %385 {offsets = [0, 128], sizes = [4, 128], strides = [1, 1]} : vector<4x256xf32> to vector<4x128xf32>
    %389 = arith.select %2, %387, %388 : vector<4x128xi1>, vector<4x128xf32>
    %390 = arith.addf %386, %389 : vector<4x128xf32>
    %391 = vector.extract_strided_slice %390 {offsets = [0, 0], sizes = [4, 96], strides = [1, 1]} : vector<4x128xf32> to vector<4x96xf32>
    %392 = arith.negf %391 : vector<4x96xf32>
    %393 = math.exp %392 : vector<4x96xf32>
    %cst_154 = arith.constant 1.000000e+00 : f32
    %394 = vector.broadcast %cst_154 : f32 to vector<4x96xf32>
    %395 = arith.addf %394, %393 : vector<4x96xf32>
    %396 = arith.divf %394, %395 : vector<4x96xf32>
    %397 = vector.extract_strided_slice %390 {offsets = [0, 96], sizes = [4, 32], strides = [1, 1]} : vector<4x128xf32> to vector<4x32xf32>
    %398 = math.tanh %397 : vector<4x32xf32>
    %399 = vector.extract_strided_slice %396 {offsets = [0, 32], sizes = [4, 32], strides = [1, 1]} : vector<4x96xf32> to vector<4x32xf32>
    %400 = arith.mulf %399, %376 : vector<4x32xf32>
    %401 = vector.extract_strided_slice %396 {offsets = [0, 0], sizes = [4, 32], strides = [1, 1]} : vector<4x96xf32> to vector<4x32xf32>
    %402 = arith.mulf %401, %398 : vector<4x32xf32>
    %403 = arith.addf %400, %402 : vector<4x32xf32>
    %404 = vector.extract_strided_slice %396 {offsets = [0, 64], sizes = [4, 32], strides = [1, 1]} : vector<4x96xf32> to vector<4x32xf32>
    %405 = math.tanh %403 : vector<4x32xf32>
    %406 = arith.mulf %404, %405 : vector<4x32xf32>
    %407 = vector.extract_strided_slice %406 {offsets = [0, 0], sizes = [2, 32], strides = [1, 1]} : vector<4x32xf32> to vector<2x32xf32>
    %c6_155 = arith.constant 6 : index
    %c0_156 = arith.constant 0 : index
    %408 = vector.load %arg8[%c6_155, %c0_156] : memref<16x64xf32, #tpu.memory_space<vmem>>, vector<2x32xf32>
    tpu.vector_store %arg8[%c6_155, %c0_156], %407 {strides = array<i32>} : memref<16x64xf32, #tpu.memory_space<vmem>>, vector<2x32xf32>,
    %409 = vector.extract_strided_slice %406 {offsets = [2, 0], sizes = [2, 32], strides = [1, 1]} : vector<4x32xf32> to vector<2x32xf32>
    %c8_157 = arith.constant 8 : index
    %c32_158 = arith.constant 32 : index
    %410 = vector.load %arg8[%c8_157, %c32_158] : memref<16x64xf32, #tpu.memory_space<vmem>>, vector<2x32xf32>
    tpu.vector_store %arg8[%c8_157, %c32_158], %409 {strides = array<i32>} : memref<16x64xf32, #tpu.memory_space<vmem>>, vector<2x32xf32>,
    %411 = arith.truncf %406 : vector<4x32xf32> to vector<4x32xbf16>
    %cst_159 = arith.constant dense<0.000000e+00> : vector<4x256xf32>
    %412 = tpu.matmul %411, %300, %cst_159 {dimension_numbers = #tpu.dot_dimension_numbers<[1], [0], [0], [1], [0, 0, 1, 1], [], []>} : vector<4x32xbf16>, vector<32x256xbf16>, vector<4x256xf32> -> vector<4x256xf32>
    %c16_160 = arith.constant 16 : index
    %c0_161 = arith.constant 0 : index
    %413 = vector.load %arg6[%c16_160, %c0_161] : memref<32x128xf32, #tpu.memory_space<vmem>>, vector<4x128xf32>
    %414 = vector.extract_strided_slice %412 {offsets = [0, 0], sizes = [4, 128], strides = [1, 1]} : vector<4x256xf32> to vector<4x128xf32>
    %415 = vector.extract_strided_slice %412 {offsets = [0, 128], sizes = [4, 128], strides = [1, 1]} : vector<4x256xf32> to vector<4x128xf32>
    %416 = arith.select %2, %414, %415 : vector<4x128xi1>, vector<4x128xf32>
    %417 = arith.addf %413, %416 : vector<4x128xf32>
    %418 = vector.extract_strided_slice %417 {offsets = [0, 0], sizes = [4, 96], strides = [1, 1]} : vector<4x128xf32> to vector<4x96xf32>
    %419 = arith.negf %418 : vector<4x96xf32>
    %420 = math.exp %419 : vector<4x96xf32>
    %cst_162 = arith.constant 1.000000e+00 : f32
    %421 = vector.broadcast %cst_162 : f32 to vector<4x96xf32>
    %422 = arith.addf %421, %420 : vector<4x96xf32>
    %423 = arith.divf %421, %422 : vector<4x96xf32>
    %424 = vector.extract_strided_slice %417 {offsets = [0, 96], sizes = [4, 32], strides = [1, 1]} : vector<4x128xf32> to vector<4x32xf32>
    %425 = math.tanh %424 : vector<4x32xf32>
    %426 = vector.extract_strided_slice %423 {offsets = [0, 32], sizes = [4, 32], strides = [1, 1]} : vector<4x96xf32> to vector<4x32xf32>
    %427 = arith.mulf %426, %403 : vector<4x32xf32>
    %428 = vector.extract_strided_slice %423 {offsets = [0, 0], sizes = [4, 32], strides = [1, 1]} : vector<4x96xf32> to vector<4x32xf32>
    %429 = arith.mulf %428, %425 : vector<4x32xf32>
    %430 = arith.addf %427, %429 : vector<4x32xf32>
    %431 = vector.extract_strided_slice %423 {offsets = [0, 64], sizes = [4, 32], strides = [1, 1]} : vector<4x96xf32> to vector<4x32xf32>
    %432 = math.tanh %430 : vector<4x32xf32>
    %433 = arith.mulf %431, %432 : vector<4x32xf32>
    %434 = vector.extract_strided_slice %433 {offsets = [0, 0], sizes = [2, 32], strides = [1, 1]} : vector<4x32xf32> to vector<2x32xf32>
    %c8_163 = arith.constant 8 : index
    %c0_164 = arith.constant 0 : index
    %435 = vector.load %arg8[%c8_163, %c0_164] : memref<16x64xf32, #tpu.memory_space<vmem>>, vector<2x32xf32>
    tpu.vector_store %arg8[%c8_163, %c0_164], %434 {strides = array<i32>} : memref<16x64xf32, #tpu.memory_space<vmem>>, vector<2x32xf32>,
    %436 = vector.extract_strided_slice %433 {offsets = [2, 0], sizes = [2, 32], strides = [1, 1]} : vector<4x32xf32> to vector<2x32xf32>
    %c6_165 = arith.constant 6 : index
    %c32_166 = arith.constant 32 : index
    %437 = vector.load %arg8[%c6_165, %c32_166] : memref<16x64xf32, #tpu.memory_space<vmem>>, vector<2x32xf32>
    tpu.vector_store %arg8[%c6_165, %c32_166], %436 {strides = array<i32>} : memref<16x64xf32, #tpu.memory_space<vmem>>, vector<2x32xf32>,
    %438 = arith.truncf %433 : vector<4x32xf32> to vector<4x32xbf16>
    %cst_167 = arith.constant dense<0.000000e+00> : vector<4x256xf32>
    %439 = tpu.matmul %438, %300, %cst_167 {dimension_numbers = #tpu.dot_dimension_numbers<[1], [0], [0], [1], [0, 0, 1, 1], [], []>} : vector<4x32xbf16>, vector<32x256xbf16>, vector<4x256xf32> -> vector<4x256xf32>
    %c20_168 = arith.constant 20 : index
    %c0_169 = arith.constant 0 : index
    %440 = vector.load %arg6[%c20_168, %c0_169] : memref<32x128xf32, #tpu.memory_space<vmem>>, vector<4x128xf32>
    %441 = vector.extract_strided_slice %439 {offsets = [0, 0], sizes = [4, 128], strides = [1, 1]} : vector<4x256xf32> to vector<4x128xf32>
    %442 = vector.extract_strided_slice %439 {offsets = [0, 128], sizes = [4, 128], strides = [1, 1]} : vector<4x256xf32> to vector<4x128xf32>
    %443 = arith.select %2, %441, %442 : vector<4x128xi1>, vector<4x128xf32>
    %444 = arith.addf %440, %443 : vector<4x128xf32>
    %445 = vector.extract_strided_slice %444 {offsets = [0, 0], sizes = [4, 96], strides = [1, 1]} : vector<4x128xf32> to vector<4x96xf32>
    %446 = arith.negf %445 : vector<4x96xf32>
    %447 = math.exp %446 : vector<4x96xf32>
    %cst_170 = arith.constant 1.000000e+00 : f32
    %448 = vector.broadcast %cst_170 : f32 to vector<4x96xf32>
    %449 = arith.addf %448, %447 : vector<4x96xf32>
    %450 = arith.divf %448, %449 : vector<4x96xf32>
    %451 = vector.extract_strided_slice %444 {offsets = [0, 96], sizes = [4, 32], strides = [1, 1]} : vector<4x128xf32> to vector<4x32xf32>
    %452 = math.tanh %451 : vector<4x32xf32>
    %453 = vector.extract_strided_slice %450 {offsets = [0, 32], sizes = [4, 32], strides = [1, 1]} : vector<4x96xf32> to vector<4x32xf32>
    %454 = arith.mulf %453, %430 : vector<4x32xf32>
    %455 = vector.extract_strided_slice %450 {offsets = [0, 0], sizes = [4, 32], strides = [1, 1]} : vector<4x96xf32> to vector<4x32xf32>
    %456 = arith.mulf %455, %452 : vector<4x32xf32>
    %457 = arith.addf %454, %456 : vector<4x32xf32>
    %458 = vector.extract_strided_slice %450 {offsets = [0, 64], sizes = [4, 32], strides = [1, 1]} : vector<4x96xf32> to vector<4x32xf32>
    %459 = math.tanh %457 : vector<4x32xf32>
    %460 = arith.mulf %458, %459 : vector<4x32xf32>
    %461 = vector.extract_strided_slice %460 {offsets = [0, 0], sizes = [2, 32], strides = [1, 1]} : vector<4x32xf32> to vector<2x32xf32>
    %c10_171 = arith.constant 10 : index
    %c0_172 = arith.constant 0 : index
    %462 = vector.load %arg8[%c10_171, %c0_172] : memref<16x64xf32, #tpu.memory_space<vmem>>, vector<2x32xf32>
    tpu.vector_store %arg8[%c10_171, %c0_172], %461 {strides = array<i32>} : memref<16x64xf32, #tpu.memory_space<vmem>>, vector<2x32xf32>,
    %463 = vector.extract_strided_slice %460 {offsets = [2, 0], sizes = [2, 32], strides = [1, 1]} : vector<4x32xf32> to vector<2x32xf32>
    %c4_173 = arith.constant 4 : index
    %c32_174 = arith.constant 32 : index
    %464 = vector.load %arg8[%c4_173, %c32_174] : memref<16x64xf32, #tpu.memory_space<vmem>>, vector<2x32xf32>
    tpu.vector_store %arg8[%c4_173, %c32_174], %463 {strides = array<i32>} : memref<16x64xf32, #tpu.memory_space<vmem>>, vector<2x32xf32>,
    %465 = arith.truncf %460 : vector<4x32xf32> to vector<4x32xbf16>
    %cst_175 = arith.constant dense<0.000000e+00> : vector<4x256xf32>
    %466 = tpu.matmul %465, %300, %cst_175 {dimension_numbers = #tpu.dot_dimension_numbers<[1], [0], [0], [1], [0, 0, 1, 1], [], []>} : vector<4x32xbf16>, vector<32x256xbf16>, vector<4x256xf32> -> vector<4x256xf32>
    %c24_176 = arith.constant 24 : index
    %c0_177 = arith.constant 0 : index
    %467 = vector.load %arg6[%c24_176, %c0_177] : memref<32x128xf32, #tpu.memory_space<vmem>>, vector<4x128xf32>
    %468 = vector.extract_strided_slice %466 {offsets = [0, 0], sizes = [4, 128], strides = [1, 1]} : vector<4x256xf32> to vector<4x128xf32>
    %469 = vector.extract_strided_slice %466 {offsets = [0, 128], sizes = [4, 128], strides = [1, 1]} : vector<4x256xf32> to vector<4x128xf32>
    %470 = arith.select %2, %468, %469 : vector<4x128xi1>, vector<4x128xf32>
    %471 = arith.addf %467, %470 : vector<4x128xf32>
    %472 = vector.extract_strided_slice %471 {offsets = [0, 0], sizes = [4, 96], strides = [1, 1]} : vector<4x128xf32> to vector<4x96xf32>
    %473 = arith.negf %472 : vector<4x96xf32>
    %474 = math.exp %473 : vector<4x96xf32>
    %cst_178 = arith.constant 1.000000e+00 : f32
    %475 = vector.broadcast %cst_178 : f32 to vector<4x96xf32>
    %476 = arith.addf %475, %474 : vector<4x96xf32>
    %477 = arith.divf %475, %476 : vector<4x96xf32>
    %478 = vector.extract_strided_slice %471 {offsets = [0, 96], sizes = [4, 32], strides = [1, 1]} : vector<4x128xf32> to vector<4x32xf32>
    %479 = math.tanh %478 : vector<4x32xf32>
    %480 = vector.extract_strided_slice %477 {offsets = [0, 32], sizes = [4, 32], strides = [1, 1]} : vector<4x96xf32> to vector<4x32xf32>
    %481 = arith.mulf %480, %457 : vector<4x32xf32>
    %482 = vector.extract_strided_slice %477 {offsets = [0, 0], sizes = [4, 32], strides = [1, 1]} : vector<4x96xf32> to vector<4x32xf32>
    %483 = arith.mulf %482, %479 : vector<4x32xf32>
    %484 = arith.addf %481, %483 : vector<4x32xf32>
    %485 = vector.extract_strided_slice %477 {offsets = [0, 64], sizes = [4, 32], strides = [1, 1]} : vector<4x96xf32> to vector<4x32xf32>
    %486 = math.tanh %484 : vector<4x32xf32>
    %487 = arith.mulf %485, %486 : vector<4x32xf32>
    %488 = vector.extract_strided_slice %487 {offsets = [0, 0], sizes = [2, 32], strides = [1, 1]} : vector<4x32xf32> to vector<2x32xf32>
    %c12_179 = arith.constant 12 : index
    %c0_180 = arith.constant 0 : index
    %489 = vector.load %arg8[%c12_179, %c0_180] : memref<16x64xf32, #tpu.memory_space<vmem>>, vector<2x32xf32>
    tpu.vector_store %arg8[%c12_179, %c0_180], %488 {strides = array<i32>} : memref<16x64xf32, #tpu.memory_space<vmem>>, vector<2x32xf32>,
    %490 = vector.extract_strided_slice %487 {offsets = [2, 0], sizes = [2, 32], strides = [1, 1]} : vector<4x32xf32> to vector<2x32xf32>
    %c2_181 = arith.constant 2 : index
    %c32_182 = arith.constant 32 : index
    %491 = vector.load %arg8[%c2_181, %c32_182] : memref<16x64xf32, #tpu.memory_space<vmem>>, vector<2x32xf32>
    tpu.vector_store %arg8[%c2_181, %c32_182], %490 {strides = array<i32>} : memref<16x64xf32, #tpu.memory_space<vmem>>, vector<2x32xf32>,
    %492 = arith.truncf %487 : vector<4x32xf32> to vector<4x32xbf16>
    %cst_183 = arith.constant dense<0.000000e+00> : vector<4x256xf32>
    %493 = tpu.matmul %492, %300, %cst_183 {dimension_numbers = #tpu.dot_dimension_numbers<[1], [0], [0], [1], [0, 0, 1, 1], [], []>} : vector<4x32xbf16>, vector<32x256xbf16>, vector<4x256xf32> -> vector<4x256xf32>
    %c28_184 = arith.constant 28 : index
    %c0_185 = arith.constant 0 : index
    %494 = vector.load %arg6[%c28_184, %c0_185] : memref<32x128xf32, #tpu.memory_space<vmem>>, vector<4x128xf32>
    %495 = vector.extract_strided_slice %493 {offsets = [0, 0], sizes = [4, 128], strides = [1, 1]} : vector<4x256xf32> to vector<4x128xf32>
    %496 = vector.extract_strided_slice %493 {offsets = [0, 128], sizes = [4, 128], strides = [1, 1]} : vector<4x256xf32> to vector<4x128xf32>
    %497 = arith.select %2, %495, %496 : vector<4x128xi1>, vector<4x128xf32>
    %498 = arith.addf %494, %497 : vector<4x128xf32>
    %499 = vector.extract_strided_slice %498 {offsets = [0, 0], sizes = [4, 96], strides = [1, 1]} : vector<4x128xf32> to vector<4x96xf32>
    %500 = arith.negf %499 : vector<4x96xf32>
    %501 = math.exp %500 : vector<4x96xf32>
    %cst_186 = arith.constant 1.000000e+00 : f32
    %502 = vector.broadcast %cst_186 : f32 to vector<4x96xf32>
    %503 = arith.addf %502, %501 : vector<4x96xf32>
    %504 = arith.divf %502, %503 : vector<4x96xf32>
    %505 = vector.extract_strided_slice %498 {offsets = [0, 96], sizes = [4, 32], strides = [1, 1]} : vector<4x128xf32> to vector<4x32xf32>
    %506 = math.tanh %505 : vector<4x32xf32>
    %507 = vector.extract_strided_slice %504 {offsets = [0, 32], sizes = [4, 32], strides = [1, 1]} : vector<4x96xf32> to vector<4x32xf32>
    %508 = arith.mulf %507, %484 : vector<4x32xf32>
    %509 = vector.extract_strided_slice %504 {offsets = [0, 0], sizes = [4, 32], strides = [1, 1]} : vector<4x96xf32> to vector<4x32xf32>
    %510 = arith.mulf %509, %506 : vector<4x32xf32>
    %511 = arith.addf %508, %510 : vector<4x32xf32>
    %512 = vector.extract_strided_slice %504 {offsets = [0, 64], sizes = [4, 32], strides = [1, 1]} : vector<4x96xf32> to vector<4x32xf32>
    %513 = math.tanh %511 : vector<4x32xf32>
    %514 = arith.mulf %512, %513 : vector<4x32xf32>
    %515 = vector.extract_strided_slice %514 {offsets = [0, 0], sizes = [2, 32], strides = [1, 1]} : vector<4x32xf32> to vector<2x32xf32>
    %c14_187 = arith.constant 14 : index
    %c0_188 = arith.constant 0 : index
    %516 = vector.load %arg8[%c14_187, %c0_188] : memref<16x64xf32, #tpu.memory_space<vmem>>, vector<2x32xf32>
    tpu.vector_store %arg8[%c14_187, %c0_188], %515 {strides = array<i32>} : memref<16x64xf32, #tpu.memory_space<vmem>>, vector<2x32xf32>,
    %517 = vector.extract_strided_slice %514 {offsets = [2, 0], sizes = [2, 32], strides = [1, 1]} : vector<4x32xf32> to vector<2x32xf32>
    %c0_189 = arith.constant 0 : index
    %c32_190 = arith.constant 32 : index
    %518 = vector.load %arg8[%c0_189, %c32_190] : memref<16x64xf32, #tpu.memory_space<vmem>>, vector<2x32xf32>
    tpu.vector_store %arg8[%c0_189, %c32_190], %517 {strides = array<i32>} : memref<16x64xf32, #tpu.memory_space<vmem>>, vector<2x32xf32>,
    %c0_191 = arith.constant 0 : index
    %c0_192 = arith.constant 0 : index
    %519 = vector.load %arg4[%c0_191, %c0_192] : memref<256x16xf32, #tpu.memory_space<vmem>>, vector<32x8xf32>
    %c32_193 = arith.constant 32 : index
    %c0_194 = arith.constant 0 : index
    %520 = vector.load %arg4[%c32_193, %c0_194] : memref<256x16xf32, #tpu.memory_space<vmem>>, vector<1x8xf32>
    %521 = tpu.concatenate %514, %511 in 0 : vector<4x32xf32>, vector<4x32xf32> -> vector<8x32xf32>
    %cst_195 = arith.constant dense<0.000000e+00> : vector<8x8xf32>
    %522 = tpu.matmul %521, %519, %cst_195 {dimension_numbers = #tpu.dot_dimension_numbers<[1], [0], [0], [1], [0, 0, 1, 1], [], []>} : vector<8x32xf32>, vector<32x8xf32>, vector<8x8xf32> -> vector<8x8xf32>
    %523 = vector.broadcast %520 : vector<1x8xf32> to vector<8x8xf32>
    %524 = arith.addf %522, %523 : vector<8x8xf32>
    %525 = vector.extract_strided_slice %524 {offsets = [2, 0], sizes = [2, 2], strides = [1, 1]} : vector<8x8xf32> to vector<2x2xf32>
    %526 = vector.extract_strided_slice %524 {offsets = [0, 2], sizes = [2, 2], strides = [1, 1]} : vector<8x8xf32> to vector<2x2xf32>
    %527 = tpu.concatenate %525, %526 in 1 : vector<2x2xf32>, vector<2x2xf32> -> vector<2x4xf32>
    %528 = vector.extract_strided_slice %524 {offsets = [6, 4], sizes = [2, 2], strides = [1, 1]} : vector<8x8xf32> to vector<2x2xf32>
    %529 = vector.extract_strided_slice %524 {offsets = [4, 6], sizes = [2, 2], strides = [1, 1]} : vector<8x8xf32> to vector<2x2xf32>
    %530 = tpu.concatenate %528, %529 in 1 : vector<2x2xf32>, vector<2x2xf32> -> vector<2x4xf32>
    %c104 = arith.constant 104 : index
    %c0_196 = arith.constant 0 : index
    %531 = vector.load %arg4[%c104, %c0_196] : memref<256x16xf32, #tpu.memory_space<vmem>>, vector<1x16xf32>
    %c0_197 = arith.constant 0 : index
    %c0_198 = arith.constant 0 : index
    %532 = vector.load %arg8[%c0_197, %c0_198] : memref<16x64xf32, #tpu.memory_space<vmem>>, vector<16x64xf32>
    %c40 = arith.constant 40 : index
    %c0_199 = arith.constant 0 : index
    %533 = vector.load %arg4[%c40, %c0_199] : memref<256x16xf32, #tpu.memory_space<vmem>>, vector<64x16xf32>
    %cst_200 = arith.constant dense<0.000000e+00> : vector<16x16xf32>
    %534 = tpu.matmul %532, %533, %cst_200 {dimension_numbers = #tpu.dot_dimension_numbers<[1], [0], [0], [1], [0, 0, 1, 1], [], []>} : vector<16x64xf32>, vector<64x16xf32>, vector<16x16xf32> -> vector<16x16xf32>
    %c112 = arith.constant 112 : index
    %c0_201 = arith.constant 0 : index
    %535 = vector.load %arg4[%c112, %c0_201] : memref<256x16xf32, #tpu.memory_space<vmem>>, vector<1x16xf32>
    %536 = vector.broadcast %535 : vector<1x16xf32> to vector<16x16xf32>
    %537 = arith.addf %534, %536 : vector<16x16xf32>
    %538 = vector.extract_strided_slice %531 {offsets = [0, 0], sizes = [1, 4], strides = [1, 1]} : vector<1x16xf32> to vector<1x4xf32>
    %539 = vector.extract_strided_slice %531 {offsets = [0, 4], sizes = [1, 4], strides = [1, 1]} : vector<1x16xf32> to vector<1x4xf32>
    %540 = vector.extract_strided_slice %531 {offsets = [0, 8], sizes = [1, 4], strides = [1, 1]} : vector<1x16xf32> to vector<1x4xf32>
    %541 = vector.extract_strided_slice %531 {offsets = [0, 12], sizes = [1, 4], strides = [1, 1]} : vector<1x16xf32> to vector<1x4xf32>
    %542 = vector.extract_strided_slice %537 {offsets = [0, 0], sizes = [2, 16], strides = [1, 1]} : vector<16x16xf32> to vector<2x16xf32>
    %543 = vector.extract_strided_slice %542 {offsets = [0, 0], sizes = [2, 4], strides = [1, 1]} : vector<2x16xf32> to vector<2x4xf32>
    %544 = vector.broadcast %538 : vector<1x4xf32> to vector<2x4xf32>
    %545 = arith.mulf %527, %544 : vector<2x4xf32>
    %546 = arith.addf %543, %545 : vector<2x4xf32>
    %547 = arith.negf %546 : vector<2x4xf32>
    %548 = math.exp %547 : vector<2x4xf32>
    %cst_202 = arith.constant 1.000000e+00 : f32
    %549 = vector.broadcast %cst_202 : f32 to vector<2x4xf32>
    %550 = arith.addf %549, %548 : vector<2x4xf32>
    %551 = arith.divf %549, %550 : vector<2x4xf32>
    %552 = vector.extract_strided_slice %542 {offsets = [0, 4], sizes = [2, 4], strides = [1, 1]} : vector<2x16xf32> to vector<2x4xf32>
    %553 = vector.broadcast %539 : vector<1x4xf32> to vector<2x4xf32>
    %554 = arith.mulf %527, %553 : vector<2x4xf32>
    %555 = arith.addf %552, %554 : vector<2x4xf32>
    %556 = arith.negf %555 : vector<2x4xf32>
    %557 = math.exp %556 : vector<2x4xf32>
    %cst_203 = arith.constant 1.000000e+00 : f32
    %558 = vector.broadcast %cst_203 : f32 to vector<2x4xf32>
    %559 = arith.addf %558, %557 : vector<2x4xf32>
    %560 = arith.divf %558, %559 : vector<2x4xf32>
    %561 = vector.extract_strided_slice %542 {offsets = [0, 8], sizes = [2, 4], strides = [1, 1]} : vector<2x16xf32> to vector<2x4xf32>
    %562 = vector.broadcast %540 : vector<1x4xf32> to vector<2x4xf32>
    %563 = arith.mulf %527, %562 : vector<2x4xf32>
    %564 = arith.addf %561, %563 : vector<2x4xf32>
    %565 = arith.negf %564 : vector<2x4xf32>
    %566 = math.exp %565 : vector<2x4xf32>
    %cst_204 = arith.constant 1.000000e+00 : f32
    %567 = vector.broadcast %cst_204 : f32 to vector<2x4xf32>
    %568 = arith.addf %567, %566 : vector<2x4xf32>
    %569 = arith.divf %567, %568 : vector<2x4xf32>
    %570 = vector.extract_strided_slice %542 {offsets = [0, 12], sizes = [2, 4], strides = [1, 1]} : vector<2x16xf32> to vector<2x4xf32>
    %571 = vector.broadcast %541 : vector<1x4xf32> to vector<2x4xf32>
    %572 = arith.mulf %527, %571 : vector<2x4xf32>
    %573 = arith.addf %570, %572 : vector<2x4xf32>
    %574 = math.tanh %573 : vector<2x4xf32>
    %575 = arith.mulf %560, %530 : vector<2x4xf32>
    %576 = arith.mulf %551, %574 : vector<2x4xf32>
    %577 = arith.addf %575, %576 : vector<2x4xf32>
    %578 = math.tanh %577 : vector<2x4xf32>
    %579 = arith.mulf %569, %578 : vector<2x4xf32>
    %580 = vector.extract_strided_slice %537 {offsets = [2, 0], sizes = [2, 16], strides = [1, 1]} : vector<16x16xf32> to vector<2x16xf32>
    %581 = vector.extract_strided_slice %580 {offsets = [0, 0], sizes = [2, 4], strides = [1, 1]} : vector<2x16xf32> to vector<2x4xf32>
    %582 = vector.broadcast %538 : vector<1x4xf32> to vector<2x4xf32>
    %583 = arith.mulf %579, %582 : vector<2x4xf32>
    %584 = arith.addf %581, %583 : vector<2x4xf32>
    %585 = arith.negf %584 : vector<2x4xf32>
    %586 = math.exp %585 : vector<2x4xf32>
    %cst_205 = arith.constant 1.000000e+00 : f32
    %587 = vector.broadcast %cst_205 : f32 to vector<2x4xf32>
    %588 = arith.addf %587, %586 : vector<2x4xf32>
    %589 = arith.divf %587, %588 : vector<2x4xf32>
    %590 = vector.extract_strided_slice %580 {offsets = [0, 4], sizes = [2, 4], strides = [1, 1]} : vector<2x16xf32> to vector<2x4xf32>
    %591 = vector.broadcast %539 : vector<1x4xf32> to vector<2x4xf32>
    %592 = arith.mulf %579, %591 : vector<2x4xf32>
    %593 = arith.addf %590, %592 : vector<2x4xf32>
    %594 = arith.negf %593 : vector<2x4xf32>
    %595 = math.exp %594 : vector<2x4xf32>
    %cst_206 = arith.constant 1.000000e+00 : f32
    %596 = vector.broadcast %cst_206 : f32 to vector<2x4xf32>
    %597 = arith.addf %596, %595 : vector<2x4xf32>
    %598 = arith.divf %596, %597 : vector<2x4xf32>
    %599 = vector.extract_strided_slice %580 {offsets = [0, 8], sizes = [2, 4], strides = [1, 1]} : vector<2x16xf32> to vector<2x4xf32>
    %600 = vector.broadcast %540 : vector<1x4xf32> to vector<2x4xf32>
    %601 = arith.mulf %579, %600 : vector<2x4xf32>
    %602 = arith.addf %599, %601 : vector<2x4xf32>
    %603 = arith.negf %602 : vector<2x4xf32>
    %604 = math.exp %603 : vector<2x4xf32>
    %cst_207 = arith.constant 1.000000e+00 : f32
    %605 = vector.broadcast %cst_207 : f32 to vector<2x4xf32>
    %606 = arith.addf %605, %604 : vector<2x4xf32>
    %607 = arith.divf %605, %606 : vector<2x4xf32>
    %608 = vector.extract_strided_slice %580 {offsets = [0, 12], sizes = [2, 4], strides = [1, 1]} : vector<2x16xf32> to vector<2x4xf32>
    %609 = vector.broadcast %541 : vector<1x4xf32> to vector<2x4xf32>
    %610 = arith.mulf %579, %609 : vector<2x4xf32>
    %611 = arith.addf %608, %610 : vector<2x4xf32>
    %612 = math.tanh %611 : vector<2x4xf32>
    %613 = arith.mulf %598, %577 : vector<2x4xf32>
    %614 = arith.mulf %589, %612 : vector<2x4xf32>
    %615 = arith.addf %613, %614 : vector<2x4xf32>
    %616 = math.tanh %615 : vector<2x4xf32>
    %617 = arith.mulf %607, %616 : vector<2x4xf32>
    %618 = vector.extract_strided_slice %537 {offsets = [4, 0], sizes = [2, 16], strides = [1, 1]} : vector<16x16xf32> to vector<2x16xf32>
    %619 = vector.extract_strided_slice %618 {offsets = [0, 0], sizes = [2, 4], strides = [1, 1]} : vector<2x16xf32> to vector<2x4xf32>
    %620 = vector.broadcast %538 : vector<1x4xf32> to vector<2x4xf32>
    %621 = arith.mulf %617, %620 : vector<2x4xf32>
    %622 = arith.addf %619, %621 : vector<2x4xf32>
    %623 = arith.negf %622 : vector<2x4xf32>
    %624 = math.exp %623 : vector<2x4xf32>
    %cst_208 = arith.constant 1.000000e+00 : f32
    %625 = vector.broadcast %cst_208 : f32 to vector<2x4xf32>
    %626 = arith.addf %625, %624 : vector<2x4xf32>
    %627 = arith.divf %625, %626 : vector<2x4xf32>
    %628 = vector.extract_strided_slice %618 {offsets = [0, 4], sizes = [2, 4], strides = [1, 1]} : vector<2x16xf32> to vector<2x4xf32>
    %629 = vector.broadcast %539 : vector<1x4xf32> to vector<2x4xf32>
    %630 = arith.mulf %617, %629 : vector<2x4xf32>
    %631 = arith.addf %628, %630 : vector<2x4xf32>
    %632 = arith.negf %631 : vector<2x4xf32>
    %633 = math.exp %632 : vector<2x4xf32>
    %cst_209 = arith.constant 1.000000e+00 : f32
    %634 = vector.broadcast %cst_209 : f32 to vector<2x4xf32>
    %635 = arith.addf %634, %633 : vector<2x4xf32>
    %636 = arith.divf %634, %635 : vector<2x4xf32>
    %637 = vector.extract_strided_slice %618 {offsets = [0, 8], sizes = [2, 4], strides = [1, 1]} : vector<2x16xf32> to vector<2x4xf32>
    %638 = vector.broadcast %540 : vector<1x4xf32> to vector<2x4xf32>
    %639 = arith.mulf %617, %638 : vector<2x4xf32>
    %640 = arith.addf %637, %639 : vector<2x4xf32>
    %641 = arith.negf %640 : vector<2x4xf32>
    %642 = math.exp %641 : vector<2x4xf32>
    %cst_210 = arith.constant 1.000000e+00 : f32
    %643 = vector.broadcast %cst_210 : f32 to vector<2x4xf32>
    %644 = arith.addf %643, %642 : vector<2x4xf32>
    %645 = arith.divf %643, %644 : vector<2x4xf32>
    %646 = vector.extract_strided_slice %618 {offsets = [0, 12], sizes = [2, 4], strides = [1, 1]} : vector<2x16xf32> to vector<2x4xf32>
    %647 = vector.broadcast %541 : vector<1x4xf32> to vector<2x4xf32>
    %648 = arith.mulf %617, %647 : vector<2x4xf32>
    %649 = arith.addf %646, %648 : vector<2x4xf32>
    %650 = math.tanh %649 : vector<2x4xf32>
    %651 = arith.mulf %636, %615 : vector<2x4xf32>
    %652 = arith.mulf %627, %650 : vector<2x4xf32>
    %653 = arith.addf %651, %652 : vector<2x4xf32>
    %654 = math.tanh %653 : vector<2x4xf32>
    %655 = arith.mulf %645, %654 : vector<2x4xf32>
    %656 = vector.extract_strided_slice %537 {offsets = [6, 0], sizes = [2, 16], strides = [1, 1]} : vector<16x16xf32> to vector<2x16xf32>
    %657 = vector.extract_strided_slice %656 {offsets = [0, 0], sizes = [2, 4], strides = [1, 1]} : vector<2x16xf32> to vector<2x4xf32>
    %658 = vector.broadcast %538 : vector<1x4xf32> to vector<2x4xf32>
    %659 = arith.mulf %655, %658 : vector<2x4xf32>
    %660 = arith.addf %657, %659 : vector<2x4xf32>
    %661 = arith.negf %660 : vector<2x4xf32>
    %662 = math.exp %661 : vector<2x4xf32>
    %cst_211 = arith.constant 1.000000e+00 : f32
    %663 = vector.broadcast %cst_211 : f32 to vector<2x4xf32>
    %664 = arith.addf %663, %662 : vector<2x4xf32>
    %665 = arith.divf %663, %664 : vector<2x4xf32>
    %666 = vector.extract_strided_slice %656 {offsets = [0, 4], sizes = [2, 4], strides = [1, 1]} : vector<2x16xf32> to vector<2x4xf32>
    %667 = vector.broadcast %539 : vector<1x4xf32> to vector<2x4xf32>
    %668 = arith.mulf %655, %667 : vector<2x4xf32>
    %669 = arith.addf %666, %668 : vector<2x4xf32>
    %670 = arith.negf %669 : vector<2x4xf32>
    %671 = math.exp %670 : vector<2x4xf32>
    %cst_212 = arith.constant 1.000000e+00 : f32
    %672 = vector.broadcast %cst_212 : f32 to vector<2x4xf32>
    %673 = arith.addf %672, %671 : vector<2x4xf32>
    %674 = arith.divf %672, %673 : vector<2x4xf32>
    %675 = vector.extract_strided_slice %656 {offsets = [0, 8], sizes = [2, 4], strides = [1, 1]} : vector<2x16xf32> to vector<2x4xf32>
    %676 = vector.broadcast %540 : vector<1x4xf32> to vector<2x4xf32>
    %677 = arith.mulf %655, %676 : vector<2x4xf32>
    %678 = arith.addf %675, %677 : vector<2x4xf32>
    %679 = arith.negf %678 : vector<2x4xf32>
    %680 = math.exp %679 : vector<2x4xf32>
    %cst_213 = arith.constant 1.000000e+00 : f32
    %681 = vector.broadcast %cst_213 : f32 to vector<2x4xf32>
    %682 = arith.addf %681, %680 : vector<2x4xf32>
    %683 = arith.divf %681, %682 : vector<2x4xf32>
    %684 = vector.extract_strided_slice %656 {offsets = [0, 12], sizes = [2, 4], strides = [1, 1]} : vector<2x16xf32> to vector<2x4xf32>
    %685 = vector.broadcast %541 : vector<1x4xf32> to vector<2x4xf32>
    %686 = arith.mulf %655, %685 : vector<2x4xf32>
    %687 = arith.addf %684, %686 : vector<2x4xf32>
    %688 = math.tanh %687 : vector<2x4xf32>
    %689 = arith.mulf %674, %653 : vector<2x4xf32>
    %690 = arith.mulf %665, %688 : vector<2x4xf32>
    %691 = arith.addf %689, %690 : vector<2x4xf32>
    %692 = math.tanh %691 : vector<2x4xf32>
    %693 = arith.mulf %683, %692 : vector<2x4xf32>
    %694 = vector.extract_strided_slice %537 {offsets = [8, 0], sizes = [2, 16], strides = [1, 1]} : vector<16x16xf32> to vector<2x16xf32>
    %695 = vector.extract_strided_slice %694 {offsets = [0, 0], sizes = [2, 4], strides = [1, 1]} : vector<2x16xf32> to vector<2x4xf32>
    %696 = vector.broadcast %538 : vector<1x4xf32> to vector<2x4xf32>
    %697 = arith.mulf %693, %696 : vector<2x4xf32>
    %698 = arith.addf %695, %697 : vector<2x4xf32>
    %699 = arith.negf %698 : vector<2x4xf32>
    %700 = math.exp %699 : vector<2x4xf32>
    %cst_214 = arith.constant 1.000000e+00 : f32
    %701 = vector.broadcast %cst_214 : f32 to vector<2x4xf32>
    %702 = arith.addf %701, %700 : vector<2x4xf32>
    %703 = arith.divf %701, %702 : vector<2x4xf32>
    %704 = vector.extract_strided_slice %694 {offsets = [0, 4], sizes = [2, 4], strides = [1, 1]} : vector<2x16xf32> to vector<2x4xf32>
    %705 = vector.broadcast %539 : vector<1x4xf32> to vector<2x4xf32>
    %706 = arith.mulf %693, %705 : vector<2x4xf32>
    %707 = arith.addf %704, %706 : vector<2x4xf32>
    %708 = arith.negf %707 : vector<2x4xf32>
    %709 = math.exp %708 : vector<2x4xf32>
    %cst_215 = arith.constant 1.000000e+00 : f32
    %710 = vector.broadcast %cst_215 : f32 to vector<2x4xf32>
    %711 = arith.addf %710, %709 : vector<2x4xf32>
    %712 = arith.divf %710, %711 : vector<2x4xf32>
    %713 = vector.extract_strided_slice %694 {offsets = [0, 8], sizes = [2, 4], strides = [1, 1]} : vector<2x16xf32> to vector<2x4xf32>
    %714 = vector.broadcast %540 : vector<1x4xf32> to vector<2x4xf32>
    %715 = arith.mulf %693, %714 : vector<2x4xf32>
    %716 = arith.addf %713, %715 : vector<2x4xf32>
    %717 = arith.negf %716 : vector<2x4xf32>
    %718 = math.exp %717 : vector<2x4xf32>
    %cst_216 = arith.constant 1.000000e+00 : f32
    %719 = vector.broadcast %cst_216 : f32 to vector<2x4xf32>
    %720 = arith.addf %719, %718 : vector<2x4xf32>
    %721 = arith.divf %719, %720 : vector<2x4xf32>
    %722 = vector.extract_strided_slice %694 {offsets = [0, 12], sizes = [2, 4], strides = [1, 1]} : vector<2x16xf32> to vector<2x4xf32>
    %723 = vector.broadcast %541 : vector<1x4xf32> to vector<2x4xf32>
    %724 = arith.mulf %693, %723 : vector<2x4xf32>
    %725 = arith.addf %722, %724 : vector<2x4xf32>
    %726 = math.tanh %725 : vector<2x4xf32>
    %727 = arith.mulf %712, %691 : vector<2x4xf32>
    %728 = arith.mulf %703, %726 : vector<2x4xf32>
    %729 = arith.addf %727, %728 : vector<2x4xf32>
    %730 = math.tanh %729 : vector<2x4xf32>
    %731 = arith.mulf %721, %730 : vector<2x4xf32>
    %732 = vector.extract_strided_slice %537 {offsets = [10, 0], sizes = [2, 16], strides = [1, 1]} : vector<16x16xf32> to vector<2x16xf32>
    %733 = vector.extract_strided_slice %732 {offsets = [0, 0], sizes = [2, 4], strides = [1, 1]} : vector<2x16xf32> to vector<2x4xf32>
    %734 = vector.broadcast %538 : vector<1x4xf32> to vector<2x4xf32>
    %735 = arith.mulf %731, %734 : vector<2x4xf32>
    %736 = arith.addf %733, %735 : vector<2x4xf32>
    %737 = arith.negf %736 : vector<2x4xf32>
    %738 = math.exp %737 : vector<2x4xf32>
    %cst_217 = arith.constant 1.000000e+00 : f32
    %739 = vector.broadcast %cst_217 : f32 to vector<2x4xf32>
    %740 = arith.addf %739, %738 : vector<2x4xf32>
    %741 = arith.divf %739, %740 : vector<2x4xf32>
    %742 = vector.extract_strided_slice %732 {offsets = [0, 4], sizes = [2, 4], strides = [1, 1]} : vector<2x16xf32> to vector<2x4xf32>
    %743 = vector.broadcast %539 : vector<1x4xf32> to vector<2x4xf32>
    %744 = arith.mulf %731, %743 : vector<2x4xf32>
    %745 = arith.addf %742, %744 : vector<2x4xf32>
    %746 = arith.negf %745 : vector<2x4xf32>
    %747 = math.exp %746 : vector<2x4xf32>
    %cst_218 = arith.constant 1.000000e+00 : f32
    %748 = vector.broadcast %cst_218 : f32 to vector<2x4xf32>
    %749 = arith.addf %748, %747 : vector<2x4xf32>
    %750 = arith.divf %748, %749 : vector<2x4xf32>
    %751 = vector.extract_strided_slice %732 {offsets = [0, 8], sizes = [2, 4], strides = [1, 1]} : vector<2x16xf32> to vector<2x4xf32>
    %752 = vector.broadcast %540 : vector<1x4xf32> to vector<2x4xf32>
    %753 = arith.mulf %731, %752 : vector<2x4xf32>
    %754 = arith.addf %751, %753 : vector<2x4xf32>
    %755 = arith.negf %754 : vector<2x4xf32>
    %756 = math.exp %755 : vector<2x4xf32>
    %cst_219 = arith.constant 1.000000e+00 : f32
    %757 = vector.broadcast %cst_219 : f32 to vector<2x4xf32>
    %758 = arith.addf %757, %756 : vector<2x4xf32>
    %759 = arith.divf %757, %758 : vector<2x4xf32>
    %760 = vector.extract_strided_slice %732 {offsets = [0, 12], sizes = [2, 4], strides = [1, 1]} : vector<2x16xf32> to vector<2x4xf32>
    %761 = vector.broadcast %541 : vector<1x4xf32> to vector<2x4xf32>
    %762 = arith.mulf %731, %761 : vector<2x4xf32>
    %763 = arith.addf %760, %762 : vector<2x4xf32>
    %764 = math.tanh %763 : vector<2x4xf32>
    %765 = arith.mulf %750, %729 : vector<2x4xf32>
    %766 = arith.mulf %741, %764 : vector<2x4xf32>
    %767 = arith.addf %765, %766 : vector<2x4xf32>
    %768 = math.tanh %767 : vector<2x4xf32>
    %769 = arith.mulf %759, %768 : vector<2x4xf32>
    %770 = vector.extract_strided_slice %537 {offsets = [12, 0], sizes = [2, 16], strides = [1, 1]} : vector<16x16xf32> to vector<2x16xf32>
    %771 = vector.extract_strided_slice %770 {offsets = [0, 0], sizes = [2, 4], strides = [1, 1]} : vector<2x16xf32> to vector<2x4xf32>
    %772 = vector.broadcast %538 : vector<1x4xf32> to vector<2x4xf32>
    %773 = arith.mulf %769, %772 : vector<2x4xf32>
    %774 = arith.addf %771, %773 : vector<2x4xf32>
    %775 = arith.negf %774 : vector<2x4xf32>
    %776 = math.exp %775 : vector<2x4xf32>
    %cst_220 = arith.constant 1.000000e+00 : f32
    %777 = vector.broadcast %cst_220 : f32 to vector<2x4xf32>
    %778 = arith.addf %777, %776 : vector<2x4xf32>
    %779 = arith.divf %777, %778 : vector<2x4xf32>
    %780 = vector.extract_strided_slice %770 {offsets = [0, 4], sizes = [2, 4], strides = [1, 1]} : vector<2x16xf32> to vector<2x4xf32>
    %781 = vector.broadcast %539 : vector<1x4xf32> to vector<2x4xf32>
    %782 = arith.mulf %769, %781 : vector<2x4xf32>
    %783 = arith.addf %780, %782 : vector<2x4xf32>
    %784 = arith.negf %783 : vector<2x4xf32>
    %785 = math.exp %784 : vector<2x4xf32>
    %cst_221 = arith.constant 1.000000e+00 : f32
    %786 = vector.broadcast %cst_221 : f32 to vector<2x4xf32>
    %787 = arith.addf %786, %785 : vector<2x4xf32>
    %788 = arith.divf %786, %787 : vector<2x4xf32>
    %789 = vector.extract_strided_slice %770 {offsets = [0, 8], sizes = [2, 4], strides = [1, 1]} : vector<2x16xf32> to vector<2x4xf32>
    %790 = vector.broadcast %540 : vector<1x4xf32> to vector<2x4xf32>
    %791 = arith.mulf %769, %790 : vector<2x4xf32>
    %792 = arith.addf %789, %791 : vector<2x4xf32>
    %793 = arith.negf %792 : vector<2x4xf32>
    %794 = math.exp %793 : vector<2x4xf32>
    %cst_222 = arith.constant 1.000000e+00 : f32
    %795 = vector.broadcast %cst_222 : f32 to vector<2x4xf32>
    %796 = arith.addf %795, %794 : vector<2x4xf32>
    %797 = arith.divf %795, %796 : vector<2x4xf32>
    %798 = vector.extract_strided_slice %770 {offsets = [0, 12], sizes = [2, 4], strides = [1, 1]} : vector<2x16xf32> to vector<2x4xf32>
    %799 = vector.broadcast %541 : vector<1x4xf32> to vector<2x4xf32>
    %800 = arith.mulf %769, %799 : vector<2x4xf32>
    %801 = arith.addf %798, %800 : vector<2x4xf32>
    %802 = math.tanh %801 : vector<2x4xf32>
    %803 = arith.mulf %788, %767 : vector<2x4xf32>
    %804 = arith.mulf %779, %802 : vector<2x4xf32>
    %805 = arith.addf %803, %804 : vector<2x4xf32>
    %806 = math.tanh %805 : vector<2x4xf32>
    %807 = arith.mulf %797, %806 : vector<2x4xf32>
    %808 = vector.extract_strided_slice %537 {offsets = [14, 0], sizes = [2, 16], strides = [1, 1]} : vector<16x16xf32> to vector<2x16xf32>
    %809 = vector.extract_strided_slice %808 {offsets = [0, 0], sizes = [2, 4], strides = [1, 1]} : vector<2x16xf32> to vector<2x4xf32>
    %810 = vector.broadcast %538 : vector<1x4xf32> to vector<2x4xf32>
    %811 = arith.mulf %807, %810 : vector<2x4xf32>
    %812 = arith.addf %809, %811 : vector<2x4xf32>
    %813 = arith.negf %812 : vector<2x4xf32>
    %814 = math.exp %813 : vector<2x4xf32>
    %cst_223 = arith.constant 1.000000e+00 : f32
    %815 = vector.broadcast %cst_223 : f32 to vector<2x4xf32>
    %816 = arith.addf %815, %814 : vector<2x4xf32>
    %817 = arith.divf %815, %816 : vector<2x4xf32>
    %818 = vector.extract_strided_slice %808 {offsets = [0, 4], sizes = [2, 4], strides = [1, 1]} : vector<2x16xf32> to vector<2x4xf32>
    %819 = vector.broadcast %539 : vector<1x4xf32> to vector<2x4xf32>
    %820 = arith.mulf %807, %819 : vector<2x4xf32>
    %821 = arith.addf %818, %820 : vector<2x4xf32>
    %822 = arith.negf %821 : vector<2x4xf32>
    %823 = math.exp %822 : vector<2x4xf32>
    %cst_224 = arith.constant 1.000000e+00 : f32
    %824 = vector.broadcast %cst_224 : f32 to vector<2x4xf32>
    %825 = arith.addf %824, %823 : vector<2x4xf32>
    %826 = arith.divf %824, %825 : vector<2x4xf32>
    %827 = vector.extract_strided_slice %808 {offsets = [0, 8], sizes = [2, 4], strides = [1, 1]} : vector<2x16xf32> to vector<2x4xf32>
    %828 = vector.broadcast %540 : vector<1x4xf32> to vector<2x4xf32>
    %829 = arith.mulf %807, %828 : vector<2x4xf32>
    %830 = arith.addf %827, %829 : vector<2x4xf32>
    %831 = arith.negf %830 : vector<2x4xf32>
    %832 = math.exp %831 : vector<2x4xf32>
    %cst_225 = arith.constant 1.000000e+00 : f32
    %833 = vector.broadcast %cst_225 : f32 to vector<2x4xf32>
    %834 = arith.addf %833, %832 : vector<2x4xf32>
    %835 = arith.divf %833, %834 : vector<2x4xf32>
    %836 = vector.extract_strided_slice %808 {offsets = [0, 12], sizes = [2, 4], strides = [1, 1]} : vector<2x16xf32> to vector<2x4xf32>
    %837 = vector.broadcast %541 : vector<1x4xf32> to vector<2x4xf32>
    %838 = arith.mulf %807, %837 : vector<2x4xf32>
    %839 = arith.addf %836, %838 : vector<2x4xf32>
    %840 = math.tanh %839 : vector<2x4xf32>
    %841 = arith.mulf %826, %805 : vector<2x4xf32>
    %842 = arith.mulf %817, %840 : vector<2x4xf32>
    %843 = arith.addf %841, %842 : vector<2x4xf32>
    %844 = math.tanh %843 : vector<2x4xf32>
    %845 = arith.mulf %835, %844 : vector<2x4xf32>
    %846 = arith.maximumf %579, %617 : vector<2x4xf32>
    %847 = arith.maximumf %655, %693 : vector<2x4xf32>
    %848 = arith.maximumf %731, %769 : vector<2x4xf32>
    %849 = arith.maximumf %807, %845 : vector<2x4xf32>
    %850 = arith.maximumf %846, %847 : vector<2x4xf32>
    %851 = arith.maximumf %848, %849 : vector<2x4xf32>
    %852 = arith.maximumf %850, %851 : vector<2x4xf32>
    %853 = arith.subf %579, %852 : vector<2x4xf32>
    %854 = math.exp %853 : vector<2x4xf32>
    %855 = arith.subf %617, %852 : vector<2x4xf32>
    %856 = math.exp %855 : vector<2x4xf32>
    %857 = arith.subf %655, %852 : vector<2x4xf32>
    %858 = math.exp %857 : vector<2x4xf32>
    %859 = arith.subf %693, %852 : vector<2x4xf32>
    %860 = math.exp %859 : vector<2x4xf32>
    %861 = arith.subf %731, %852 : vector<2x4xf32>
    %862 = math.exp %861 : vector<2x4xf32>
    %863 = arith.subf %769, %852 : vector<2x4xf32>
    %864 = math.exp %863 : vector<2x4xf32>
    %865 = arith.subf %807, %852 : vector<2x4xf32>
    %866 = math.exp %865 : vector<2x4xf32>
    %867 = arith.subf %845, %852 : vector<2x4xf32>
    %868 = math.exp %867 : vector<2x4xf32>
    %869 = arith.addf %854, %856 : vector<2x4xf32>
    %870 = arith.addf %858, %860 : vector<2x4xf32>
    %871 = arith.addf %862, %864 : vector<2x4xf32>
    %872 = arith.addf %866, %868 : vector<2x4xf32>
    %873 = arith.addf %869, %870 : vector<2x4xf32>
    %874 = arith.addf %871, %872 : vector<2x4xf32>
    %875 = arith.addf %873, %874 : vector<2x4xf32>
    %cst_226 = arith.constant 1.000000e+00 : f32
    %876 = vector.broadcast %cst_226 : f32 to vector<2x4xf32>
    %877 = arith.divf %876, %875 : vector<2x4xf32>
    %878 = arith.mulf %854, %877 : vector<2x4xf32>
    %879 = arith.mulf %856, %877 : vector<2x4xf32>
    %880 = arith.mulf %858, %877 : vector<2x4xf32>
    %881 = arith.mulf %860, %877 : vector<2x4xf32>
    %882 = arith.mulf %862, %877 : vector<2x4xf32>
    %883 = arith.mulf %864, %877 : vector<2x4xf32>
    %884 = arith.mulf %866, %877 : vector<2x4xf32>
    %885 = arith.mulf %868, %877 : vector<2x4xf32>
    %cst_227 = arith.constant 0.000000e+00 : f32
    %886 = vector.broadcast %cst_227 : f32 to vector<2x64xf32>
    %cst_228 = arith.constant 0.000000e+00 : f32
    %887 = vector.broadcast %cst_228 : f32 to vector<2x64xf32>
    %cst_229 = arith.constant 0.000000e+00 : f32
    %888 = vector.broadcast %cst_229 : f32 to vector<2x64xf32>
    %cst_230 = arith.constant 0.000000e+00 : f32
    %889 = vector.broadcast %cst_230 : f32 to vector<2x64xf32>
    %c0_231 = arith.constant 0 : index
    %c0_232 = arith.constant 0 : index
    %890 = vector.load %arg8[%c0_231, %c0_232] : memref<16x64xf32, #tpu.memory_space<vmem>>, vector<2x64xf32>
    %891 = vector.extract_strided_slice %878 {offsets = [0, 0], sizes = [2, 1], strides = [1, 1]} : vector<2x4xf32> to vector<2x1xf32>
    %892 = vector.broadcast %891 : vector<2x1xf32> to vector<2x64xf32>
    %893 = arith.mulf %892, %890 : vector<2x64xf32>
    %894 = arith.addf %886, %893 : vector<2x64xf32>
    %895 = vector.extract_strided_slice %878 {offsets = [0, 1], sizes = [2, 1], strides = [1, 1]} : vector<2x4xf32> to vector<2x1xf32>
    %896 = vector.broadcast %895 : vector<2x1xf32> to vector<2x64xf32>
    %897 = arith.mulf %896, %890 : vector<2x64xf32>
    %898 = arith.addf %887, %897 : vector<2x64xf32>
    %899 = vector.extract_strided_slice %878 {offsets = [0, 2], sizes = [2, 1], strides = [1, 1]} : vector<2x4xf32> to vector<2x1xf32>
    %900 = vector.broadcast %899 : vector<2x1xf32> to vector<2x64xf32>
    %901 = arith.mulf %900, %890 : vector<2x64xf32>
    %902 = arith.addf %888, %901 : vector<2x64xf32>
    %903 = vector.extract_strided_slice %878 {offsets = [0, 3], sizes = [2, 1], strides = [1, 1]} : vector<2x4xf32> to vector<2x1xf32>
    %904 = vector.broadcast %903 : vector<2x1xf32> to vector<2x64xf32>
    %905 = arith.mulf %904, %890 : vector<2x64xf32>
    %906 = arith.addf %889, %905 : vector<2x64xf32>
    %c2_233 = arith.constant 2 : index
    %c0_234 = arith.constant 0 : index
    %907 = vector.load %arg8[%c2_233, %c0_234] : memref<16x64xf32, #tpu.memory_space<vmem>>, vector<2x64xf32>
    %908 = vector.extract_strided_slice %879 {offsets = [0, 0], sizes = [2, 1], strides = [1, 1]} : vector<2x4xf32> to vector<2x1xf32>
    %909 = vector.broadcast %908 : vector<2x1xf32> to vector<2x64xf32>
    %910 = arith.mulf %909, %907 : vector<2x64xf32>
    %911 = arith.addf %894, %910 : vector<2x64xf32>
    %912 = vector.extract_strided_slice %879 {offsets = [0, 1], sizes = [2, 1], strides = [1, 1]} : vector<2x4xf32> to vector<2x1xf32>
    %913 = vector.broadcast %912 : vector<2x1xf32> to vector<2x64xf32>
    %914 = arith.mulf %913, %907 : vector<2x64xf32>
    %915 = arith.addf %898, %914 : vector<2x64xf32>
    %916 = vector.extract_strided_slice %879 {offsets = [0, 2], sizes = [2, 1], strides = [1, 1]} : vector<2x4xf32> to vector<2x1xf32>
    %917 = vector.broadcast %916 : vector<2x1xf32> to vector<2x64xf32>
    %918 = arith.mulf %917, %907 : vector<2x64xf32>
    %919 = arith.addf %902, %918 : vector<2x64xf32>
    %920 = vector.extract_strided_slice %879 {offsets = [0, 3], sizes = [2, 1], strides = [1, 1]} : vector<2x4xf32> to vector<2x1xf32>
    %921 = vector.broadcast %920 : vector<2x1xf32> to vector<2x64xf32>
    %922 = arith.mulf %921, %907 : vector<2x64xf32>
    %923 = arith.addf %906, %922 : vector<2x64xf32>
    %c4_235 = arith.constant 4 : index
    %c0_236 = arith.constant 0 : index
    %924 = vector.load %arg8[%c4_235, %c0_236] : memref<16x64xf32, #tpu.memory_space<vmem>>, vector<2x64xf32>
    %925 = vector.extract_strided_slice %880 {offsets = [0, 0], sizes = [2, 1], strides = [1, 1]} : vector<2x4xf32> to vector<2x1xf32>
    %926 = vector.broadcast %925 : vector<2x1xf32> to vector<2x64xf32>
    %927 = arith.mulf %926, %924 : vector<2x64xf32>
    %928 = arith.addf %911, %927 : vector<2x64xf32>
    %929 = vector.extract_strided_slice %880 {offsets = [0, 1], sizes = [2, 1], strides = [1, 1]} : vector<2x4xf32> to vector<2x1xf32>
    %930 = vector.broadcast %929 : vector<2x1xf32> to vector<2x64xf32>
    %931 = arith.mulf %930, %924 : vector<2x64xf32>
    %932 = arith.addf %915, %931 : vector<2x64xf32>
    %933 = vector.extract_strided_slice %880 {offsets = [0, 2], sizes = [2, 1], strides = [1, 1]} : vector<2x4xf32> to vector<2x1xf32>
    %934 = vector.broadcast %933 : vector<2x1xf32> to vector<2x64xf32>
    %935 = arith.mulf %934, %924 : vector<2x64xf32>
    %936 = arith.addf %919, %935 : vector<2x64xf32>
    %937 = vector.extract_strided_slice %880 {offsets = [0, 3], sizes = [2, 1], strides = [1, 1]} : vector<2x4xf32> to vector<2x1xf32>
    %938 = vector.broadcast %937 : vector<2x1xf32> to vector<2x64xf32>
    %939 = arith.mulf %938, %924 : vector<2x64xf32>
    %940 = arith.addf %923, %939 : vector<2x64xf32>
    %c6_237 = arith.constant 6 : index
    %c0_238 = arith.constant 0 : index
    %941 = vector.load %arg8[%c6_237, %c0_238] : memref<16x64xf32, #tpu.memory_space<vmem>>, vector<2x64xf32>
    %942 = vector.extract_strided_slice %881 {offsets = [0, 0], sizes = [2, 1], strides = [1, 1]} : vector<2x4xf32> to vector<2x1xf32>
    %943 = vector.broadcast %942 : vector<2x1xf32> to vector<2x64xf32>
    %944 = arith.mulf %943, %941 : vector<2x64xf32>
    %945 = arith.addf %928, %944 : vector<2x64xf32>
    %946 = vector.extract_strided_slice %881 {offsets = [0, 1], sizes = [2, 1], strides = [1, 1]} : vector<2x4xf32> to vector<2x1xf32>
    %947 = vector.broadcast %946 : vector<2x1xf32> to vector<2x64xf32>
    %948 = arith.mulf %947, %941 : vector<2x64xf32>
    %949 = arith.addf %932, %948 : vector<2x64xf32>
    %950 = vector.extract_strided_slice %881 {offsets = [0, 2], sizes = [2, 1], strides = [1, 1]} : vector<2x4xf32> to vector<2x1xf32>
    %951 = vector.broadcast %950 : vector<2x1xf32> to vector<2x64xf32>
    %952 = arith.mulf %951, %941 : vector<2x64xf32>
    %953 = arith.addf %936, %952 : vector<2x64xf32>
    %954 = vector.extract_strided_slice %881 {offsets = [0, 3], sizes = [2, 1], strides = [1, 1]} : vector<2x4xf32> to vector<2x1xf32>
    %955 = vector.broadcast %954 : vector<2x1xf32> to vector<2x64xf32>
    %956 = arith.mulf %955, %941 : vector<2x64xf32>
    %957 = arith.addf %940, %956 : vector<2x64xf32>
    %c8_239 = arith.constant 8 : index
    %c0_240 = arith.constant 0 : index
    %958 = vector.load %arg8[%c8_239, %c0_240] : memref<16x64xf32, #tpu.memory_space<vmem>>, vector<2x64xf32>
    %959 = vector.extract_strided_slice %882 {offsets = [0, 0], sizes = [2, 1], strides = [1, 1]} : vector<2x4xf32> to vector<2x1xf32>
    %960 = vector.broadcast %959 : vector<2x1xf32> to vector<2x64xf32>
    %961 = arith.mulf %960, %958 : vector<2x64xf32>
    %962 = arith.addf %945, %961 : vector<2x64xf32>
    %963 = vector.extract_strided_slice %882 {offsets = [0, 1], sizes = [2, 1], strides = [1, 1]} : vector<2x4xf32> to vector<2x1xf32>
    %964 = vector.broadcast %963 : vector<2x1xf32> to vector<2x64xf32>
    %965 = arith.mulf %964, %958 : vector<2x64xf32>
    %966 = arith.addf %949, %965 : vector<2x64xf32>
    %967 = vector.extract_strided_slice %882 {offsets = [0, 2], sizes = [2, 1], strides = [1, 1]} : vector<2x4xf32> to vector<2x1xf32>
    %968 = vector.broadcast %967 : vector<2x1xf32> to vector<2x64xf32>
    %969 = arith.mulf %968, %958 : vector<2x64xf32>
    %970 = arith.addf %953, %969 : vector<2x64xf32>
    %971 = vector.extract_strided_slice %882 {offsets = [0, 3], sizes = [2, 1], strides = [1, 1]} : vector<2x4xf32> to vector<2x1xf32>
    %972 = vector.broadcast %971 : vector<2x1xf32> to vector<2x64xf32>
    %973 = arith.mulf %972, %958 : vector<2x64xf32>
    %974 = arith.addf %957, %973 : vector<2x64xf32>
    %c10_241 = arith.constant 10 : index
    %c0_242 = arith.constant 0 : index
    %975 = vector.load %arg8[%c10_241, %c0_242] : memref<16x64xf32, #tpu.memory_space<vmem>>, vector<2x64xf32>
    %976 = vector.extract_strided_slice %883 {offsets = [0, 0], sizes = [2, 1], strides = [1, 1]} : vector<2x4xf32> to vector<2x1xf32>
    %977 = vector.broadcast %976 : vector<2x1xf32> to vector<2x64xf32>
    %978 = arith.mulf %977, %975 : vector<2x64xf32>
    %979 = arith.addf %962, %978 : vector<2x64xf32>
    %980 = vector.extract_strided_slice %883 {offsets = [0, 1], sizes = [2, 1], strides = [1, 1]} : vector<2x4xf32> to vector<2x1xf32>
    %981 = vector.broadcast %980 : vector<2x1xf32> to vector<2x64xf32>
    %982 = arith.mulf %981, %975 : vector<2x64xf32>
    %983 = arith.addf %966, %982 : vector<2x64xf32>
    %984 = vector.extract_strided_slice %883 {offsets = [0, 2], sizes = [2, 1], strides = [1, 1]} : vector<2x4xf32> to vector<2x1xf32>
    %985 = vector.broadcast %984 : vector<2x1xf32> to vector<2x64xf32>
    %986 = arith.mulf %985, %975 : vector<2x64xf32>
    %987 = arith.addf %970, %986 : vector<2x64xf32>
    %988 = vector.extract_strided_slice %883 {offsets = [0, 3], sizes = [2, 1], strides = [1, 1]} : vector<2x4xf32> to vector<2x1xf32>
    %989 = vector.broadcast %988 : vector<2x1xf32> to vector<2x64xf32>
    %990 = arith.mulf %989, %975 : vector<2x64xf32>
    %991 = arith.addf %974, %990 : vector<2x64xf32>
    %c12_243 = arith.constant 12 : index
    %c0_244 = arith.constant 0 : index
    %992 = vector.load %arg8[%c12_243, %c0_244] : memref<16x64xf32, #tpu.memory_space<vmem>>, vector<2x64xf32>
    %993 = vector.extract_strided_slice %884 {offsets = [0, 0], sizes = [2, 1], strides = [1, 1]} : vector<2x4xf32> to vector<2x1xf32>
    %994 = vector.broadcast %993 : vector<2x1xf32> to vector<2x64xf32>
    %995 = arith.mulf %994, %992 : vector<2x64xf32>
    %996 = arith.addf %979, %995 : vector<2x64xf32>
    %997 = vector.extract_strided_slice %884 {offsets = [0, 1], sizes = [2, 1], strides = [1, 1]} : vector<2x4xf32> to vector<2x1xf32>
    %998 = vector.broadcast %997 : vector<2x1xf32> to vector<2x64xf32>
    %999 = arith.mulf %998, %992 : vector<2x64xf32>
    %1000 = arith.addf %983, %999 : vector<2x64xf32>
    %1001 = vector.extract_strided_slice %884 {offsets = [0, 2], sizes = [2, 1], strides = [1, 1]} : vector<2x4xf32> to vector<2x1xf32>
    %1002 = vector.broadcast %1001 : vector<2x1xf32> to vector<2x64xf32>
    %1003 = arith.mulf %1002, %992 : vector<2x64xf32>
    %1004 = arith.addf %987, %1003 : vector<2x64xf32>
    %1005 = vector.extract_strided_slice %884 {offsets = [0, 3], sizes = [2, 1], strides = [1, 1]} : vector<2x4xf32> to vector<2x1xf32>
    %1006 = vector.broadcast %1005 : vector<2x1xf32> to vector<2x64xf32>
    %1007 = arith.mulf %1006, %992 : vector<2x64xf32>
    %1008 = arith.addf %991, %1007 : vector<2x64xf32>
    %c14_245 = arith.constant 14 : index
    %c0_246 = arith.constant 0 : index
    %1009 = vector.load %arg8[%c14_245, %c0_246] : memref<16x64xf32, #tpu.memory_space<vmem>>, vector<2x64xf32>
    %1010 = vector.extract_strided_slice %885 {offsets = [0, 0], sizes = [2, 1], strides = [1, 1]} : vector<2x4xf32> to vector<2x1xf32>
    %1011 = vector.broadcast %1010 : vector<2x1xf32> to vector<2x64xf32>
    %1012 = arith.mulf %1011, %1009 : vector<2x64xf32>
    %1013 = arith.addf %996, %1012 : vector<2x64xf32>
    %1014 = vector.extract_strided_slice %885 {offsets = [0, 1], sizes = [2, 1], strides = [1, 1]} : vector<2x4xf32> to vector<2x1xf32>
    %1015 = vector.broadcast %1014 : vector<2x1xf32> to vector<2x64xf32>
    %1016 = arith.mulf %1015, %1009 : vector<2x64xf32>
    %1017 = arith.addf %1000, %1016 : vector<2x64xf32>
    %1018 = vector.extract_strided_slice %885 {offsets = [0, 2], sizes = [2, 1], strides = [1, 1]} : vector<2x4xf32> to vector<2x1xf32>
    %1019 = vector.broadcast %1018 : vector<2x1xf32> to vector<2x64xf32>
    %1020 = arith.mulf %1019, %1009 : vector<2x64xf32>
    %1021 = arith.addf %1004, %1020 : vector<2x64xf32>
    %1022 = vector.extract_strided_slice %885 {offsets = [0, 3], sizes = [2, 1], strides = [1, 1]} : vector<2x4xf32> to vector<2x1xf32>
    %1023 = vector.broadcast %1022 : vector<2x1xf32> to vector<2x64xf32>
    %1024 = arith.mulf %1023, %1009 : vector<2x64xf32>
    %1025 = arith.addf %1008, %1024 : vector<2x64xf32>
    %c0_247 = arith.constant 0 : index
    %c0_248 = arith.constant 0 : index
    %1026 = vector.load %arg1[%c0_247, %c0_248] : memref<2x20xf32, #tpu.memory_space<vmem>>, vector<2x20xf32>
    %1027 = tpu.concatenate %1013, %1017, %1021, %1025, %1026 in 1 : vector<2x64xf32>, vector<2x64xf32>, vector<2x64xf32>, vector<2x64xf32>, vector<2x20xf32> -> vector<2x276xf32>
    %c0_249 = arith.constant 0 : index
    %c0_250 = arith.constant 0 : index
    %1028 = vector.load %arg3[%c0_249, %c0_250] : memref<424x128xf32, #tpu.memory_space<vmem>>, vector<276x128xf32>
    %cst_251 = arith.constant dense<0.000000e+00> : vector<2x128xf32>
    %1029 = tpu.matmul %1027, %1028, %cst_251 {dimension_numbers = #tpu.dot_dimension_numbers<[1], [0], [0], [1], [0, 0, 1, 1], [], []>} : vector<2x276xf32>, vector<276x128xf32>, vector<2x128xf32> -> vector<2x128xf32>
    %c408 = arith.constant 408 : index
    %c0_252 = arith.constant 0 : index
    %1030 = vector.load %arg3[%c408, %c0_252] : memref<424x128xf32, #tpu.memory_space<vmem>>, vector<1x128xf32>
    %1031 = vector.broadcast %1030 : vector<1x128xf32> to vector<2x128xf32>
    %1032 = arith.addf %1029, %1031 : vector<2x128xf32>
    %cst_253 = arith.constant 0.000000e+00 : f32
    %1033 = vector.broadcast %cst_253 : f32 to vector<2x128xf32>
    %1034 = arith.maximumf %1032, %1033 : vector<2x128xf32>
    %c280 = arith.constant 280 : index
    %c0_254 = arith.constant 0 : index
    %1035 = vector.load %arg3[%c280, %c0_254] : memref<424x128xf32, #tpu.memory_space<vmem>>, vector<128x128xf32>
    %cst_255 = arith.constant dense<0.000000e+00> : vector<2x128xf32>
    %1036 = tpu.matmul %1034, %1035, %cst_255 {dimension_numbers = #tpu.dot_dimension_numbers<[1], [0], [0], [1], [0, 0, 1, 1], [], []>} : vector<2x128xf32>, vector<128x128xf32>, vector<2x128xf32> -> vector<2x128xf32>
    %c416 = arith.constant 416 : index
    %c0_256 = arith.constant 0 : index
    %1037 = vector.load %arg3[%c416, %c0_256] : memref<424x128xf32, #tpu.memory_space<vmem>>, vector<1x128xf32>
    %1038 = vector.broadcast %1037 : vector<1x128xf32> to vector<2x128xf32>
    %1039 = arith.addf %1036, %1038 : vector<2x128xf32>
    %cst_257 = arith.constant 0.000000e+00 : f32
    %1040 = vector.broadcast %cst_257 : f32 to vector<2x128xf32>
    %1041 = arith.maximumf %1039, %1040 : vector<2x128xf32>
    %c120 = arith.constant 120 : index
    %c0_258 = arith.constant 0 : index
    %1042 = vector.load %arg4[%c120, %c0_258] : memref<256x16xf32, #tpu.memory_space<vmem>>, vector<128x16xf32>
    %cst_259 = arith.constant dense<0.000000e+00> : vector<2x16xf32>
    %1043 = tpu.matmul %1041, %1042, %cst_259 {dimension_numbers = #tpu.dot_dimension_numbers<[1], [0], [0], [1], [0, 0, 1, 1], [], []>} : vector<2x128xf32>, vector<128x16xf32>, vector<2x16xf32> -> vector<2x16xf32>
    %c248 = arith.constant 248 : index
    %c0_260 = arith.constant 0 : index
    %1044 = vector.load %arg4[%c248, %c0_260] : memref<256x16xf32, #tpu.memory_space<vmem>>, vector<1x16xf32>
    %1045 = vector.broadcast %1044 : vector<1x16xf32> to vector<2x16xf32>
    %1046 = arith.addf %1043, %1045 : vector<2x16xf32>
    %1047 = arith.negf %1046 : vector<2x16xf32>
    %1048 = math.exp %1047 : vector<2x16xf32>
    %cst_261 = arith.constant 1.000000e+00 : f32
    %1049 = vector.broadcast %cst_261 : f32 to vector<2x16xf32>
    %1050 = arith.addf %1049, %1048 : vector<2x16xf32>
    %1051 = arith.divf %1049, %1050 : vector<2x16xf32>
    %c0_262 = arith.constant 0 : index
    %c0_263 = arith.constant 0 : index
    %1052 = vector.load %arg5[%c0_262, %c0_263] : memref<2x16xf32, #tpu.memory_space<vmem>>, vector<2x16xf32>
    tpu.vector_store %arg5[%c0_262, %c0_263], %1051 {strides = array<i32>} : memref<2x16xf32, #tpu.memory_space<vmem>>, vector<2x16xf32>,
    return
  }
}

</mosaic_0001>

<bundles_post_ra>
// kernel: bilstm_mh_attn.1
= control target key start
LH: loop header
LB: loop body
LE: loop exit
PB: predicated region body
PF: predicated region fallthrough
CT: control target
= control target key end

     0   :  { %10 = vsyncpa [#allocation6], 0  ;;  %s5059_s0 = inlined_call_operand.vmem [shape: f32[16,194], index: 0, kind: input, shape index: {}]   ;;  %s5060_s1 = inlined_call_operand.vmem [shape: f32[2,20], index: 1, kind: input, shape index: {}]   ;;  %s5061_s2 = inlined_call_operand.hbm [shape: f32[344,256], index: 2, kind: input, shape index: {}]   ;;  %s5062_s3 = inlined_call_operand.vmem [shape: f32[424,128], index: 3, kind: input, shape index: {}]   ;;  %s5063_s4 = inlined_call_operand.vmem [shape: f32[256,16], index: 4, kind: input, shape index: {}]   ;;  %s5064_s5 = inlined_call_operand.hbm [shape: f32[2,16], index: 5, kind: output, shape index: {}]  }
   0x1   :  { %11 = vsyncpa [#allocation7], 0  ;;  %s4057_s18 = smov [#allocation5]   ;;  %s4009_s22 = scalar_lea.hbm %s5061_s2, 11008 }
   0x2   :  { %s21_s19 = sshll.u32 %s4057_s18, 4  ;;  %p4010_p0 = scmp.ne.s32.totalorder %s5061_s2, %s4009_s22  ;;  %s22_s19 = int_to_ptr.vmem [resolvable:$true] %s21_s19 }
   0x3   :  { %p4013_p1 = scmp.lt.u32.totalorder %s4009_s22, %s5061_s2 }
   0x5   :  { %p4015_p2 = pnand %p4013_p1, %p4010_p0 }
   0x7   :  { %4018 = shalt.err (!%p4015_p2)
}
   0x8   :  { %s4019_s27 = scalar_lea.vmem %s22_s19, 11008  ;;  %p4024_p4 = scmp.lt.s32.totalorder %s22_s19, %s22_s19 }
   0x9   :  { %p4020_p3 = scmp.ne.s32.totalorder %s22_s19, %s4019_s27  ;;  %p4025_p5 = scmp.lt.s32.totalorder %s4019_s27, %s4019_s27 }
   0xb   :  { %p4026_p6 = por %p4025_p5, %p4024_p4 }
   0xd   :  { %p4027_p7 = pnand %p4026_p6, %p4020_p3 }
   0xf   :  { %4030 = shalt.err (!%p4027_p7)
}
  0x10   :  { %s4058_s28 = smov 256   ;;  %s4059_s29 = smov 16  }
  0x11   :  { %27 = dma.hbm_to_vmem [thread:$0]  %s5061_s2, 11008, %s22_s19, [#allocation6], %s4058_s28, %s4058_s28, %s4059_s29  }
  0x12   :  { %4053 = dma.done.wait [#allocation6], 11008  }
  0x13   :  { %4054 = vsyncadd [#allocation6], 4294956288  ;;  %v4060_v0 = vmov 0   ;;  %v44_v1 = vld [vmem:[#allocation5 + $0x8] sm:$0xff]  ;;  %v46_v2 = vld [vmem:[#allocation5 + $0x18] sm:$0xff]  ;;  %vm106_vm0 = vcmask 539648  }
  0x14   :  { %347 = vmatprep.mubr.bf16.mxu1 %v4060_v0  ;;  %v43_v3 = vld [vmem:[#allocation5] sm:$0xff]  ;;  %v3516_v4 = vpack.c.bf16 %v46_v2, %v44_v1  ;;  %v45_v5 = vld [vmem:[#allocation5 + $0x10] sm:$0xff]  ;;  %v48_v6 = vld [vmem:[#allocation5 + $0x28] sm:$0xff]  ;;  %vm113_vm1 = vcmask 1041408   ;;  %s4062_s14 = smov 64   ;;  %vm225_vm3 = vcmask 261120  }
  0x15   :  { %v50_v7 = vld [vmem:[#allocation5 + $0x38] sm:$0xff]  ;;  %v3518_v8 = vpack.c.bf16 %v45_v5, %v43_v3  ;;  %v47_v10 = vld [vmem:[#allocation5 + $0x20] sm:$0xff]  ;;  %v49_v11 = vld [vmem:[#allocation5 + $0x30] sm:$0xff]  ;;  %s4063_s15 = smov 96   ;;  %vm301_vm4 = vcmask 254976   ;;  %vm306_vm5 = vcmask 519426  }
  0x16   :  { %v3520_v9 = vpack.c.bf16 %v50_v7, %v48_v6  ;;  %v52_v12 = vld [vmem:[#allocation5 + $0x48] sm:$0xff]  ;;  %3517 = vmatprep.subr.bf16.mxu0 %v3516_v4  ;;  %v54_v13 = vld [vmem:[#allocation5 + $0x58] sm:$0xff]  ;;  %v3522_v14 = vpack.c.bf16 %v49_v11, %v47_v10  ;;  %v51_v16 = vld [vmem:[#allocation5 + $0x40] sm:$0xff]  ;;  %vm927_vm6 = vcmask 523264   ;;  %vm4066_vm7 = vmmov 0   ;;  %s4067_s17 = smov 116  }
  0x17   :  { %3519 = vmatpush1.bf16.msra.mxu0 %v3518_v8  ;;  %v3524_v15 = vpack.c.bf16 %v54_v13, %v52_v12  ;;  %v53_v17 = vld [vmem:[#allocation5 + $0x50] sm:$0xff]  ;;  %v56_v18 = vld [vmem:[#allocation5 + $0x68] sm:$0xff]  ;;  %v58_v19 = vld [vmem:[#allocation5 + $0x78] sm:$0xff]  ;;  %vm1714_vm8 = vcmask 1043456   ;;  %s4068_s18 = smov 124   ;;  %vm1798_vm9 = vcmask 15360  }
  0x18   :  { %3521 = vmatprep.subr.bf16.mxu0 %v3520_v9  ;;  %v3526_v20 = vpack.c.bf16 %v53_v17, %v51_v16  ;;  %v3528_v21 = vpack.c.bf16 %v58_v19, %v56_v18  ;;  %v55_v22 = vld [vmem:[#allocation5 + $0x60] sm:$0xff]  ;;  %v57_v23 = vld [vmem:[#allocation5 + $0x70] sm:$0xff]  ;;  %v60_v24 = vld [vmem:[#allocation5 + $0x88] sm:$0xff]  ;;  %s4069_s20 = smov 12   ;;  %s4070_s21 = smov 4   ;;  %vm2893_vm10 = vcmask 162816  }
  0x19   :  { %v62_v25 = vld [vmem:[#allocation5 + $0x98] sm:$0xff]  ;;  %v3530_v26 = vpack.c.bf16 %v57_v23, %v55_v22  ;;  %v59_v28 = vld [vmem:[#allocation5 + $0x80] sm:$0xff]  ;;  %v61_v29 = vld [vmem:[#allocation5 + $0x90] sm:$0xff]  ;;  %s4071_s24 = smov 120   ;;  %s4072_s25 = smov 8   ;;  %vm3230_vm11 = vcmask 123904  }
  0x1a   :  { %v3532_v27 = vpack.c.bf16 %v62_v25, %v60_v24  ;;  %v64_v30 = vld [vmem:[#allocation5 + $0xa8] sm:$0xff]  ;;  %v66_v31 = vld [vmem:[#allocation5 + $0xb8] sm:$0xff]  ;;  %v3534_v32 = vpack.c.bf16 %v61_v29, %v59_v28  ;;  %v63_v33 = vld [vmem:[#allocation5 + $0xa0] sm:$0xff]  ;;  %v36_v28 = vlaneseq  ;;  %s4077_s7 = smov [#allocation8]  }
  0x1b   :  { %3523 = vmatpush1.bf16.msra.mxu0 %v3522_v14  ;;  %v65_v34 = vld [vmem:[#allocation5 + $0xb0] sm:$0xff]  ;;  %v40_v35 = vld [vmem:[%s5059_s0 + $0x8] sm:$0xff]  ;;  %v3536_v36 = vpack.c.bf16 %v66_v31, %v64_v30  ;;  %v214_v38 = vld [vmem:[#allocation5 + $0x198] sm:$0xff]  ;;  %s3238_s8 = sshll.u32 %s4077_s7, 4  ;;  %s3239_s8 = int_to_ptr.vmem [resolvable:$true] %s3238_s8 }
  0x1c   :  { %3525 = vmatprep.subr.bf16.mxu0 %v3524_v15  ;;  %v68_v37 = vld [vmem:[#allocation5 + $0xc8] sm:$0xff]  ;;  %3249 = vmatprep.mubr.msk.f32.mxu0 %vm106_vm0, %v40_v35  ;;  %v70_v40 = vld [vmem:[#allocation5 + $0xd8] sm:$0xff]  ;;  %v213_v42 = vld [vmem:[#allocation5 + $0x190] sm:$0xff]  ;;  %v3538_v47 = vpack.c.bf16 %v65_v34, %v63_v33  ;;  %v4159_v29 = vshrl.u32 %v36_v28, 7  ;;  %p4036_p9 = scmp.lt.s32.totalorder %s3239_s8, %s3239_s8 }
  0x1d   :  { %v216_v39 = vld [vmem:[#allocation5 + $0x1a8] sm:$0xff]  ;;  %v215_v43 = vld [vmem:[#allocation5 + $0x1a0] sm:$0xff]  ;;  %v218_v45 = vld [vmem:[#allocation5 + $0x1b8] sm:$0xff]  ;;  %v3540_v51 = vpack.c.bf16 %v70_v40, %v68_v37 }
  0x1e   :  { %v4125_v41 = vpack.c.bf16 %v216_v39, %v214_v38  ;;  %v4127_v44 = vpack.c.bf16 %v215_v43, %v213_v42  ;;  %v220_v46 = vld [vmem:[#allocation5 + $0x1c8] sm:$0xff]  ;;  %v217_v49 = vld [vmem:[#allocation5 + $0x1b0] sm:$0xff]  ;;  %v219_v50 = vld [vmem:[#allocation5 + $0x1c0] sm:$0xff]  ;;  %v98_v30 = vsub.s32 0, %v4159_v29  ;;  %vm38_vm2 = vcmp.lt.s32.totalorder %v4159_v29, 2 }
  0x1f   :  { %3527 = vmatpush1.bf16.msra.mxu0 %v3526_v20  ;;  %v4129_v48 = vpack.c.bf16 %v220_v46, %v218_v45  ;;  %v67_v52 = vld [vmem:[#allocation5 + $0xc0] sm:$0xff]  ;;  %v69_v53 = vld [vmem:[#allocation5 + $0xd0] sm:$0xff]  ;;  %v72_v54 = vld [vmem:[#allocation5 + $0xe8] sm:$0xff]  ;;  %v4134_v56 = vpack.c.bf16 %v219_v50, %v217_v49 }
  0x20   :  { %3529 = vmatprep.subr.bf16.mxu0 %v3528_v21  ;;  %315 = vmatprep.subr.bf16.mxu1 %v4125_v41  ;;  %v74_v55 = vld [vmem:[#allocation5 + $0xf8] sm:$0xff]  ;;  %v3542_v57 = vpack.c.bf16 %v69_v53, %v67_v52  ;;  %v71_v59 = vld [vmem:[#allocation5 + $0xe0] sm:$0xff]  ;;  %v73_v60 = vld [vmem:[#allocation5 + $0xf0] sm:$0xff] }
  0x21   :  { %316 = vmatpush1.bf16.msra.mxu1 %v4127_v44  ;;  %v3544_v58 = vpack.c.bf16 %v74_v55, %v72_v54  ;;  %v76_v61 = vld [vmem:[#allocation5 + $0x108] sm:$0xff]  ;;  %v78_v62 = vld [vmem:[#allocation5 + $0x118] sm:$0xff]  ;;  %v3546_v63 = vpack.c.bf16 %v73_v60, %v71_v59  ;;  %v75_v2 = vld [vmem:[#allocation5 + $0x100] sm:$0xff] }
  0x22   :  { %317 = vmatprep.subr.bf16.mxu1 %v4129_v48  ;;  %v3548_v1 = vpack.c.bf16 %v78_v62, %v76_v61  ;;  %v77_v3 = vld [vmem:[#allocation5 + $0x110] sm:$0xff]  ;;  %v80_v4 = vld [vmem:[#allocation5 + $0x128] sm:$0xff]  ;;  %v82_v5 = vld [vmem:[#allocation5 + $0x138] sm:$0xff] }
  0x23   :  { %3531 = vmatpush1.bf16.msra.mxu0 %v3530_v26  ;;  %v3550_v6 = vpack.c.bf16 %v77_v3, %v75_v2  ;;  %v3552_v7 = vpack.c.bf16 %v82_v5, %v80_v4  ;;  %v79_v8 = vld [vmem:[#allocation5 + $0x120] sm:$0xff]  ;;  %v81_v9 = vld [vmem:[#allocation5 + $0x130] sm:$0xff]  ;;  %v84_v10 = vld [vmem:[#allocation5 + $0x148] sm:$0xff] }
  0x24   :  { %3533 = vmatprep.subr.bf16.mxu0 %v3532_v27  ;;  %v86_v11 = vld [vmem:[#allocation5 + $0x158] sm:$0xff]  ;;  %v3554_v12 = vpack.c.bf16 %v81_v9, %v79_v8  ;;  %v83_v14 = vld [vmem:[#allocation5 + $0x140] sm:$0xff]  ;;  %v85_v15 = vld [vmem:[#allocation5 + $0x150] sm:$0xff] }
  0x25   :  { %318 = vmatpush1.bf16.msra.mxu1 %v4134_v56  ;;  %v3556_v13 = vpack.c.bf16 %v86_v11, %v84_v10  ;;  %v88_v16 = vld [vmem:[#allocation5 + $0x168] sm:$0xff]  ;;  %v90_v17 = vld [vmem:[#allocation5 + $0x178] sm:$0xff]  ;;  %v3558_v18 = vpack.c.bf16 %v85_v15, %v83_v14  ;;  %v87_v20 = vld [vmem:[#allocation5 + $0x160] sm:$0xff] }
  0x26   :  { %399 = vmatprep.subr.bf16.mxu1 %v4125_v41  ;;  %v3560_v19 = vpack.c.bf16 %v90_v17, %v88_v16  ;;  %v89_v21 = vld [vmem:[#allocation5 + $0x170] sm:$0xff]  ;;  %v92_v23 = vld [vmem:[#allocation5 + $0x188] sm:$0x3]  ;;  %v91_v24 = vld [vmem:[#allocation5 + $0x180] sm:$0x3] }
  0x27   :  { %3535 = vmatpush1.bf16.msra.mxu0 %v3534_v32  ;;  %v3562_v22 = vpack.c.bf16 %v89_v21, %v87_v20  ;;  %v39_v25 = vld [vmem:[%s5059_s0] sm:$0xff]  ;;  %v42_v26 = vld [vmem:[%s5059_s0 + $0x18] sm:$0xff]  ;;  %v41_v27 = vld [vmem:[%s5059_s0 + $0x10] sm:$0xff]  ;;  %v102_v32 = vsub.s32 1, %v4159_v29  ;;  %s4061_s0 = smov 32  }
  0x28   :  { %3537 = vmatprep.subr.bf16.mxu0 %v3536_v36  ;;  %v94_v31 = vld [vmem:[#allocation5 + $0x290] ss:$8 sm:$0x3] }
  0x29   :  { %v99_v33 = vrot.slane %v94_v31, %v98_v30  ;;  %v103_v34 = vrot.slane %v94_v31, %v102_v32 }
  0x2b   :  { %3539 = vmatpush1.bf16.msra.mxu0 %v3538_v47 }
  0x2c   :  { %3541 = vmatprep.subr.bf16.mxu0 %v3540_v51 }
  0x2f   :  { %3543 = vmatpush1.bf16.msra.mxu0 %v3542_v57 }
  0x30   :  { %3545 = vmatprep.subr.bf16.mxu0 %v3544_v58 }
  0x33   :  { %3547 = vmatpush1.bf16.msra.mxu0 %v3546_v63 }
  0x34   :  { %3549 = vmatprep.subr.bf16.mxu0 %v3548_v1 }
  0x37   :  { %3551 = vmatpush1.bf16.msra.mxu0 %v3550_v6 }
  0x38   :  { %3553 = vmatprep.subr.bf16.mxu0 %v3552_v7 }
  0x3b   :  { %3555 = vmatpush1.bf16.msra.mxu0 %v3554_v12 }
  0x3c   :  { %3557 = vmatprep.subr.bf16.mxu0 %v3556_v13 }
  0x3f   :  { %3559 = vmatpush1.bf16.msra.mxu0 %v3558_v18 }
  0x40   :  { %3561 = vmatprep.subr.bf16.mxu0 %v3560_v19 }
  0x43   :  { %3563 = vmatpush1.bf16.msra.mxu0 %v3562_v22 }
  0x44   :  { %3247 = vmatprep.subr.msk.mxu0 %vm113_vm1, %v92_v23 }
  0x47   :  { %3248 = vmatpush1.msk.msra.mxu0 %vm113_vm1, %v91_v24 }
  0x48   :  { %185 = vmatmul.mubr.f32.vlgmr.msra.gmra.mrb[0].mxu0 %v39_v25  ;;  %229 = vmatprep.subr.bf16.mxu0 %v4125_v41 }
  0x49   :  { %3250 = vmatprep.mubr.msk.f32.mxu0 %vm106_vm0, %v42_v26  ;;  %230 = vmatpush1.bf16.msra.mxu0 %v4127_v44 }
  0x4a   :  { %231 = vmatprep.subr.bf16.mxu0 %v4129_v48 }
  0x4c   :  { %191 = vmatmul.mubr.f32.gmra.mrb[2].mxu0 %v41_v27 }
  0x4d   :  { %232 = vmatpush1.bf16.msra.mxu0 %v4134_v56  ;;  %261 = vmatprep.mubr.bf16.mxu0 %v4060_v0 }
  0x4e   :  { %819 = vmatprep.subr.bf16.mxu0 %v4125_v41 }
  0x50   :  { %262 = vmatmul.mubr.bf16.vlgmr.msra.gmra.mrb[4].mxu0 %v4060_v0 }
  0x51   :  { %820 = vmatpush1.bf16.msra.mxu0 %v4127_v44  ;;  %851 = vmatprep.mubr.bf16.mxu0 %v4060_v0 }
  0x52   :  { %821 = vmatprep.subr.bf16.mxu0 %v4129_v48 }
  0x55   :  { %822 = vmatpush1.bf16.msra.mxu0 %v4134_v56 }
 0x11b   :  { %v186_v35 = vpop.f32.mrb[0].mxu0 }
 0x11c   :  { %v187_v36 = vadd.f32 %v186_v35, %v99_v33  ;;  %v188_v37 = vpop.f32.mrb[1].mxu0 }
 0x11d   :  { %v189_v38 = vadd.f32 %v188_v37, %v103_v34 }
 0x11e   :  { %197 = vst [vmem:[#allocation2] ss:$8 sps:$4 sm:$0x33] %v187_v36   ;;  %199 = vst [vmem:[#allocation2 + $0x2] ss:$8 sps:$4 sm:$0xcc] %v187_v36  }
 0x11f   :  { %206 = vst [vmem:[#allocation2 + $0x18] ss:$-8 sps:$4 sm:$0xcc] %v189_v38   ;;  %208 = vst [vmem:[#allocation2 + $0x1e] ss:$-8 sps:$4 sm:$0x33] %v189_v38  }
 0x120   :  { %v192_v39 = vpop.f32.mrb[2].mxu0 }
 0x121   :  { %v193_v40 = vadd.f32 %v192_v39, %v99_v33  ;;  %v194_v42 = vpop.f32.mrb[3].mxu0 }
 0x122   :  { %v195_v43 = vadd.f32 %v194_v42, %v103_v34 }
 0x123   :  { %205 = vst [vmem:[#allocation2 + $0x10] ss:$8 sps:$4 sm:$0x33] %v193_v40   ;;  %207 = vst [vmem:[#allocation2 + $0x12] ss:$8 sps:$4 sm:$0xcc] %v193_v40  }
 0x124   :  { %198 = vst [vmem:[#allocation2 + $0x8] ss:$-8 sps:$4 sm:$0xcc] %v195_v43   ;;  %200 = vst [vmem:[#allocation2 + $0xe] ss:$-8 sps:$4 sm:$0x33] %v195_v43  }
 0x125   :  { %v263_v45 = vpop.f32.mrb[4].mxu0 }
 0x126   :  { %v265_v46 = vpop.f32.mrb[5].mxu0 }
 0x127   :  { %v271_v47 = vsel %vm38_vm2, %v263_v45, %v265_v46  ;;  %v267_v49 = vpop.f32.mrb[6].mxu0 }
 0x128   :  { %v268_v50 = vpop.f32.mrb[7].mxu0 }
 0x12b   :  { %v270_v51 = vld [vmem:[#allocation2] sm:$0xf]  ;;  %v356_v8 = vld [vmem:[#allocation2 + $0x4] sm:$0xf]  ;;  %v440_v33 = vld [vmem:[#allocation2 + $0x8] sm:$0xf] }
 0x12c   :  { %v272_v52 = vadd.f32 %v271_v47, %v270_v51 }
 0x12e   :  { %3731 = vtanh.f32 %v272_v52  ;;  %v3251_v54 = vmul.f32 -1.442695, %v272_v52 }
 0x130   :  { %3733 = vpow2.f32 %v3251_v54 }
 0x138   :  { %v3732_v53 = vpop.eup %3731 }
 0x139   :  { %282 = vrot.lane.b32.xlu0 %v3732_v53, %s4061_s0 }
 0x13a   :  { %v3734_v55 = vpop.eup %3733 }
 0x13b   :  { %v276_v57 = vadd.f32 1.0, %v3734_v55 }
 0x13d   :  { %3735 = vrcp.f32 %v276_v57 }
 0x147   :  { %v3736_v58 = vpop.eup %3735 }
 0x148   :  { %v280_v61 = vmul.f32 0.0, %v3736_v58 }
 0x1ab   :  { %v283_v59 = vpop.permute.xlu0 %282 }
 0x1ac   :  { %v285_v60 = vmul.f32 %v3736_v58, %v283_v59  ;;  %v524_v59 = vld [vmem:[#allocation2 + $0xc] sm:$0xf] }
 0x1ae   :  { %287 = vrot.lane.b32.xlu0 %v285_v60, %s4061_s0 }
 0x220   :  { %v288_v62 = vpop.permute.xlu0 %287 }
 0x221   :  { %v290_v63 = vadd.f32 %v288_v62, %v280_v61 }
 0x223   :  { %3737 = vtanh.f32 %v290_v63 }
 0x22d   :  { %v3738_v1 = vpop.eup %3737 }
 0x22e   :  { %293 = vrot.lane.b32.xlu1 %v3738_v1, %s4061_s0 }
 0x2a0   :  { %v294_v2 = vpop.permute.xlu1 %293 }
 0x2a1   :  { %v4173_v3 = vmul.f32 %v3736_v58, %v294_v2 }
 0x2a3   :  { %v308_v4 = vpack.c.bf16 %v4173_v3, %v4173_v3 }
 0x2a5   :  { %310 = vrot.lane.b32.xlu1 %v308_v4, %s4062_s14 }
 0x317   :  { %v311_v5 = vpop.permute.xlu1 %310 }
 0x318   :  { %3252 = vmatmul.mubr.msk.bf16.vlgmr.msra.gmra.mrb[0].mxu1 %vm225_vm3, %v311_v5 }
 0x319   :  { %400 = vmatpush1.bf16.msra.mxu1 %v4127_v44  ;;  %431 = vmatprep.mubr.bf16.mxu1 %v4060_v0 }
 0x31a   :  { %401 = vmatprep.subr.bf16.mxu1 %v4129_v48 }
 0x31d   :  { %402 = vmatpush1.bf16.msra.mxu1 %v4134_v56 }
 0x31e   :  { %483 = vmatprep.subr.bf16.mxu1 %v4125_v41 }
 0x3eb   :  { %v349_v6 = vpop.f32.mrb[0].mxu1 }
 0x3ec   :  { %v351_v7 = vpop.f32.mrb[1].mxu1 }
 0x3ed   :  { %v357_v9 = vsel %vm38_vm2, %v349_v6, %v351_v7  ;;  %v353_v10 = vpop.f32.mrb[2].mxu1 }
 0x3ee   :  { %v358_v11 = vadd.f32 %v357_v9, %v356_v8  ;;  %v354_v12 = vpop.f32.mrb[3].mxu1 }
 0x3f0   :  { %3739 = vtanh.f32 %v358_v11  ;;  %v3253_v14 = vmul.f32 -1.442695, %v358_v11 }
 0x3f2   :  { %3741 = vpow2.f32 %v3253_v14 }
 0x3fa   :  { %v3740_v13 = vpop.eup %3739 }
 0x3fb   :  { %368 = vrot.lane.b32.xlu0 %v3740_v13, %s4061_s0 }
 0x3fc   :  { %v3742_v15 = vpop.eup %3741 }
 0x3fd   :  { %v362_v16 = vadd.f32 1.0, %v3742_v15 }
 0x3ff   :  { %3743 = vrcp.f32 %v362_v16 }
 0x409   :  { %v3744_v17 = vpop.eup %3743 }
 0x40a   :  { %v366_v20 = vmul.f32 %v3744_v17, %v290_v63 }
 0x46d   :  { %v369_v18 = vpop.permute.xlu0 %368 }
 0x46e   :  { %v371_v19 = vmul.f32 %v3744_v17, %v369_v18 }
 0x470   :  { %373 = vrot.lane.b32.xlu1 %v371_v19, %s4061_s0  ;;  %v608_v19 = vld [vmem:[#allocation2 + $0x10] sm:$0xf] }
 0x4e2   :  { %v374_v21 = vpop.permute.xlu1 %373 }
 0x4e3   :  { %v376_v22 = vadd.f32 %v374_v21, %v366_v20 }
 0x4e5   :  { %3745 = vtanh.f32 %v376_v22 }
 0x4ef   :  { %v3746_v23 = vpop.eup %3745 }
 0x4f0   :  { %379 = vrot.lane.b32.xlu0 %v3746_v23, %s4061_s0 }
 0x562   :  { %v380_v24 = vpop.permute.xlu0 %379 }
 0x563   :  { %v4189_v25 = vmul.f32 %v3744_v17, %v380_v24 }
 0x565   :  { %v392_v26 = vpack.c.bf16 %v4189_v25, %v4189_v25 }
 0x567   :  { %394 = vrot.lane.b32.xlu1 %v392_v26, %s4062_s14 }
 0x5d9   :  { %v395_v27 = vpop.permute.xlu1 %394 }
 0x5da   :  { %3254 = vmatmul.mubr.msk.bf16.vlgmr.msra.gmra.mrb[4].mxu1 %vm225_vm3, %v395_v27 }
 0x5db   :  { %484 = vmatpush1.bf16.msra.mxu1 %v4127_v44  ;;  %515 = vmatprep.mubr.bf16.mxu1 %v4060_v0 }
 0x5dc   :  { %485 = vmatprep.subr.bf16.mxu1 %v4129_v48 }
 0x5df   :  { %486 = vmatpush1.bf16.msra.mxu1 %v4134_v56 }
 0x5e0   :  { %567 = vmatprep.subr.bf16.mxu1 %v4125_v41 }
 0x6ad   :  { %v433_v28 = vpop.f32.mrb[4].mxu1 }
 0x6ae   :  { %v435_v31 = vpop.f32.mrb[5].mxu1 }
 0x6af   :  { %v441_v34 = vsel %vm38_vm2, %v433_v28, %v435_v31  ;;  %v437_v35 = vpop.f32.mrb[6].mxu1 }
 0x6b0   :  { %v442_v36 = vadd.f32 %v441_v34, %v440_v33  ;;  %v438_v37 = vpop.f32.mrb[7].mxu1 }
 0x6b2   :  { %3747 = vtanh.f32 %v442_v36  ;;  %v3255_v39 = vmul.f32 -1.442695, %v442_v36 }
 0x6b4   :  { %3749 = vpow2.f32 %v3255_v39 }
 0x6bc   :  { %v3748_v38 = vpop.eup %3747 }
 0x6bd   :  { %452 = vrot.lane.b32.xlu0 %v3748_v38, %s4061_s0 }
 0x6be   :  { %v3750_v40 = vpop.eup %3749 }
 0x6bf   :  { %v446_v42 = vadd.f32 1.0, %v3750_v40 }
 0x6c1   :  { %3751 = vrcp.f32 %v446_v42 }
 0x6cb   :  { %v3752_v43 = vpop.eup %3751 }
 0x6cc   :  { %v450_v47 = vmul.f32 %v3752_v43, %v376_v22 }
 0x72f   :  { %v453_v45 = vpop.permute.xlu0 %452 }
 0x730   :  { %v455_v46 = vmul.f32 %v3752_v43, %v453_v45 }
 0x732   :  { %457 = vrot.lane.b32.xlu1 %v455_v46, %s4061_s0  ;;  %v692_v46 = vld [vmem:[#allocation2 + $0x14] sm:$0xf] }
 0x7a4   :  { %v458_v49 = vpop.permute.xlu1 %457 }
 0x7a5   :  { %v460_v50 = vadd.f32 %v458_v49, %v450_v47 }
 0x7a7   :  { %3753 = vtanh.f32 %v460_v50 }
 0x7b1   :  { %v3754_v51 = vpop.eup %3753 }
 0x7b2   :  { %463 = vrot.lane.b32.xlu0 %v3754_v51, %s4061_s0 }
 0x824   :  { %v464_v52 = vpop.permute.xlu0 %463 }
 0x825   :  { %v4205_v53 = vmul.f32 %v3752_v43, %v464_v52 }
 0x827   :  { %v476_v54 = vpack.c.bf16 %v4205_v53, %v4205_v53 }
 0x829   :  { %478 = vrot.lane.b32.xlu1 %v476_v54, %s4062_s14 }
 0x89b   :  { %v479_v55 = vpop.permute.xlu1 %478 }
 0x89c   :  { %3256 = vmatmul.mubr.msk.bf16.vlgmr.msra.gmra.mrb[8].mxu1 %vm225_vm3, %v479_v55 }
 0x89d   :  { %568 = vmatpush1.bf16.msra.mxu1 %v4127_v44  ;;  %599 = vmatprep.mubr.bf16.mxu1 %v4060_v0 }
 0x89e   :  { %569 = vmatprep.subr.bf16.mxu1 %v4129_v48 }
 0x8a1   :  { %570 = vmatpush1.bf16.msra.mxu1 %v4134_v56 }
 0x8a2   :  { %651 = vmatprep.subr.bf16.mxu1 %v4125_v41 }
 0x96f   :  { %v517_v57 = vpop.f32.mrb[8].mxu1 }
 0x970   :  { %v519_v58 = vpop.f32.mrb[9].mxu1 }
 0x971   :  { %v525_v60 = vsel %vm38_vm2, %v517_v57, %v519_v58  ;;  %v521_v61 = vpop.f32.mrb[10].mxu1 }
 0x972   :  { %v526_v62 = vadd.f32 %v525_v60, %v524_v59  ;;  %v522_v63 = vpop.f32.mrb[11].mxu1 }
 0x974   :  { %3755 = vtanh.f32 %v526_v62  ;;  %v3257_v2 = vmul.f32 -1.442695, %v526_v62 }
 0x976   :  { %3757 = vpow2.f32 %v3257_v2 }
 0x97e   :  { %v3756_v1 = vpop.eup %3755 }
 0x97f   :  { %536 = vrot.lane.b32.xlu0 %v3756_v1, %s4061_s0 }
 0x980   :  { %v3758_v4 = vpop.eup %3757 }
 0x981   :  { %v530_v5 = vadd.f32 1.0, %v3758_v4 }
 0x983   :  { %3759 = vrcp.f32 %v530_v5 }
 0x98d   :  { %v3760_v6 = vpop.eup %3759 }
 0x98e   :  { %v534_v9 = vmul.f32 %v3760_v6, %v460_v50 }
 0x9f1   :  { %v537_v7 = vpop.permute.xlu0 %536 }
 0x9f2   :  { %v539_v8 = vmul.f32 %v3760_v6, %v537_v7 }
 0x9f4   :  { %541 = vrot.lane.b32.xlu1 %v539_v8, %s4061_s0 }
 0xa66   :  { %v542_v10 = vpop.permute.xlu1 %541 }
 0xa67   :  { %v544_v11 = vadd.f32 %v542_v10, %v534_v9 }
 0xa69   :  { %3761 = vtanh.f32 %v544_v11 }
 0xa73   :  { %v3762_v12 = vpop.eup %3761 }
 0xa74   :  { %547 = vrot.lane.b32.xlu0 %v3762_v12, %s4061_s0 }
 0xae6   :  { %v548_v13 = vpop.permute.xlu0 %547 }
 0xae7   :  { %v4221_v14 = vmul.f32 %v3760_v6, %v548_v13  ;;  %v776_v6 = vld [vmem:[#allocation2 + $0x18] sm:$0xf] }
 0xae9   :  { %v560_v15 = vpack.c.bf16 %v4221_v14, %v4221_v14 }
 0xaeb   :  { %562 = vrot.lane.b32.xlu1 %v560_v15, %s4062_s14 }
 0xb5d   :  { %v563_v16 = vpop.permute.xlu1 %562 }
 0xb5e   :  { %3258 = vmatmul.mubr.msk.bf16.vlgmr.msra.gmra.mrb[12].mxu1 %vm225_vm3, %v563_v16 }
 0xb5f   :  { %652 = vmatpush1.bf16.msra.mxu1 %v4127_v44  ;;  %683 = vmatprep.mubr.bf16.mxu1 %v4060_v0 }
 0xb60   :  { %653 = vmatprep.subr.bf16.mxu1 %v4129_v48 }
 0xb63   :  { %654 = vmatpush1.bf16.msra.mxu1 %v4134_v56 }
 0xb64   :  { %735 = vmatprep.subr.bf16.mxu1 %v4125_v41 }
 0xc31   :  { %v601_v17 = vpop.f32.mrb[12].mxu1 }
 0xc32   :  { %v603_v18 = vpop.f32.mrb[13].mxu1 }
 0xc33   :  { %v609_v20 = vsel %vm38_vm2, %v601_v17, %v603_v18  ;;  %v605_v21 = vpop.f32.mrb[14].mxu1 }
 0xc34   :  { %v610_v22 = vadd.f32 %v609_v20, %v608_v19  ;;  %v606_v23 = vpop.f32.mrb[15].mxu1 }
 0xc36   :  { %3763 = vtanh.f32 %v610_v22  ;;  %v3259_v26 = vmul.f32 -1.442695, %v610_v22 }
 0xc38   :  { %3765 = vpow2.f32 %v3259_v26 }
 0xc40   :  { %v3764_v24 = vpop.eup %3763 }
 0xc41   :  { %620 = vrot.lane.b32.xlu0 %v3764_v24, %s4061_s0 }
 0xc42   :  { %v3766_v27 = vpop.eup %3765 }
 0xc43   :  { %v614_v28 = vadd.f32 1.0, %v3766_v27 }
 0xc45   :  { %3767 = vrcp.f32 %v614_v28 }
 0xc4f   :  { %v3768_v31 = vpop.eup %3767 }
 0xc50   :  { %v618_v34 = vmul.f32 %v3768_v31, %v544_v11 }
 0xcb3   :  { %v621_v41 = vpop.permute.xlu0 %620 }
 0xcb4   :  { %v623_v33 = vmul.f32 %v3768_v31, %v621_v41  ;;  %v860_v41 = vld [vmem:[#allocation2 + $0x1c] sm:$0xf] }
 0xcb6   :  { %625 = vrot.lane.b32.xlu1 %v623_v33, %s4061_s0 }
 0xd28   :  { %v626_v35 = vpop.permute.xlu1 %625 }
 0xd29   :  { %v628_v36 = vadd.f32 %v626_v35, %v618_v34 }
 0xd2b   :  { %3769 = vtanh.f32 %v628_v36 }
 0xd35   :  { %v3770_v37 = vpop.eup %3769 }
 0xd36   :  { %631 = vrot.lane.b32.xlu0 %v3770_v37, %s4061_s0 }
 0xda8   :  { %v632_v38 = vpop.permute.xlu0 %631 }
 0xda9   :  { %v4237_v39 = vmul.f32 %v3768_v31, %v632_v38 }
 0xdab   :  { %v644_v40 = vpack.c.bf16 %v4237_v39, %v4237_v39 }
 0xdad   :  { %646 = vrot.lane.b32.xlu1 %v644_v40, %s4062_s14 }
 0xe1f   :  { %v647_v42 = vpop.permute.xlu1 %646 }
 0xe20   :  { %3260 = vmatmul.mubr.msk.bf16.vlgmr.msra.gmra.mrb[16].mxu1 %vm225_vm3, %v647_v42 }
 0xe21   :  { %736 = vmatpush1.bf16.msra.mxu1 %v4127_v44  ;;  %767 = vmatprep.mubr.bf16.mxu1 %v4060_v0 }
 0xe22   :  { %737 = vmatprep.subr.bf16.mxu1 %v4129_v48 }
 0xe25   :  { %738 = vmatpush1.bf16.msra.mxu1 %v4134_v56 }
 0xef3   :  { %v685_v43 = vpop.f32.mrb[16].mxu1 }
 0xef4   :  { %v687_v45 = vpop.f32.mrb[17].mxu1 }
 0xef5   :  { %v693_v47 = vsel %vm38_vm2, %v685_v43, %v687_v45  ;;  %v689_v49 = vpop.f32.mrb[18].mxu1 }
 0xef6   :  { %v694_v50 = vadd.f32 %v693_v47, %v692_v46  ;;  %v690_v51 = vpop.f32.mrb[19].mxu1 }
 0xef8   :  { %3771 = vtanh.f32 %v694_v50  ;;  %v3261_v44 = vmul.f32 -1.442695, %v694_v50 }
 0xefa   :  { %3773 = vpow2.f32 %v3261_v44 }
 0xf02   :  { %v3772_v52 = vpop.eup %3771 }
 0xf03   :  { %704 = vrot.lane.b32.xlu0 %v3772_v52, %s4061_s0 }
 0xf04   :  { %v3774_v54 = vpop.eup %3773 }
 0xf05   :  { %v698_v55 = vadd.f32 1.0, %v3774_v54 }
 0xf07   :  { %3775 = vrcp.f32 %v698_v55  ;;  %v899_v55 = vld [vmem:[#allocation5 + $0x1d8] sm:$0xff] }
 0xf11   :  { %v3776_v48 = vpop.eup %3775 }
 0xf12   :  { %v702_v58 = vmul.f32 %v3776_v48, %v628_v36 }
 0xf75   :  { %v705_v56 = vpop.permute.xlu0 %704 }
 0xf76   :  { %v707_v57 = vmul.f32 %v3776_v48, %v705_v56  ;;  %v898_v56 = vld [vmem:[#allocation5 + $0x1d0] sm:$0xff] }
 0xf78   :  { %709 = vrot.lane.b32.xlu1 %v707_v57, %s4061_s0 }
 0xfea   :  { %v710_v59 = vpop.permute.xlu1 %709 }
 0xfeb   :  { %v712_v60 = vadd.f32 %v710_v59, %v702_v58  ;;  %v900_v58 = vld [vmem:[#allocation5 + $0x1e0] sm:$0xff]  ;;  %v903_v59 = vld [vmem:[#allocation5 + $0x1f8] sm:$0xff] }
 0xfed   :  { %3777 = vtanh.f32 %v712_v60 }
 0xff7   :  { %v3778_v61 = vpop.eup %3777 }
 0xff8   :  { %715 = vrot.lane.b32.xlu0 %v3778_v61, %s4061_s0  ;;  %v3566_v61 = vpack.c.bf16 %v900_v58, %v898_v56 }
0x106a   :  { %v716_v62 = vpop.permute.xlu0 %715 }
0x106b   :  { %v4252_v63 = vmul.f32 %v3776_v48, %v716_v62  ;;  %v901_v48 = vld [vmem:[#allocation5 + $0x1e8] sm:$0xff] }
0x106c   :  { %v3564_v57 = vpack.c.bf16 %v901_v48, %v899_v55 }
0x106d   :  { %v728_v1 = vpack.c.bf16 %v4252_v63, %v4252_v63 }
0x106e   :  { %3565 = vmatprep.subr.bf16.mxu1 %v3564_v57 }
0x106f   :  { %730 = vrot.lane.b32.xlu1 %v728_v1, %s4062_s14  ;;  %v902_v1 = vld [vmem:[#allocation5 + $0x1f0] sm:$0xff] }
0x10e1   :  { %v731_v2 = vpop.permute.xlu1 %730 }
0x10e2   :  { %3262 = vmatmul.mubr.msk.bf16.vlgmr.msra.gmra.mrb[20].mxu1 %vm225_vm3, %v731_v2  ;;  %v904_v2 = vld [vmem:[#allocation5 + $0x200] sm:$0xff] }
0x10e3   :  { %3567 = vmatpush1.bf16.msra.mxu1 %v3566_v61 }
0x11b5   :  { %v769_v4 = vpop.f32.mrb[20].mxu1 }
0x11b6   :  { %v771_v5 = vpop.f32.mrb[21].mxu1 }
0x11b7   :  { %v777_v7 = vsel %vm38_vm2, %v769_v4, %v771_v5  ;;  %v773_v8 = vpop.f32.mrb[22].mxu1  ;;  %v3570_v4 = vpack.c.bf16 %v904_v2, %v902_v1  ;;  %v907_v5 = vld [vmem:[#allocation5 + $0x218] sm:$0xff] }
0x11b8   :  { %v778_v9 = vadd.f32 %v777_v7, %v776_v6  ;;  %v774_v10 = vpop.f32.mrb[23].mxu1  ;;  %v909_v6 = vld [vmem:[#allocation5 + $0x228] sm:$0xff]  ;;  %v906_v8 = vld [vmem:[#allocation5 + $0x210] sm:$0xff] }
0x11b9   :  { %v3572_v7 = vpack.c.bf16 %v909_v6, %v907_v5 }
0x11ba   :  { %3779 = vtanh.f32 %v778_v9  ;;  %v3263_v12 = vmul.f32 -1.442695, %v778_v9  ;;  %v908_v9 = vld [vmem:[#allocation5 + $0x220] sm:$0xff] }
0x11bb   :  { %v3574_v10 = vpack.c.bf16 %v908_v9, %v906_v8 }
0x11bc   :  { %3781 = vpow2.f32 %v3263_v12  ;;  %v913_v12 = vld [vmem:[#allocation5 + $0x248] sm:$0xff] }
0x11c4   :  { %v3780_v11 = vpop.eup %3779 }
0x11c5   :  { %788 = vrot.lane.b32.xlu0 %v3780_v11, %s4061_s0  ;;  %v911_v11 = vld [vmem:[#allocation5 + $0x238] sm:$0xff] }
0x11c6   :  { %v3782_v13 = vpop.eup %3781 }
0x11c7   :  { %v782_v15 = vadd.f32 1.0, %v3782_v13  ;;  %v3576_v13 = vpack.c.bf16 %v913_v12, %v911_v11 }
0x11c9   :  { %3783 = vrcp.f32 %v782_v15  ;;  %v912_v15 = vld [vmem:[#allocation5 + $0x240] sm:$0xff] }
0x11d3   :  { %v3784_v16 = vpop.eup %3783 }
0x11d4   :  { %v786_v19 = vmul.f32 %v3784_v16, %v712_v60  ;;  %v905_v60 = vld [vmem:[#allocation5 + $0x208] sm:$0xff] }
0x11d5   :  { %v3568_v62 = vpack.c.bf16 %v905_v60, %v903_v59 }
0x11d7   :  { %3569 = vmatprep.subr.bf16.mxu1 %v3568_v62 }
0x11d8   :  { %3571 = vmatpush1.bf16.msra.mxu1 %v3570_v4 }
0x11d9   :  { %3573 = vmatprep.subr.bf16.mxu1 %v3572_v7 }
0x11dc   :  { %3575 = vmatpush1.bf16.msra.mxu1 %v3574_v10 }
0x11dd   :  { %3577 = vmatprep.subr.bf16.mxu1 %v3576_v13 }
0x1237   :  { %v789_v17 = vpop.permute.xlu0 %788 }
0x1238   :  { %v791_v18 = vmul.f32 %v3784_v16, %v789_v17  ;;  %v4064_v17 = vmov 0.0  }
0x1239   :  { %998 = vmatprep.mubr.f32.mxu1 %v4064_v17 }
0x123a   :  { %793 = vrot.lane.b32.xlu1 %v791_v18, %s4061_s0 }
0x12ac   :  { %v794_v20 = vpop.permute.xlu1 %793 }
0x12ad   :  { %v796_v21 = vadd.f32 %v794_v20, %v786_v19  ;;  %v1027_v19 = vld [vmem:[#allocation5 + $0x250] sm:$0xff]  ;;  %v1029_v20 = vld [vmem:[#allocation5 + $0x260] sm:$0xff] }
0x12af   :  { %3785 = vtanh.f32 %v796_v21 }
0x12b9   :  { %v3786_v22 = vpop.eup %3785 }
0x12ba   :  { %799 = vrot.lane.b32.xlu0 %v3786_v22, %s4061_s0  ;;  %v4312_v22 = vpack.c.bf16 %v1029_v20, %v1027_v19 }
0x132c   :  { %v800_v23 = vpop.permute.xlu0 %799 }
0x132d   :  { %v802_v24 = vmul.f32 %v3784_v16, %v800_v23 }
0x132f   :  { %v812_v26 = vpack.c.bf16 %v802_v24, %v802_v24 }
0x1331   :  { %814 = vrot.lane.b32.xlu1 %v812_v26, %s4062_s14  ;;  %v1034_v26 = vld [vmem:[#allocation5 + $0x288] sm:$0xff] }
0x13a3   :  { %v815_v27 = vpop.permute.xlu1 %814 }
0x13a4   :  { %3264 = vmatmul.mubr.msk.bf16.vlgmr.msra.gmra.mrb[8].mxu0 %vm225_vm3, %v815_v27  ;;  %v1031_v27 = vld [vmem:[#allocation5 + $0x270] sm:$0xff] }
0x13a5   :  { %1071 = vmatprep.mubr.bf16.mxu0 %v4060_v0 }
0x1477   :  { %v853_v28 = vpop.f32.mrb[8].mxu0 }
0x1478   :  { %v855_v31 = vpop.f32.mrb[9].mxu0 }
0x1479   :  { %v861_v33 = vsel %vm38_vm2, %v853_v28, %v855_v31  ;;  %v857_v34 = vpop.f32.mrb[10].mxu0  ;;  %v1033_v31 = vld [vmem:[#allocation5 + $0x280] sm:$0xff] }
0x147a   :  { %v862_v35 = vadd.f32 %v861_v33, %v860_v41  ;;  %v858_v36 = vpop.f32.mrb[11].mxu0  ;;  %v4321_v33 = vpack.c.bf16 %v1033_v31, %v1031_v27 }
0x147c   :  { %3787 = vtanh.f32 %v862_v35  ;;  %v3265_v38 = vmul.f32 -1.442695, %v862_v35 }
0x147e   :  { %3789 = vpow2.f32 %v3265_v38 }
0x1486   :  { %v3788_v37 = vpop.eup %3787 }
0x1487   :  { %872 = vrot.lane.b32.xlu0 %v3788_v37, %s4061_s0 }
0x1488   :  { %v3790_v40 = vpop.eup %3789 }
0x1489   :  { %v866_v42 = vadd.f32 1.0, %v3790_v40 }
0x148b   :  { %3791 = vrcp.f32 %v866_v42 }
0x1495   :  { %v4269_v43 = vpop.eup %3791 }
0x1496   :  { %v870_v47 = vmul.f32 %v4269_v43, %v796_v21 }
0x14f9   :  { %v873_v45 = vpop.permute.xlu0 %872 }
0x14fa   :  { %v875_v46 = vmul.f32 %v4269_v43, %v873_v45 }
0x14fc   :  { %877 = vrot.lane.b32.xlu1 %v875_v46, %s4061_s0 }
0x1500   :  { %298 = vrot.lane.b32.xlu1 %v4173_v3, %s4062_s14 }
0x1504   :  { %468 = vrot.lane.b32.xlu1 %v4205_v53, %s4062_s14 }
0x1508   :  { %640 = vrot.lane.b32.xlu1 %v4237_v39, %s4063_s15 }
0x150c   :  { %808 = vrot.lane.b32.xlu1 %v802_v24, %s4063_s15 }
0x1510   :  { %303 = vrot.lane.b32.xlu1 %v4173_v3, %s4063_s15 }
0x1514   :  { %472 = vrot.lane.b32.xlu1 %v4205_v53, %s4063_s15 }
0x1518   :  { %636 = vrot.lane.b32.xlu1 %v4237_v39, %s4062_s14 }
0x151c   :  { %804 = vrot.lane.b32.xlu1 %v802_v24, %s4062_s14  ;;  %v1032_v24 = vld [vmem:[#allocation5 + $0x278] sm:$0xff] }
0x151d   :  { %v4319_v28 = vpack.c.bf16 %v1034_v26, %v1032_v24 }
0x156e   :  { %v878_v49 = vpop.permute.xlu1 %877 }
0x156f   :  { %v880_v50 = vadd.f32 %v878_v49, %v870_v47 }
0x1571   :  { %3793 = vtanh.f32 %v880_v50 }
0x1572   :  { %v299_v51 = vpop.permute.xlu1 %298 }
0x1573   :  { %302 = vst.msk [vmem:[#allocation3] sm:$0x3] %vm301_vm4, %v299_v51 }
0x1576   :  { %v469_v52 = vpop.permute.xlu1 %468 }
0x1577   :  { %471 = vst.msk [vmem:[#allocation3 + $0x4] sm:$0x3] %vm301_vm4, %v469_v52 }
0x157a   :  { %v4290_v3 = vpop.permute.xlu1 %640 }
0x157b   :  { %v3794_v53 = vpop.eup %3793 }
0x157c   :  { %883 = vrot.lane.b32.xlu0 %v3794_v53, %s4061_s0  ;;  %v915_v53 = vld [vmem:[#allocation5 + $0x2a0] ss:$8 sm:$0x3] }
0x157e   :  { %v4293_v39 = vpop.permute.xlu1 %808 }
0x1580   :  { %384 = vrot.lane.b32.xlu0 %v4189_v25, %s4062_s14 }
0x1582   :  { %v304_v44 = vpop.permute.xlu1 %303 }
0x1583   :  { %307 = vst.msk [vmem:[#allocation3 + $0xc] sm:$0xc] %vm306_vm5, %v304_v44  ;;  %v924_v44 = vrot.slane %v915_v53, %v102_v32 }
0x1584   :  { %552 = vrot.lane.b32.xlu0 %v4221_v14, %s4062_s14 }
0x1586   :  { %v473_v54 = vpop.permute.xlu1 %472 }
0x1587   :  { %475 = vst.msk [vmem:[#allocation3 + $0x8] sm:$0xc] %vm306_vm5, %v473_v54 }
0x1588   :  { %724 = vrot.lane.b32.xlu0 %v4252_v63, %s4063_s15 }
0x158a   :  { %v637_v35 = vpop.permute.xlu1 %636 }
0x158c   :  { %388 = vrot.lane.b32.xlu0 %v4189_v25, %s4063_s15  ;;  %v910_v25 = vld [vmem:[#allocation5 + $0x230] sm:$0xff] }
0x158d   :  { %v3578_v16 = vpack.c.bf16 %v912_v15, %v910_v25 }
0x158e   :  { %v805_v38 = vpop.permute.xlu1 %804 }
0x158f   :  { %3579 = vmatpush1.bf16.msra.mxu1 %v3578_v16 }
0x1590   :  { %556 = vrot.lane.b32.xlu0 %v4221_v14, %s4063_s15  ;;  %v1028_v14 = vld [vmem:[#allocation5 + $0x258] sm:$0xff] }
0x1594   :  { %720 = vrot.lane.b32.xlu0 %v4252_v63, %s4062_s14  ;;  %v1030_v63 = vld [vmem:[#allocation5 + $0x268] sm:$0xff] }
0x1595   :  { %v4310_v18 = vpack.c.bf16 %v1030_v63, %v1028_v14 }
0x1597   :  { %1039 = vmatprep.subr.bf16.mxu0 %v4310_v18  ;;  %1207 = vmatprep.subr.bf16.mxu1 %v4310_v18 }
0x1598   :  { %1040 = vmatpush1.bf16.msra.mxu0 %v4312_v22 }
0x1599   :  { %1041 = vmatprep.subr.bf16.mxu0 %v4319_v28 }
0x159c   :  { %1042 = vmatpush1.bf16.msra.mxu0 %v4321_v33 }
0x159d   :  { %1123 = vmatprep.subr.bf16.mxu0 %v4310_v18 }
0x159f   :  { %1072 = vmatmul.mubr.bf16.vlgmr.msra.gmra.mrb[12].mxu0 %v4060_v0 }
0x15a0   :  { %1124 = vmatpush1.bf16.msra.mxu0 %v4312_v22  ;;  %1155 = vmatprep.mubr.bf16.mxu0 %v4060_v0 }
0x15a1   :  { %1125 = vmatprep.subr.bf16.mxu0 %v4319_v28 }
0x15a4   :  { %1126 = vmatpush1.bf16.msra.mxu0 %v4321_v33 }
0x15a5   :  { %1291 = vmatprep.subr.bf16.mxu0 %v4310_v18 }
0x15ee   :  { %v884_v21 = vpop.permute.xlu0 %883 }
0x15ef   :  { %v886_v23 = vmul.f32 %v4269_v43, %v884_v21 }
0x15f1   :  { %892 = vrot.lane.b32.xlu0 %v886_v23, %s4063_s15 }
0x15f2   :  { %v385_v41 = vpop.permute.xlu0 %384 }
0x15f3   :  { %387 = vst.msk [vmem:[#allocation3 + $0x2] sm:$0x3] %vm301_vm4, %v385_v41 }
0x15f4   :  { %811 = vst.msk [vmem:[#allocation3] sm:$0xc] %vm306_vm5, %v4293_v39  ;;  %v920_v39 = vrot.slane %v915_v53, %v98_v30 }
0x15f5   :  { %888 = vrot.lane.b32.xlu0 %v886_v23, %s4062_s14 }
0x15f6   :  { %v553_v34 = vpop.permute.xlu0 %552 }
0x15f7   :  { %555 = vst.msk [vmem:[#allocation3 + $0x6] sm:$0x3] %vm301_vm4, %v553_v34 }
0x15f8   :  { %643 = vst.msk [vmem:[#allocation3 + $0x4] sm:$0xc] %vm306_vm5, %v4290_v3 }
0x15fa   :  { %v725_v36 = vpop.permute.xlu0 %724 }
0x15fb   :  { %727 = vst.msk [vmem:[#allocation3 + $0x2] sm:$0xc] %vm306_vm5, %v725_v36 }
0x15fe   :  { %v389_v37 = vpop.permute.xlu0 %388 }
0x15ff   :  { %391 = vst.msk [vmem:[#allocation3 + $0xa] sm:$0xc] %vm306_vm5, %v389_v37 }
0x1600   :  { %807 = vst.msk [vmem:[#allocation3 + $0xc] sm:$0x3] %vm301_vm4, %v805_v38 }
0x1602   :  { %v557_v40 = vpop.permute.xlu0 %556 }
0x1603   :  { %559 = vst.msk [vmem:[#allocation3 + $0x6] sm:$0xc] %vm306_vm5, %v557_v40 }
0x1604   :  { %639 = vst.msk [vmem:[#allocation3 + $0x8] sm:$0x3] %vm301_vm4, %v637_v35 }
0x1606   :  { %v721_v42 = vpop.permute.xlu0 %720 }
0x1607   :  { %723 = vst.msk [vmem:[#allocation3 + $0xa] sm:$0x3] %vm301_vm4, %v721_v42 }
0x1663   :  { %v893_v43 = vpop.permute.xlu0 %892 }
0x1664   :  { %895 = vst.msk [vmem:[#allocation3 - $0x2] sm:$0xc] %vm306_vm5, %v893_v43 }
0x1667   :  { %v889_v45 = vpop.permute.xlu0 %888 }
0x1668   :  { %891 = vst.msk [vmem:[#allocation3 + $0xe] sm:$0x3] %vm301_vm4, %v889_v45 }
0x166b   :  { %v896_v46 = vld [vmem:[#allocation3] sm:$0xff] }
0x166c   :  { %3266 = vmatmul.mubr.msk.f32.vlgmr.msra.gmra.mrb[24].mxu1 %vm927_vm6, %v896_v46 }
0x166d   :  { %1004 = vmatprep.mubr.f32.mxu1 %v4064_v17  ;;  %1208 = vmatpush1.bf16.msra.mxu1 %v4312_v22 }
0x166e   :  { %1209 = vmatprep.subr.bf16.mxu1 %v4319_v28 }
0x166f   :  { %v897_v47 = vld [vmem:[#allocation3 + $0x8] sm:$0xff] }
0x1670   :  { %3267 = vmatmul.mubr.msk.f32.gmra.mrb[26].mxu1 %vm927_vm6, %v897_v47 }
0x1671   :  { %1210 = vmatpush1.bf16.msra.mxu1 %v4321_v33  ;;  %1239 = vmatprep.mubr.bf16.mxu1 %v4060_v0 }
0x1672   :  { %1375 = vmatprep.subr.bf16.mxu1 %v4310_v18  ;;  %v1073_v49 = vpop.f32.mrb[12].mxu0 }
0x1673   :  { %v1075_v50 = vpop.f32.mrb[13].mxu0 }
0x1674   :  { %v1077_v51 = vpop.f32.mrb[14].mxu0  ;;  %v1081_v3 = vsel %vm38_vm2, %v1073_v49, %v1075_v50 }
0x1675   :  { %v1078_v52 = vpop.f32.mrb[15].mxu0 }
0x173f   :  { %v1000_v54 = vpop.f32.mrb[24].mxu1 }
0x1740   :  { %v1001_v55 = vadd.f32 %v1000_v54, %v920_v39  ;;  %v1002_v48 = vpop.f32.mrb[25].mxu1 }
0x1741   :  { %v1003_v56 = vadd.f32 %v1002_v48, %v924_v44 }
0x1742   :  { %1011 = vst [vmem:[#allocation2] ss:$8 sps:$4 sm:$0x33] %v1001_v55   ;;  %1013 = vst [vmem:[#allocation2 + $0x2] ss:$8 sps:$4 sm:$0xcc] %v1001_v55  }
0x1743   :  { %1020 = vst [vmem:[#allocation2 + $0x18] ss:$-8 sps:$4 sm:$0xcc] %v1003_v56   ;;  %1022 = vst [vmem:[#allocation2 + $0x1e] ss:$-8 sps:$4 sm:$0x33] %v1003_v56  }
0x1744   :  { %v1006_v57 = vpop.f32.mrb[26].mxu1 }
0x1745   :  { %v1007_v58 = vadd.f32 %v1006_v57, %v920_v39  ;;  %v1008_v59 = vpop.f32.mrb[27].mxu1 }
0x1746   :  { %v1009_v60 = vadd.f32 %v1008_v59, %v924_v44 }
0x1747   :  { %1019 = vst [vmem:[#allocation2 + $0x10] ss:$8 sps:$4 sm:$0x33] %v1007_v58   ;;  %1021 = vst [vmem:[#allocation2 + $0x12] ss:$8 sps:$4 sm:$0xcc] %v1007_v58  }
0x1748   :  { %1012 = vst [vmem:[#allocation2 + $0x8] ss:$-8 sps:$4 sm:$0xcc] %v1009_v60   ;;  %1014 = vst [vmem:[#allocation2 + $0xe] ss:$-8 sps:$4 sm:$0x33] %v1009_v60  }
0x174f   :  { %v1080_v30 = vld [vmem:[#allocation2] sm:$0xf]  ;;  %v1164_v14 = vld [vmem:[#allocation2 + $0x4] sm:$0xf]  ;;  %v1248_v49 = vld [vmem:[#allocation2 + $0x8] sm:$0xf] }
0x1750   :  { %v1082_v61 = vadd.f32 %v1081_v3, %v1080_v30 }
0x1752   :  { %3795 = vtanh.f32 %v1082_v61  ;;  %v3268_v62 = vmul.f32 -1.442695, %v1082_v61 }
0x1754   :  { %3797 = vpow2.f32 %v3268_v62 }
0x175c   :  { %v3796_v32 = vpop.eup %3795 }
0x175d   :  { %1092 = vrot.lane.b32.xlu1 %v3796_v32, %s4061_s0 }
0x175e   :  { %v3798_v1 = vpop.eup %3797 }
0x175f   :  { %v1086_v2 = vadd.f32 1.0, %v3798_v1 }
0x1761   :  { %3799 = vrcp.f32 %v1086_v2 }
0x176b   :  { %v3800_v4 = vpop.eup %3799 }
0x176c   :  { %v1090_v7 = vmul.f32 0.0, %v3800_v4 }
0x17cf   :  { %v1093_v5 = vpop.permute.xlu1 %1092 }
0x17d0   :  { %v1095_v6 = vmul.f32 %v3800_v4, %v1093_v5 }
0x17d2   :  { %1097 = vrot.lane.b32.xlu0 %v1095_v6, %s4061_s0 }
0x1844   :  { %v1098_v8 = vpop.permute.xlu0 %1097 }
0x1845   :  { %v1100_v9 = vadd.f32 %v1098_v8, %v1090_v7 }
0x1847   :  { %3801 = vtanh.f32 %v1100_v9 }
0x1851   :  { %v3802_v10 = vpop.eup %3801 }
0x1852   :  { %1103 = vrot.lane.b32.xlu1 %v3802_v10, %s4061_s0 }
0x18c4   :  { %v1104_v11 = vpop.permute.xlu1 %1103 }
0x18c5   :  { %v4364_v12 = vmul.f32 %v3800_v4, %v1104_v11  ;;  %v1332_v4 = vld [vmem:[#allocation2 + $0xc] sm:$0xf] }
0x18c7   :  { %v1116_v13 = vpack.c.bf16 %v4364_v12, %v4364_v12 }
0x18c9   :  { %1118 = vrot.lane.b32.xlu0 %v1116_v13, %s4062_s14 }
0x193b   :  { %v1119_v25 = vpop.permute.xlu0 %1118 }
0x193c   :  { %3269 = vmatmul.mubr.msk.bf16.vlgmr.msra.gmra.mrb[16].mxu0 %vm225_vm3, %v1119_v25 }
0x193d   :  { %1292 = vmatpush1.bf16.msra.mxu0 %v4312_v22  ;;  %1323 = vmatprep.mubr.bf16.mxu0 %v4060_v0 }
0x193e   :  { %1293 = vmatprep.subr.bf16.mxu0 %v4319_v28 }
0x1941   :  { %1294 = vmatpush1.bf16.msra.mxu0 %v4321_v33 }
0x1942   :  { %1459 = vmatprep.subr.bf16.mxu0 %v4310_v18 }
0x1a0f   :  { %v1157_v15 = vpop.f32.mrb[16].mxu0 }
0x1a10   :  { %v1159_v16 = vpop.f32.mrb[17].mxu0 }
0x1a11   :  { %v1165_v63 = vsel %vm38_vm2, %v1157_v15, %v1159_v16  ;;  %v1161_v19 = vpop.f32.mrb[18].mxu0 }
0x1a12   :  { %v1166_v20 = vadd.f32 %v1165_v63, %v1164_v14  ;;  %v1162_v21 = vpop.f32.mrb[19].mxu0 }
0x1a14   :  { %3803 = vtanh.f32 %v1166_v20  ;;  %v3270_v24 = vmul.f32 -1.442695, %v1166_v20 }
0x1a16   :  { %3805 = vpow2.f32 %v3270_v24 }
0x1a1e   :  { %v3804_v23 = vpop.eup %3803 }
0x1a1f   :  { %1176 = vrot.lane.b32.xlu1 %v3804_v23, %s4061_s0 }
0x1a20   :  { %v3806_v26 = vpop.eup %3805 }
0x1a21   :  { %v1170_v27 = vadd.f32 1.0, %v3806_v26 }
0x1a23   :  { %3807 = vrcp.f32 %v1170_v27 }
0x1a2d   :  { %v3808_v31 = vpop.eup %3807 }
0x1a2e   :  { %v1174_v35 = vmul.f32 %v3808_v31, %v1100_v9 }
0x1a91   :  { %v1177_v41 = vpop.permute.xlu1 %1176 }
0x1a92   :  { %v1179_v34 = vmul.f32 %v3808_v31, %v1177_v41 }
0x1a94   :  { %1181 = vrot.lane.b32.xlu0 %v1179_v34, %s4061_s0 }
0x1b06   :  { %v1182_v36 = vpop.permute.xlu0 %1181 }
0x1b07   :  { %v1184_v37 = vadd.f32 %v1182_v36, %v1174_v35 }
0x1b09   :  { %3809 = vtanh.f32 %v1184_v37 }
0x1b13   :  { %v3810_v38 = vpop.eup %3809 }
0x1b14   :  { %1187 = vrot.lane.b32.xlu1 %v3810_v38, %s4061_s0 }
0x1b86   :  { %v1188_v40 = vpop.permute.xlu1 %1187 }
0x1b87   :  { %v4380_v42 = vmul.f32 %v3808_v31, %v1188_v40  ;;  %v1416_v31 = vld [vmem:[#allocation2 + $0x10] sm:$0xf] }
0x1b89   :  { %v1200_v43 = vpack.c.bf16 %v4380_v42, %v4380_v42 }
0x1b8b   :  { %1202 = vrot.lane.b32.xlu0 %v1200_v43, %s4062_s14 }
0x1bfd   :  { %v1203_v45 = vpop.permute.xlu0 %1202 }
0x1bfe   :  { %3271 = vmatmul.mubr.msk.bf16.vlgmr.msra.gmra.mrb[28].mxu1 %vm225_vm3, %v1203_v45 }
0x1bff   :  { %1376 = vmatpush1.bf16.msra.mxu1 %v4312_v22  ;;  %1407 = vmatprep.mubr.bf16.mxu1 %v4060_v0 }
0x1c00   :  { %1377 = vmatprep.subr.bf16.mxu1 %v4319_v28 }
0x1c03   :  { %1378 = vmatpush1.bf16.msra.mxu1 %v4321_v33 }
0x1c04   :  { %1543 = vmatprep.subr.bf16.mxu1 %v4310_v18 }
0x1cd1   :  { %v1241_v46 = vpop.f32.mrb[28].mxu1 }
0x1cd2   :  { %v1243_v47 = vpop.f32.mrb[29].mxu1 }
0x1cd3   :  { %v1249_v50 = vsel %vm38_vm2, %v1241_v46, %v1243_v47  ;;  %v1245_v51 = vpop.f32.mrb[30].mxu1 }
0x1cd4   :  { %v1250_v52 = vadd.f32 %v1249_v50, %v1248_v49  ;;  %v1246_v3 = vpop.f32.mrb[31].mxu1 }
0x1cd6   :  { %3811 = vtanh.f32 %v1250_v52  ;;  %v3272_v39 = vmul.f32 -1.442695, %v1250_v52 }
0x1cd8   :  { %3813 = vpow2.f32 %v3272_v39 }
0x1ce0   :  { %v3812_v53 = vpop.eup %3811 }
0x1ce1   :  { %1260 = vrot.lane.b32.xlu1 %v3812_v53, %s4061_s0 }
0x1ce2   :  { %v3814_v44 = vpop.eup %3813 }
0x1ce3   :  { %v1254_v54 = vadd.f32 1.0, %v3814_v44 }
0x1ce5   :  { %3815 = vrcp.f32 %v1254_v54 }
0x1cef   :  { %v3816_v55 = vpop.eup %3815 }
0x1cf0   :  { %v1258_v57 = vmul.f32 %v3816_v55, %v1184_v37 }
0x1d53   :  { %v1261_v48 = vpop.permute.xlu1 %1260 }
0x1d54   :  { %v1263_v56 = vmul.f32 %v3816_v55, %v1261_v48  ;;  %v1500_v48 = vld [vmem:[#allocation2 + $0x14] sm:$0xf] }
0x1d56   :  { %1265 = vrot.lane.b32.xlu0 %v1263_v56, %s4061_s0 }
0x1dc8   :  { %v1266_v58 = vpop.permute.xlu0 %1265 }
0x1dc9   :  { %v1268_v59 = vadd.f32 %v1266_v58, %v1258_v57 }
0x1dcb   :  { %3817 = vtanh.f32 %v1268_v59 }
0x1dd5   :  { %v3818_v60 = vpop.eup %3817 }
0x1dd6   :  { %1271 = vrot.lane.b32.xlu1 %v3818_v60, %s4061_s0 }
0x1e48   :  { %v1272_v30 = vpop.permute.xlu1 %1271 }
0x1e49   :  { %v4396_v61 = vmul.f32 %v3816_v55, %v1272_v30 }
0x1e4b   :  { %v1284_v32 = vpack.c.bf16 %v4396_v61, %v4396_v61 }
0x1e4d   :  { %1286 = vrot.lane.b32.xlu0 %v1284_v32, %s4062_s14 }
0x1ebf   :  { %v1287_v62 = vpop.permute.xlu0 %1286 }
0x1ec0   :  { %3273 = vmatmul.mubr.msk.bf16.vlgmr.msra.gmra.mrb[20].mxu0 %vm225_vm3, %v1287_v62 }
0x1ec1   :  { %1460 = vmatpush1.bf16.msra.mxu0 %v4312_v22  ;;  %1491 = vmatprep.mubr.bf16.mxu0 %v4060_v0 }
0x1ec2   :  { %1461 = vmatprep.subr.bf16.mxu0 %v4319_v28 }
0x1ec5   :  { %1462 = vmatpush1.bf16.msra.mxu0 %v4321_v33 }
0x1ec6   :  { %1627 = vmatprep.subr.bf16.mxu0 %v4310_v18 }
0x1f93   :  { %v1325_v1 = vpop.f32.mrb[20].mxu0 }
0x1f94   :  { %v1327_v2 = vpop.f32.mrb[21].mxu0 }
0x1f95   :  { %v1333_v5 = vsel %vm38_vm2, %v1325_v1, %v1327_v2  ;;  %v1329_v6 = vpop.f32.mrb[22].mxu0 }
0x1f96   :  { %v1334_v7 = vadd.f32 %v1333_v5, %v1332_v4  ;;  %v1330_v8 = vpop.f32.mrb[23].mxu0 }
0x1f98   :  { %3819 = vtanh.f32 %v1334_v7  ;;  %v3274_v10 = vmul.f32 -1.442695, %v1334_v7 }
0x1f9a   :  { %3821 = vpow2.f32 %v3274_v10 }
0x1fa2   :  { %v3820_v9 = vpop.eup %3819 }
0x1fa3   :  { %1344 = vrot.lane.b32.xlu1 %v3820_v9, %s4061_s0 }
0x1fa4   :  { %v3822_v11 = vpop.eup %3821 }
0x1fa5   :  { %v1338_v13 = vadd.f32 1.0, %v3822_v11  ;;  %v1584_v11 = vld [vmem:[#allocation2 + $0x18] sm:$0xf] }
0x1fa7   :  { %3823 = vrcp.f32 %v1338_v13 }
0x1fb1   :  { %v3824_v25 = vpop.eup %3823 }
0x1fb2   :  { %v1342_v16 = vmul.f32 %v3824_v25, %v1268_v59 }
0x2015   :  { %v1345_v18 = vpop.permute.xlu1 %1344 }
0x2016   :  { %v1347_v15 = vmul.f32 %v3824_v25, %v1345_v18 }
0x2018   :  { %1349 = vrot.lane.b32.xlu0 %v1347_v15, %s4061_s0 }
0x208a   :  { %v1350_v14 = vpop.permute.xlu0 %1349 }
0x208b   :  { %v1352_v63 = vadd.f32 %v1350_v14, %v1342_v16 }
0x208d   :  { %3825 = vtanh.f32 %v1352_v63 }
0x2097   :  { %v3826_v19 = vpop.eup %3825 }
0x2098   :  { %1355 = vrot.lane.b32.xlu1 %v3826_v19, %s4061_s0 }
0x210a   :  { %v1356_v20 = vpop.permute.xlu1 %1355 }
0x210b   :  { %v4412_v21 = vmul.f32 %v3824_v25, %v1356_v20 }
0x210d   :  { %v1368_v23 = vpack.c.bf16 %v4412_v21, %v4412_v21 }
0x210f   :  { %1370 = vrot.lane.b32.xlu0 %v1368_v23, %s4062_s14 }
0x2181   :  { %v1371_v24 = vpop.permute.xlu0 %1370 }
0x2182   :  { %3275 = vmatmul.mubr.msk.bf16.vlgmr.msra.gmra.mrb[32].mxu1 %vm225_vm3, %v1371_v24 }
0x2183   :  { %1544 = vmatpush1.bf16.msra.mxu1 %v4312_v22  ;;  %1575 = vmatprep.mubr.bf16.mxu1 %v4060_v0 }
0x2184   :  { %1545 = vmatprep.subr.bf16.mxu1 %v4319_v28 }
0x2187   :  { %1546 = vmatpush1.bf16.msra.mxu1 %v4321_v33 }
0x2255   :  { %v1409_v26 = vpop.f32.mrb[32].mxu1 }
0x2256   :  { %v1411_v27 = vpop.f32.mrb[33].mxu1 }
0x2257   :  { %v1417_v41 = vsel %vm38_vm2, %v1409_v26, %v1411_v27  ;;  %v1413_v34 = vpop.f32.mrb[34].mxu1 }
0x2258   :  { %v1418_v35 = vadd.f32 %v1417_v41, %v1416_v31  ;;  %v1414_v36 = vpop.f32.mrb[35].mxu1 }
0x225a   :  { %3827 = vtanh.f32 %v1418_v35  ;;  %v3276_v38 = vmul.f32 -1.442695, %v1418_v35 }
0x225c   :  { %3829 = vpow2.f32 %v3276_v38 }
0x2264   :  { %v3828_v37 = vpop.eup %3827 }
0x2265   :  { %1428 = vrot.lane.b32.xlu1 %v3828_v37, %s4061_s0 }
0x2266   :  { %v3830_v40 = vpop.eup %3829 }
0x2267   :  { %v1422_v43 = vadd.f32 1.0, %v3830_v40 }
0x2269   :  { %3831 = vrcp.f32 %v1422_v43  ;;  %v1668_v43 = vld [vmem:[#allocation2 + $0x1c] sm:$0xf] }
0x2273   :  { %v3832_v45 = vpop.eup %3831 }
0x2274   :  { %v1426_v49 = vmul.f32 %v3832_v45, %v1352_v63 }
0x22d7   :  { %v1429_v46 = vpop.permute.xlu1 %1428 }
0x22d8   :  { %v1431_v47 = vmul.f32 %v3832_v45, %v1429_v46 }
0x22da   :  { %1433 = vrot.lane.b32.xlu0 %v1431_v47, %s4061_s0 }
0x234c   :  { %v1434_v50 = vpop.permute.xlu0 %1433 }
0x234d   :  { %v1436_v51 = vadd.f32 %v1434_v50, %v1426_v49 }
0x234f   :  { %3833 = vtanh.f32 %v1436_v51 }
0x2359   :  { %v3834_v52 = vpop.eup %3833 }
0x235a   :  { %1439 = vrot.lane.b32.xlu1 %v3834_v52, %s4061_s0 }
0x23cc   :  { %v1440_v3 = vpop.permute.xlu1 %1439 }
0x23cd   :  { %v4427_v53 = vmul.f32 %v3832_v45, %v1440_v3 }
0x23cf   :  { %v1452_v39 = vpack.c.bf16 %v4427_v53, %v4427_v53 }
0x23d1   :  { %1454 = vrot.lane.b32.xlu0 %v1452_v39, %s4062_s14 }
0x2443   :  { %v1455_v44 = vpop.permute.xlu0 %1454 }
0x2444   :  { %3277 = vmatmul.mubr.msk.bf16.vlgmr.msra.gmra.mrb[24].mxu0 %vm225_vm3, %v1455_v44 }
0x2445   :  { %1628 = vmatpush1.bf16.msra.mxu0 %v4312_v22  ;;  %1659 = vmatprep.mubr.bf16.mxu0 %v4060_v0 }
0x2446   :  { %1629 = vmatprep.subr.bf16.mxu0 %v4319_v28 }
0x2449   :  { %1630 = vmatpush1.bf16.msra.mxu0 %v4321_v33 }
0x2517   :  { %v1493_v54 = vpop.f32.mrb[24].mxu0 }
0x2518   :  { %v1495_v55 = vpop.f32.mrb[25].mxu0 }
0x2519   :  { %v1501_v56 = vsel %vm38_vm2, %v1493_v54, %v1495_v55  ;;  %v1497_v57 = vpop.f32.mrb[26].mxu0 }
0x251a   :  { %v1502_v58 = vadd.f32 %v1501_v56, %v1500_v48  ;;  %v1498_v59 = vpop.f32.mrb[27].mxu0 }
0x251b   :  { %v1705_v59 = vld [vmem:[%s5063_s4 + $0x8] sm:$0xff] }
0x251c   :  { %3835 = vtanh.f32 %v1502_v58  ;;  %v3278_v22 = vmul.f32 -1.442695, %v1502_v58  ;;  %v1704_v58 = vld [vmem:[%s5063_s4] sm:$0xff] }
0x251e   :  { %3837 = vpow2.f32 %v3278_v22 }
0x2526   :  { %v3836_v60 = vpop.eup %3835 }
0x2527   :  { %1512 = vrot.lane.b32.xlu1 %v3836_v60, %s4061_s0  ;;  %v3581_v60 = vpack.c.bf16 %v1705_v59, %v1704_v58 }
0x2528   :  { %v3838_v0 = vpop.eup %3837 }
0x2529   :  { %v1506_v30 = vadd.f32 1.0, %v3838_v0 }
0x252b   :  { %3839 = vrcp.f32 %v1506_v30 }
0x2535   :  { %v3840_v28 = vpop.eup %3839 }
0x2536   :  { %v1510_v62 = vmul.f32 %v3840_v28, %v1436_v51 }
0x2599   :  { %v1513_v33 = vpop.permute.xlu1 %1512 }
0x259a   :  { %v1515_v32 = vmul.f32 %v3840_v28, %v1513_v33 }
0x259c   :  { %1517 = vrot.lane.b32.xlu0 %v1515_v32, %s4061_s0 }
0x260e   :  { %v1518_v1 = vpop.permute.xlu0 %1517 }
0x260f   :  { %v1520_v2 = vadd.f32 %v1518_v1, %v1510_v62 }
0x2611   :  { %3841 = vtanh.f32 %v1520_v2 }
0x261b   :  { %v3842_v4 = vpop.eup %3841 }
0x261c   :  { %1523 = vrot.lane.b32.xlu1 %v3842_v4, %s4061_s0  ;;  %v1810_v4 = vld [vmem:[%s5063_s4 + $0x28] sm:$0xff] }
0x268e   :  { %v1524_v5 = vpop.permute.xlu1 %1523 }
0x268f   :  { %v4442_v6 = vmul.f32 %v3840_v28, %v1524_v5  ;;  %v1811_v5 = vld [vmem:[%s5063_s4 + $0x30] sm:$0xff] }
0x2691   :  { %v1536_v7 = vpack.c.bf16 %v4442_v6, %v4442_v6 }
0x2693   :  { %1538 = vrot.lane.b32.xlu0 %v1536_v7, %s4062_s14  ;;  %v3586_v7 = vpack.c.bf16 %v1811_v5, %v1810_v4 }
0x2695   :  { %3587 = vmatprep.subr.bf16.mxu0 %v3586_v7 }
0x2705   :  { %v1539_v8 = vpop.permute.xlu0 %1538 }
0x2706   :  { %3279 = vmatmul.mubr.msk.bf16.vlgmr.msra.gmra.mrb[36].mxu1 %vm225_vm3, %v1539_v8  ;;  %v1812_v8 = vld [vmem:[%s5063_s4 + $0x38] sm:$0xff] }
0x2707   :  { %3415 = vmatprep.mubr.msk.f32.mxu1 %vm4066_vm7, %v4064_v17 }
0x27d9   :  { %v1577_v9 = vpop.f32.mrb[36].mxu1 }
0x27da   :  { %v1579_v10 = vpop.f32.mrb[37].mxu1 }
0x27db   :  { %v1585_v13 = vsel %vm38_vm2, %v1577_v9, %v1579_v10  ;;  %v1581_v25 = vpop.f32.mrb[38].mxu1  ;;  %v1813_v9 = vld [vmem:[%s5063_s4 + $0x40] sm:$0xff] }
0x27dc   :  { %v1586_v18 = vadd.f32 %v1585_v13, %v1584_v11  ;;  %v1582_v15 = vpop.f32.mrb[39].mxu1  ;;  %v3590_v10 = vpack.c.bf16 %v1813_v9, %v1812_v8  ;;  %v1815_v11 = vld [vmem:[%s5063_s4 + $0x50] sm:$0xff]  ;;  %v1816_v25 = vld [vmem:[%s5063_s4 + $0x58] sm:$0xff] }
0x27dd   :  { %v4535_v15 = vld [vmem:[%s5063_s4 + $0x68] ss:$0 sm:$0xff] }
0x27de   :  { %3843 = vtanh.f32 %v1586_v18  ;;  %v3280_v14 = vmul.f32 -1.442695, %v1586_v18  ;;  %v1817_v18 = vld [vmem:[%s5063_s4 + $0x60] sm:$0xff] }
0x27e0   :  { %3845 = vpow2.f32 %v3280_v14 }
0x27e8   :  { %v3844_v16 = vpop.eup %3843 }
0x27e9   :  { %1596 = vrot.lane.b32.xlu1 %v3844_v16, %s4061_s0 }
0x27ea   :  { %v3846_v63 = vpop.eup %3845 }
0x27eb   :  { %v1590_v19 = vadd.f32 1.0, %v3846_v63 }
0x27ed   :  { %3847 = vrcp.f32 %v1590_v19 }
0x27f7   :  { %v3848_v20 = vpop.eup %3847 }
0x27f8   :  { %v1594_v26 = vmul.f32 %v3848_v20, %v1520_v2 }
0x285b   :  { %v1597_v23 = vpop.permute.xlu1 %1596 }
0x285c   :  { %v1599_v24 = vmul.f32 %v3848_v20, %v1597_v23 }
0x285e   :  { %1601 = vrot.lane.b32.xlu0 %v1599_v24, %s4061_s0 }
0x28d0   :  { %v1602_v27 = vpop.permute.xlu0 %1601 }
0x28d1   :  { %v1604_v31 = vadd.f32 %v1602_v27, %v1594_v26 }
0x28d3   :  { %3849 = vtanh.f32 %v1604_v31 }
0x28dd   :  { %v3850_v41 = vpop.eup %3849 }
0x28de   :  { %1607 = vrot.lane.b32.xlu1 %v3850_v41, %s4061_s0 }
0x2950   :  { %v1608_v34 = vpop.permute.xlu1 %1607 }
0x2951   :  { %v1610_v35 = vmul.f32 %v3848_v20, %v1608_v34 }
0x2953   :  { %v1620_v36 = vpack.c.bf16 %v1610_v35, %v1610_v35 }
0x2955   :  { %1622 = vrot.lane.b32.xlu0 %v1620_v36, %s4062_s14 }
0x29c7   :  { %v1623_v37 = vpop.permute.xlu0 %1622 }
0x29c8   :  { %3281 = vmatmul.mubr.msk.bf16.vlgmr.msra.gmra.mrb[28].mxu0 %vm225_vm3, %v1623_v37 }
0x29c9   :  { %3589 = vmatpush3.bf16.msra.mxu0 %v3586_v7 }
0x29ca   :  { %3591 = vmatprep.subr.bf16.mxu0 %v3590_v10 }
0x29cd   :  { %3593 = vmatpush3.bf16.msra.mxu0 %v3590_v10 }
0x2a9b   :  { %v1661_v38 = vpop.f32.mrb[28].mxu0 }
0x2a9c   :  { %v1663_v40 = vpop.f32.mrb[29].mxu0 }
0x2a9d   :  { %v1669_v45 = vsel %vm38_vm2, %v1661_v38, %v1663_v40  ;;  %v1665_v46 = vpop.f32.mrb[30].mxu0  ;;  %v3283_v38 = vld [vmem:[%s5063_s4 + $0x20] ss:$0 sm:$0xff] }
0x2a9e   :  { %v1670_v47 = vadd.f32 %v1669_v45, %v1668_v43  ;;  %v1666_v49 = vpop.f32.mrb[31].mxu0 }
0x2aa0   :  { %3851 = vtanh.f32 %v1670_v47  ;;  %v3282_v51 = vmul.f32 -1.442695, %v1670_v47 }
0x2aa2   :  { %3853 = vpow2.f32 %v3282_v51 }
0x2aaa   :  { %v3852_v50 = vpop.eup %3851 }
0x2aab   :  { %1680 = vrot.lane.b32.xlu1 %v3852_v50, %s4061_s0 }
0x2aac   :  { %v3854_v52 = vpop.eup %3853 }
0x2aad   :  { %v1674_v3 = vadd.f32 1.0, %v3854_v52 }
0x2aaf   :  { %3855 = vrcp.f32 %v1674_v3 }
0x2ab9   :  { %v3856_v39 = vpop.eup %3855 }
0x2aba   :  { %v1678_v55 = vmul.f32 %v3856_v39, %v1604_v31 }
0x2b1d   :  { %v1681_v44 = vpop.permute.xlu1 %1680 }
0x2b1e   :  { %v1683_v54 = vmul.f32 %v3856_v39, %v1681_v44 }
0x2b20   :  { %1685 = vrot.lane.b32.xlu0 %v1683_v54, %s4061_s0 }
0x2b92   :  { %v1686_v29 = vpop.permute.xlu0 %1685 }
0x2b93   :  { %v1688_v48 = vadd.f32 %v1686_v29, %v1678_v55 }
0x2b95   :  { %3857 = vtanh.f32 %v1688_v48  ;;  %v1710_v56 = vrot.slane %v1688_v48, 4 }
0x2b97   :  { %1711 = vrot.lane.b32.xlu0 %v1710_v56, %s4061_s0 }
0x2b9b   :  { %1108 = vrot.lane.b32.xlu0 %v4364_v12, %s4062_s14 }
0x2b9f   :  { %v3858_v57 = vpop.eup %3857  ;;  %1276 = vrot.lane.b32.xlu0 %v4396_v61, %s4062_s14 }
0x2ba0   :  { %1691 = vrot.lane.b32.xlu1 %v3858_v57, %s4061_s0 }
0x2ba3   :  { %1112 = vrot.lane.b32.xlu0 %v4364_v12, %s4063_s15  ;;  %v1706_v12 = vld [vmem:[%s5063_s4 + $0x10] sm:$0xff] }
0x2ba7   :  { %1280 = vrot.lane.b32.xlu0 %v4396_v61, %s4063_s15  ;;  %v4065_v61 = vmov 0.0|0.0  }
0x2ba8   :  { %3580 = vmatprep.subr.bf16.mxu1 %v4065_v61 }
0x2ba9   :  { %3582 = vmatpush3.bf16.msra.mxu1 %v3581_v60 }
0x2baa   :  { %3583 = vmatprep.subr.bf16.mxu1 %v4065_v61 }
0x2bab   :  { %1448 = vrot.lane.b32.xlu0 %v4427_v53, %s4063_s15 }
0x2baf   :  { %1616 = vrot.lane.b32.xlu0 %v1610_v35, %s4063_s15 }
0x2bb3   :  { %1444 = vrot.lane.b32.xlu0 %v4427_v53, %s4062_s14  ;;  %v1707_v53 = vld [vmem:[%s5063_s4 + $0x18] sm:$0xff] }
0x2bb4   :  { %v3584_v22 = vpack.c.bf16 %v1707_v53, %v1706_v12 }
0x2bb6   :  { %3585 = vmatpush3.bf16.msra.mxu1 %v3584_v22 }
0x2bb7   :  { %1612 = vrot.lane.b32.xlu0 %v1610_v35, %s4062_s14 }
0x2bbb   :  { %1952 = vrot.lane.b32.xlu0 %v4535_v15, %s4067_s17 }
0x2bbf   :  { %1920 = vrot.lane.b32.xlu0 %v4535_v15, %s4068_s18 }
0x2c09   :  { %v1712_v0 = vpop.permute.xlu0 %1711 }
0x2c0d   :  { %v1109_v30 = vpop.permute.xlu0 %1108 }
0x2c0e   :  { %1111 = vst.msk [vmem:[#allocation4] sm:$0x3] %vm301_vm4, %v1109_v30 }
0x2c11   :  { %v1277_v28 = vpop.permute.xlu0 %1276 }
0x2c12   :  { %1279 = vst.msk [vmem:[#allocation4 + $0x4] sm:$0x3] %vm301_vm4, %v1277_v28  ;;  %v1692_v33 = vpop.permute.xlu1 %1691 }
0x2c13   :  { %v1694_v32 = vmul.f32 %v3856_v39, %v1692_v33  ;;  %v3285_v39 = vld [vmem:[%s5063_s4 + $0x70] ss:$0 sm:$0xff] }
0x2c15   :  { %v1113_v62 = vpop.permute.xlu0 %1112  ;;  %v1715_v1 = vsel %vm1714_vm8, %v1694_v32, %v1712_v0 }
0x2c16   :  { %1115 = vst.msk [vmem:[#allocation4 + $0xc] sm:$0xc] %vm306_vm5, %v1113_v62  ;;  %1721 = vrot.lane.b32.xlu1 %v1715_v1, %s4062_s14 }
0x2c19   :  { %v1281_v2 = vpop.permute.xlu0 %1280 }
0x2c1a   :  { %1283 = vst.msk [vmem:[#allocation4 + $0x8] sm:$0xc] %vm306_vm5, %v1281_v2  ;;  %1192 = vrot.lane.b32.xlu1 %v4380_v42, %s4062_s14 }
0x2c1d   :  { %v1449_v16 = vpop.permute.xlu0 %1448 }
0x2c1e   :  { %1360 = vrot.lane.b32.xlu1 %v4412_v21, %s4062_s14 }
0x2c21   :  { %v1617_v63 = vpop.permute.xlu0 %1616 }
0x2c22   :  { %1196 = vrot.lane.b32.xlu1 %v4380_v42, %s4063_s15  ;;  %v1814_v42 = vld [vmem:[%s5063_s4 + $0x48] sm:$0xff] }
0x2c23   :  { %v3594_v13 = vpack.c.bf16 %v1815_v11, %v1814_v42 }
0x2c25   :  { %3595 = vmatprep.subr.bf16.mxu0 %v3594_v13 }
0x2c26   :  { %1364 = vrot.lane.b32.xlu1 %v4412_v21, %s4063_s15  ;;  %v3598_v21 = vpack.c.bf16 %v1817_v18, %v1816_v25  ;;  %3597 = vmatpush3.bf16.msra.mxu0 %v3594_v13 }
0x2c28   :  { %3599 = vmatprep.subr.bf16.mxu0 %v3598_v21 }
0x2c2a   :  { %1532 = vrot.lane.b32.xlu1 %v4442_v6, %s4063_s15  ;;  %3601 = vmatpush3.bf16.msra.mxu0 %v3598_v21 }
0x2c2b   :  { %3634 = vmatprep.subr.bf16.mxu0 %v4065_v61 }
0x2c2e   :  { %1700 = vrot.lane.b32.xlu1 %v1694_v32, %s4063_s15 }
0x2c32   :  { %1528 = vrot.lane.b32.xlu1 %v4442_v6, %s4062_s14  ;;  %v1445_v6 = vpop.permute.xlu0 %1444 }
0x2c36   :  { %1696 = vrot.lane.b32.xlu1 %v1694_v32, %s4062_s14  ;;  %v1613_v24 = vpop.permute.xlu0 %1612 }
0x2c3a   :  { %v1953_v37 = vpop.permute.xlu0 %1952 }
0x2c3e   :  { %v4565_v47 = vpop.permute.xlu0 %1920 }
0x2c88   :  { %v1722_v14 = vpop.permute.xlu1 %1721 }
0x2c89   :  { %3416 = vmatmul.mubr.msk.f32.vlgmr.msra.gmra.mrb[40].mxu1 %vm225_vm3, %v1722_v14 }
0x2c8c   :  { %v1193_v19 = vpop.permute.xlu1 %1192 }
0x2c8d   :  { %1195 = vst.msk [vmem:[#allocation4 + $0x2] sm:$0x3] %vm301_vm4, %v1193_v19 }
0x2c8e   :  { %1619 = vst.msk [vmem:[#allocation4] sm:$0xc] %vm306_vm5, %v1617_v63 }
0x2c90   :  { %v1361_v20 = vpop.permute.xlu1 %1360 }
0x2c91   :  { %1363 = vst.msk [vmem:[#allocation4 + $0x6] sm:$0x3] %vm301_vm4, %v1361_v20 }
0x2c92   :  { %1451 = vst.msk [vmem:[#allocation4 + $0x4] sm:$0xc] %vm306_vm5, %v1449_v16 }
0x2c94   :  { %v1197_v23 = vpop.permute.xlu1 %1196 }
0x2c95   :  { %1199 = vst.msk [vmem:[#allocation4 + $0xa] sm:$0xc] %vm306_vm5, %v1197_v23 }
0x2c96   :  { %1615 = vst.msk [vmem:[#allocation4 + $0xc] sm:$0x3] %vm301_vm4, %v1613_v24 }
0x2c98   :  { %v1365_v26 = vpop.permute.xlu1 %1364 }
0x2c99   :  { %1367 = vst.msk [vmem:[#allocation4 + $0x6] sm:$0xc] %vm306_vm5, %v1365_v26 }
0x2c9a   :  { %1447 = vst.msk [vmem:[#allocation4 + $0x8] sm:$0x3] %vm301_vm4, %v1445_v6 }
0x2c9c   :  { %v1533_v27 = vpop.permute.xlu1 %1532 }
0x2c9d   :  { %1535 = vst.msk [vmem:[#allocation4 + $0x2] sm:$0xc] %vm306_vm5, %v1533_v27 }
0x2ca0   :  { %v1701_v31 = vpop.permute.xlu1 %1700 }
0x2ca1   :  { %1703 = vst.msk [vmem:[#allocation4 - $0x2] sm:$0xc] %vm306_vm5, %v1701_v31 }
0x2ca4   :  { %v1529_v41 = vpop.permute.xlu1 %1528 }
0x2ca5   :  { %1531 = vst.msk [vmem:[#allocation4 + $0xa] sm:$0x3] %vm301_vm4, %v1529_v41 }
0x2ca8   :  { %v1697_v34 = vpop.permute.xlu1 %1696  ;;  %v1808_v35 = vld [vmem:[#allocation4] sm:$0xff] }
0x2ca9   :  { %1699 = vst.msk [vmem:[#allocation4 + $0xe] sm:$0x3] %vm301_vm4, %v1697_v34  ;;  %3434 = vmatprep.mubr.msk.f32.mxu0 %vm927_vm6, %v1808_v35 }
0x2cb0   :  { %v1809_v36 = vld [vmem:[#allocation4 + $0x8] sm:$0xff] }
0x2cb1   :  { %3435 = vmatmul.mubr.msk.f32.vlgmr.msra.gmra.mrb[32].mxu0 %vm927_vm6, %v1809_v36 }
0x2cb2   :  { %3443 = vmatprep.mubr.msk.f32.mxu0 %vm4066_vm7, %v4064_v17 }
0x2d5c   :  { %v1791_v40 = vpop.f32.mrb[40].mxu1 }
0x2d5d   :  { %v1792_v43 = vadd.f32 %v3283_v38, %v1791_v40  ;;  %v3417_v45 = vpop.f32.mrb[41].mxu1 }
0x2d5f   :  { %v1796_v46 = vrot.slane %v1792_v43, 6 }
0x2d61   :  { %v1799_v49 = vsel %vm1798_vm9, %v1792_v43, %v1796_v46  ;;  %1803 = vrot.lane.b32.xlu0 %v1796_v46, %s4068_s18 }
0x2d62   :  { %v1955_v50 = vmul.f32 %v1953_v37, %v1799_v49  ;;  %v1923_v51 = vmul.f32 %v4565_v47, %v1799_v49  ;;  %v1908_v53 = vmul.f32 %v4535_v15, %v1799_v49 }
0x2d64   :  { %v1957_v52 = vrot.slane %v1955_v50, 2  ;;  %v1925_v3 = vrot.slane %v1923_v51, 2  ;;  %v1910_v22 = vrot.slane %v1908_v53, 2 }
0x2d66   :  { %1958 = vrot.lane.b32.xlu1 %v1957_v52, %s4069_s20  ;;  %1926 = vrot.lane.b32.xlu0 %v1925_v3, %s4070_s21 }
0x2d6a   :  { %1800 = vrot.lane.b32.xlu1 %v1792_v43, %s4068_s18 }
0x2d84   :  { %v3436_v44 = vpop.f32.mrb[32].mxu0 }
0x2d85   :  { %v4575_v54 = vadd.f32 %v3436_v44, %v3285_v39  ;;  %v1895_v55 = vpop.f32.mrb[33].mxu0 }
0x2d86   :  { %v4577_v29 = vadd.f32 %v3285_v39, %v1895_v55 }
0x2d88   :  { %v1912_v0 = vadd.f32 %v1910_v22, %v4577_v29 }
0x2d8a   :  { %v3289_v30 = vmul.f32 -1.442695, %v1912_v0 }
0x2dd3   :  { %v1804_v57 = vpop.permute.xlu0 %1803 }
0x2dd8   :  { %v1959_v48 = vpop.permute.xlu1 %1958  ;;  %v1927_v7 = vpop.permute.xlu0 %1926 }
0x2dd9   :  { %v1961_v56 = vadd.f32 %v1959_v48, %v4577_v29  ;;  %v1929_v8 = vadd.f32 %v1927_v7, %v4577_v29 }
0x2ddb   :  { %3859 = vtanh.f32 %v1961_v56  ;;  %v3290_v9 = vmul.f32 -1.442695, %v1929_v8 }
0x2ddc   :  { %v1801_v58 = vpop.permute.xlu1 %1800  ;;  %3861 = vpow2.f32 %v3289_v30 }
0x2ddd   :  { %v1806_v59 = vsel %vm1798_vm9, %v1801_v58, %v1804_v57 }
0x2dde   :  { %v1964_v12 = vrot.slane %v1806_v59, 6 }
0x2de0   :  { %1965 = vrot.lane.b32.xlu0 %v1964_v12, %s4070_s21 }
0x2de5   :  { %v3860_v60 = vpop.eup %3859 }
0x2de6   :  { %1970 = vrot.lane.b32.xlu1 %v3860_v60, %s4067_s17  ;;  %v3862_v28 = vpop.eup %3861 }
0x2de7   :  { %v1916_v33 = vadd.f32 1.0, %v3862_v28 }
0x2de9   :  { %3863 = vrcp.f32 %v1916_v33 }
0x2dea   :  { %1936 = vrot.lane.b32.xlu1 %v4535_v15, %s4071_s24  ;;  %3865 = vpow2.f32 %v3290_v9 }
0x2df3   :  { %v3864_v32 = vpop.eup %3863 }
0x2df4   :  { %v3866_v10 = vpop.eup %3865 }
0x2df5   :  { %v1933_v42 = vadd.f32 1.0, %v3866_v10 }
0x2df7   :  { %3867 = vrcp.f32 %v1933_v42 }
0x2e01   :  { %v3868_v13 = vpop.eup %3867 }
0x2e52   :  { %v1966_v11 = vpop.permute.xlu0 %1965 }
0x2e53   :  { %v1968_v25 = vmul.f32 %v3868_v13, %v1966_v11 }
0x2e58   :  { %v1971_v62 = vpop.permute.xlu1 %1970 }
0x2e59   :  { %v1973_v1 = vmul.f32 %v3864_v32, %v1971_v62 }
0x2e5b   :  { %1975 = vrot.lane.b32.xlu1 %v1973_v1, %s4070_s21 }
0x2e5c   :  { %v1937_v2 = vpop.permute.xlu1 %1936 }
0x2e5d   :  { %v1939_v4 = vmul.f32 %v1937_v2, %v1799_v49 }
0x2e5f   :  { %v1941_v5 = vrot.slane %v1939_v4, 2 }
0x2e61   :  { %1942 = vrot.lane.b32.xlu0 %v1941_v5, %s4072_s25 }
0x2e65   :  { %1985 = vrot.lane.b32.xlu0 %v4535_v15, %s4072_s25 }
0x2e69   :  { %2001 = vrot.lane.b32.xlu0 %v4535_v15, %s4070_s21 }
0x2ecd   :  { %v1976_v18 = vpop.permute.xlu1 %1975 }
0x2ece   :  { %v1978_v21 = vadd.f32 %v1976_v18, %v1968_v25 }
0x2ed0   :  { %3869 = vtanh.f32 %v1978_v21  ;;  %v2037_v12 = vrot.slane %v1978_v21, 6 }
0x2ed3   :  { %v1943_v14 = vpop.permute.xlu0 %1942 }
0x2ed4   :  { %v1945_v63 = vadd.f32 %v1943_v14, %v4577_v29 }
0x2ed6   :  { %v3291_v19 = vmul.f32 -1.442695, %v1945_v63 }
0x2ed7   :  { %v4594_v24 = vpop.permute.xlu0 %1985 }
0x2ed8   :  { %3871 = vpow2.f32 %v3291_v19 }
0x2eda   :  { %v3870_v16 = vpop.eup %3869 }
0x2edb   :  { %1981 = vrot.lane.b32.xlu1 %v3870_v16, %s4070_s21  ;;  %v4602_v35 = vpop.permute.xlu0 %2001 }
0x2ee2   :  { %v3872_v6 = vpop.eup %3871 }
0x2ee3   :  { %v1949_v20 = vadd.f32 1.0, %v3872_v6 }
0x2ee5   :  { %3873 = vrcp.f32 %v1949_v20 }
0x2eef   :  { %v3874_v23 = vpop.eup %3873 }
0x2f4d   :  { %v1982_v26 = vpop.permute.xlu1 %1981 }
0x2f4e   :  { %v4596_v27 = vmul.f32 %v3874_v23, %v1982_v26 }
0x2f50   :  { %v2028_v31 = vmul.f32 %v4596_v27, %v4565_v47  ;;  %v1988_v34 = vmul.f32 %v4594_v24, %v4596_v27  ;;  %v2004_v37 = vmul.f32 %v4602_v35, %v4596_v27  ;;  %v2017_v30 = vmul.f32 %v4535_v15, %v4596_v27 }
0x2f52   :  { %v2030_v41 = vrot.slane %v2028_v31, 6  ;;  %v1990_v36 = vrot.slane %v1988_v34, 6  ;;  %v2006_v38 = vrot.slane %v2004_v37, 6  ;;  %v2019_v28 = vrot.slane %v2017_v30, 6 }
0x2f54   :  { %2031 = vrot.lane.b32.xlu1 %v2030_v41, %s4070_s21  ;;  %v2021_v33 = vadd.f32 %v2019_v28, %v4577_v29 }
0x2f56   :  { %v3294_v32 = vmul.f32 -1.442695, %v2021_v33 }
0x2f58   :  { %1991 = vrot.lane.b32.xlu1 %v1990_v36, %s4071_s24 }
0x2f5c   :  { %2007 = vrot.lane.b32.xlu1 %v2006_v38, %s4068_s18 }
0x2fc6   :  { %v2032_v40 = vpop.permute.xlu1 %2031 }
0x2fc7   :  { %v2034_v43 = vadd.f32 %v2032_v40, %v4577_v29 }
0x2fc9   :  { %3875 = vtanh.f32 %v2034_v43 }
0x2fca   :  { %v1992_v46 = vpop.permute.xlu1 %1991 }
0x2fcb   :  { %v1994_v49 = vadd.f32 %v1992_v46, %v4577_v29 }
0x2fcd   :  { %v3292_v50 = vmul.f32 -1.442695, %v1994_v49 }
0x2fce   :  { %v2008_v55 = vpop.permute.xlu1 %2007 }
0x2fcf   :  { %3877 = vpow2.f32 %v3292_v50  ;;  %v2010_v48 = vadd.f32 %v2008_v55, %v4577_v29 }
0x2fd1   :  { %v3293_v56 = vmul.f32 -1.442695, %v2010_v48 }
0x2fd3   :  { %v3876_v45 = vpop.eup %3875 }
0x2fd4   :  { %2041 = vrot.lane.b32.xlu0 %v3876_v45, %s4067_s17 }
0x2fd9   :  { %v3878_v51 = vpop.eup %3877 }
0x2fda   :  { %v1998_v52 = vadd.f32 1.0, %v3878_v51 }
0x2fdc   :  { %3879 = vrcp.f32 %v1998_v52 }
0x2fdd   :  { %3881 = vpow2.f32 %v3293_v56 }
0x2fe6   :  { %v3880_v3 = vpop.eup %3879 }
0x2fe7   :  { %v3882_v57 = vpop.eup %3881 }
0x2fe8   :  { %v2014_v58 = vadd.f32 1.0, %v3882_v57 }
0x2fea   :  { %3883 = vrcp.f32 %v2014_v58 }
0x2ff4   :  { %v3884_v59 = vpop.eup %3883 }
0x2ff5   :  { %v2039_v60 = vmul.f32 %v3884_v59, %v2037_v12 }
0x3046   :  { %v2042_v39 = vpop.permute.xlu0 %2041 }
0x3047   :  { %v2044_v44 = vmul.f32 %v3880_v3, %v2042_v39 }
0x3049   :  { %2046 = vrot.lane.b32.xlu0 %v2044_v44, %s4070_s21 }
0x30bb   :  { %v2047_v53 = vpop.permute.xlu0 %2046 }
0x30bc   :  { %v2049_v22 = vadd.f32 %v2047_v53, %v2039_v60 }
0x30be   :  { %3885 = vtanh.f32 %v2049_v22  ;;  %v2102_v38 = vrot.slane %v2049_v22, 6 }
0x30bf   :  { %3887 = vpow2.f32 %v3294_v32 }
0x30c8   :  { %v3886_v0 = vpop.eup %3885 }
0x30c9   :  { %2052 = vrot.lane.b32.xlu1 %v3886_v0, %s4070_s21  ;;  %v3888_v62 = vpop.eup %3887 }
0x30ca   :  { %v2025_v1 = vadd.f32 1.0, %v3888_v62 }
0x30cc   :  { %3889 = vrcp.f32 %v2025_v1 }
0x30d6   :  { %v3890_v2 = vpop.eup %3889 }
0x313b   :  { %v2053_v4 = vpop.permute.xlu1 %2052 }
0x313c   :  { %v4618_v5 = vmul.f32 %v3890_v2, %v2053_v4 }
0x313e   :  { %v2093_v7 = vmul.f32 %v4618_v5, %v4565_v47  ;;  %v2056_v8 = vmul.f32 %v4618_v5, %v4594_v24  ;;  %v2069_v42 = vmul.f32 %v4618_v5, %v4602_v35  ;;  %v2082_v49 = vmul.f32 %v4535_v15, %v4618_v5 }
0x3140   :  { %v2095_v9 = vrot.slane %v2093_v7, 6  ;;  %v2058_v10 = vrot.slane %v2056_v8, 6  ;;  %v2071_v11 = vrot.slane %v2069_v42, 6  ;;  %v2084_v50 = vrot.slane %v2082_v49, 6 }
0x3142   :  { %2096 = vrot.lane.b32.xlu0 %v2095_v9, %s4070_s21  ;;  %2059 = vrot.lane.b32.xlu1 %v2058_v10, %s4071_s24  ;;  %v2086_v51 = vadd.f32 %v2084_v50, %v4577_v29 }
0x3144   :  { %v3297_v52 = vmul.f32 -1.442695, %v2086_v51 }
0x3146   :  { %2072 = vrot.lane.b32.xlu1 %v2071_v11, %s4068_s18 }
0x31b4   :  { %v2097_v13 = vpop.permute.xlu0 %2096  ;;  %v2060_v21 = vpop.permute.xlu1 %2059 }
0x31b5   :  { %v2099_v25 = vadd.f32 %v2097_v13, %v4577_v29  ;;  %v2062_v16 = vadd.f32 %v2060_v21, %v4577_v29 }
0x31b7   :  { %3891 = vtanh.f32 %v2099_v25  ;;  %v3295_v14 = vmul.f32 -1.442695, %v2062_v16 }
0x31b8   :  { %v2073_v26 = vpop.permute.xlu1 %2072 }
0x31b9   :  { %3893 = vpow2.f32 %v3295_v14  ;;  %v2075_v31 = vadd.f32 %v2073_v26, %v4577_v29 }
0x31bb   :  { %v3296_v41 = vmul.f32 -1.442695, %v2075_v31 }
0x31c1   :  { %v3892_v18 = vpop.eup %3891 }
0x31c2   :  { %2106 = vrot.lane.b32.xlu0 %v3892_v18, %s4067_s17 }
0x31c3   :  { %v3894_v63 = vpop.eup %3893 }
0x31c4   :  { %v2066_v19 = vadd.f32 1.0, %v3894_v63 }
0x31c6   :  { %3895 = vrcp.f32 %v2066_v19 }
0x31c7   :  { %3897 = vpow2.f32 %v3296_v41 }
0x31d0   :  { %v3896_v6 = vpop.eup %3895 }
0x31d1   :  { %v3898_v34 = vpop.eup %3897 }
0x31d2   :  { %v2079_v36 = vadd.f32 1.0, %v3898_v34 }
0x31d4   :  { %3899 = vrcp.f32 %v2079_v36 }
0x31de   :  { %v3900_v37 = vpop.eup %3899 }
0x31df   :  { %v2104_v40 = vmul.f32 %v3900_v37, %v2102_v38 }
0x3234   :  { %v2107_v20 = vpop.permute.xlu0 %2106 }
0x3235   :  { %v2109_v23 = vmul.f32 %v3896_v6, %v2107_v20 }
0x3237   :  { %2111 = vrot.lane.b32.xlu0 %v2109_v23, %s4070_s21 }
0x32a9   :  { %v2112_v43 = vpop.permute.xlu0 %2111 }
0x32aa   :  { %v2114_v45 = vadd.f32 %v2112_v43, %v2104_v40 }
0x32ac   :  { %3901 = vtanh.f32 %v2114_v45  ;;  %v2167_v13 = vrot.slane %v2114_v45, 6 }
0x32ad   :  { %3903 = vpow2.f32 %v3297_v52 }
0x32b6   :  { %v3902_v46 = vpop.eup %3901 }
0x32b7   :  { %2117 = vrot.lane.b32.xlu1 %v3902_v46, %s4070_s21  ;;  %v3904_v3 = vpop.eup %3903 }
0x32b8   :  { %v2090_v39 = vadd.f32 1.0, %v3904_v3 }
0x32ba   :  { %3905 = vrcp.f32 %v2090_v39 }
0x32c4   :  { %v3906_v44 = vpop.eup %3905 }
0x3329   :  { %v2118_v55 = vpop.permute.xlu1 %2117 }
0x332a   :  { %v4638_v48 = vmul.f32 %v3906_v44, %v2118_v55 }
0x332c   :  { %v2158_v56 = vmul.f32 %v4638_v48, %v4565_v47  ;;  %v2121_v57 = vmul.f32 %v4638_v48, %v4594_v24  ;;  %v2134_v12 = vmul.f32 %v4638_v48, %v4602_v35  ;;  %v2147_v14 = vmul.f32 %v4535_v15, %v4638_v48 }
0x332e   :  { %v2160_v58 = vrot.slane %v2158_v56, 6  ;;  %v2123_v59 = vrot.slane %v2121_v57, 6  ;;  %v2136_v60 = vrot.slane %v2134_v12, 6  ;;  %v2149_v63 = vrot.slane %v2147_v14, 6 }
0x3330   :  { %2161 = vrot.lane.b32.xlu0 %v2160_v58, %s4070_s21  ;;  %2124 = vrot.lane.b32.xlu1 %v2123_v59, %s4071_s24  ;;  %v2151_v19 = vadd.f32 %v2149_v63, %v4577_v29 }
0x3332   :  { %v3300_v6 = vmul.f32 -1.442695, %v2151_v19 }
0x3334   :  { %2137 = vrot.lane.b32.xlu1 %v2136_v60, %s4068_s18 }
0x33a2   :  { %v2162_v53 = vpop.permute.xlu0 %2161  ;;  %v2125_v30 = vpop.permute.xlu1 %2124 }
0x33a3   :  { %v2164_v22 = vadd.f32 %v2162_v53, %v4577_v29  ;;  %v2127_v28 = vadd.f32 %v2125_v30, %v4577_v29 }
0x33a5   :  { %3907 = vtanh.f32 %v2164_v22  ;;  %v3298_v33 = vmul.f32 -1.442695, %v2127_v28 }
0x33a6   :  { %v2138_v7 = vpop.permute.xlu1 %2137 }
0x33a7   :  { %3909 = vpow2.f32 %v3298_v33  ;;  %v2140_v8 = vadd.f32 %v2138_v7, %v4577_v29 }
0x33a9   :  { %v3299_v9 = vmul.f32 -1.442695, %v2140_v8 }
0x33af   :  { %v3908_v0 = vpop.eup %3907 }
0x33b0   :  { %2171 = vrot.lane.b32.xlu0 %v3908_v0, %s4067_s17 }
0x33b1   :  { %v3910_v32 = vpop.eup %3909 }
0x33b2   :  { %v2131_v62 = vadd.f32 1.0, %v3910_v32 }
0x33b4   :  { %3911 = vrcp.f32 %v2131_v62 }
0x33b5   :  { %3913 = vpow2.f32 %v3299_v9 }
0x33be   :  { %v3912_v1 = vpop.eup %3911 }
0x33bf   :  { %v3914_v10 = vpop.eup %3913 }
0x33c0   :  { %v2144_v42 = vadd.f32 1.0, %v3914_v10 }
0x33c2   :  { %3915 = vrcp.f32 %v2144_v42 }
0x33cc   :  { %v3916_v11 = vpop.eup %3915 }
0x33cd   :  { %v2169_v25 = vmul.f32 %v3916_v11, %v2167_v13 }
0x3422   :  { %v2172_v2 = vpop.permute.xlu0 %2171 }
0x3423   :  { %v2174_v4 = vmul.f32 %v3912_v1, %v2172_v2 }
0x3425   :  { %2176 = vrot.lane.b32.xlu0 %v2174_v4, %s4070_s21 }
0x3497   :  { %v2177_v18 = vpop.permute.xlu0 %2176 }
0x3498   :  { %v2179_v21 = vadd.f32 %v2177_v18, %v2169_v25 }
0x349a   :  { %3917 = vtanh.f32 %v2179_v21  ;;  %v2232_v53 = vrot.slane %v2179_v21, 6 }
0x349b   :  { %3919 = vpow2.f32 %v3300_v6 }
0x34a4   :  { %v3918_v16 = vpop.eup %3917 }
0x34a5   :  { %2182 = vrot.lane.b32.xlu1 %v3918_v16, %s4070_s21  ;;  %v3920_v20 = vpop.eup %3919 }
0x34a6   :  { %v2155_v23 = vadd.f32 1.0, %v3920_v20 }
0x34a8   :  { %3921 = vrcp.f32 %v2155_v23 }
0x34b2   :  { %v3922_v26 = vpop.eup %3921 }
0x3517   :  { %v2183_v31 = vpop.permute.xlu1 %2182 }
0x3518   :  { %v4658_v41 = vmul.f32 %v3922_v26, %v2183_v31 }
0x351a   :  { %v2223_v34 = vmul.f32 %v4658_v41, %v4565_v47  ;;  %v2186_v36 = vmul.f32 %v4658_v41, %v4594_v24  ;;  %v2199_v29 = vmul.f32 %v4658_v41, %v4602_v35  ;;  %v2212_v33 = vmul.f32 %v4535_v15, %v4658_v41 }
0x351c   :  { %v2225_v37 = vrot.slane %v2223_v34, 6  ;;  %v2188_v38 = vrot.slane %v2186_v36, 6  ;;  %v2201_v40 = vrot.slane %v2199_v29, 6  ;;  %v2214_v32 = vrot.slane %v2212_v33, 6 }
0x351e   :  { %2226 = vrot.lane.b32.xlu0 %v2225_v37, %s4070_s21  ;;  %2189 = vrot.lane.b32.xlu1 %v2188_v38, %s4071_s24  ;;  %v2216_v62 = vadd.f32 %v2214_v32, %v4575_v54 }
0x3520   :  { %v3303_v1 = vmul.f32 -1.442695, %v2216_v62 }
0x3522   :  { %2202 = vrot.lane.b32.xlu1 %v2201_v40, %s4068_s18 }
0x3590   :  { %v2227_v43 = vpop.permute.xlu0 %2226  ;;  %v2190_v49 = vpop.permute.xlu1 %2189 }
0x3591   :  { %v2229_v45 = vadd.f32 %v2227_v43, %v4575_v54  ;;  %v2192_v50 = vadd.f32 %v2190_v49, %v4575_v54 }
0x3593   :  { %3923 = vtanh.f32 %v2229_v45  ;;  %v3301_v51 = vmul.f32 -1.442695, %v2192_v50 }
0x3594   :  { %v2203_v56 = vpop.permute.xlu1 %2202 }
0x3595   :  { %3925 = vpow2.f32 %v3301_v51  ;;  %v2205_v57 = vadd.f32 %v2203_v56, %v4575_v54 }
0x3597   :  { %v3302_v58 = vmul.f32 -1.442695, %v2205_v57 }
0x359d   :  { %v3924_v46 = vpop.eup %3923 }
0x359e   :  { %2236 = vrot.lane.b32.xlu0 %v3924_v46, %s4067_s17 }
0x359f   :  { %v3926_v52 = vpop.eup %3925 }
0x35a0   :  { %v2196_v3 = vadd.f32 1.0, %v3926_v52 }
0x35a2   :  { %3927 = vrcp.f32 %v2196_v3 }
0x35a3   :  { %3929 = vpow2.f32 %v3302_v58 }
0x35ac   :  { %v3928_v39 = vpop.eup %3927 }
0x35ad   :  { %v3930_v59 = vpop.eup %3929 }
0x35ae   :  { %v2209_v12 = vadd.f32 1.0, %v3930_v59 }
0x35b0   :  { %3931 = vrcp.f32 %v2209_v12 }
0x35ba   :  { %v3932_v60 = vpop.eup %3931 }
0x35bb   :  { %v2234_v22 = vmul.f32 %v3932_v60, %v2232_v53 }
0x3610   :  { %v2237_v44 = vpop.permute.xlu0 %2236 }
0x3611   :  { %v2239_v55 = vmul.f32 %v3928_v39, %v2237_v44 }
0x3613   :  { %2241 = vrot.lane.b32.xlu0 %v2239_v55, %s4070_s21 }
0x3685   :  { %v2242_v0 = vpop.permute.xlu0 %2241 }
0x3686   :  { %v2244_v30 = vadd.f32 %v2242_v0, %v2234_v22 }
0x3688   :  { %3933 = vtanh.f32 %v2244_v30  ;;  %v2297_v45 = vrot.slane %v2244_v30, 6 }
0x3689   :  { %3935 = vpow2.f32 %v3303_v1 }
0x3692   :  { %v3934_v28 = vpop.eup %3933 }
0x3693   :  { %2247 = vrot.lane.b32.xlu1 %v3934_v28, %s4070_s21  ;;  %v3936_v2 = vpop.eup %3935 }
0x3694   :  { %v2220_v4 = vadd.f32 1.0, %v3936_v2 }
0x3696   :  { %3937 = vrcp.f32 %v2220_v4 }
0x36a0   :  { %v3938_v7 = vpop.eup %3937 }
0x3705   :  { %v2248_v8 = vpop.permute.xlu1 %2247 }
0x3706   :  { %v4678_v9 = vmul.f32 %v3938_v7, %v2248_v8 }
0x3708   :  { %v2288_v10 = vmul.f32 %v4678_v9, %v4565_v47  ;;  %v2251_v42 = vmul.f32 %v4678_v9, %v4594_v24  ;;  %v2264_v25 = vmul.f32 %v4678_v9, %v4602_v35  ;;  %v2277_v52 = vmul.f32 %v4535_v15, %v4678_v9 }
0x370a   :  { %v2290_v11 = vrot.slane %v2288_v10, 6  ;;  %v2253_v13 = vrot.slane %v2251_v42, 6  ;;  %v2266_v18 = vrot.slane %v2264_v25, 6  ;;  %v2279_v3 = vrot.slane %v2277_v52, 6 }
0x370c   :  { %2291 = vrot.lane.b32.xlu0 %v2290_v11, %s4070_s21  ;;  %2254 = vrot.lane.b32.xlu1 %v2253_v13, %s4071_s24  ;;  %v2281_v39 = vadd.f32 %v2279_v3, %v4575_v54 }
0x370e   :  { %v3306_v44 = vmul.f32 -1.442695, %v2281_v39 }
0x3710   :  { %2267 = vrot.lane.b32.xlu1 %v2266_v18, %s4068_s18 }
0x377e   :  { %v2292_v21 = vpop.permute.xlu0 %2291  ;;  %v2255_v63 = vpop.permute.xlu1 %2254 }
0x377f   :  { %v2294_v16 = vadd.f32 %v2292_v21, %v4575_v54  ;;  %v2257_v19 = vadd.f32 %v2255_v63, %v4575_v54 }
0x3781   :  { %3939 = vtanh.f32 %v2294_v16  ;;  %v3304_v6 = vmul.f32 -1.442695, %v2257_v19 }
0x3782   :  { %v2268_v36 = vpop.permute.xlu1 %2267 }
0x3783   :  { %3941 = vpow2.f32 %v3304_v6  ;;  %v2270_v37 = vadd.f32 %v2268_v36, %v4575_v54 }
0x3785   :  { %v3305_v38 = vmul.f32 -1.442695, %v2270_v37 }
0x378b   :  { %v3940_v14 = vpop.eup %3939 }
0x378c   :  { %2301 = vrot.lane.b32.xlu0 %v3940_v14, %s4067_s17 }
0x378d   :  { %v3942_v20 = vpop.eup %3941 }
0x378e   :  { %v2261_v23 = vadd.f32 1.0, %v3942_v20 }
0x3790   :  { %3943 = vrcp.f32 %v2261_v23 }
0x3791   :  { %3945 = vpow2.f32 %v3305_v38 }
0x379a   :  { %v3944_v26 = vpop.eup %3943 }
0x379b   :  { %v3946_v29 = vpop.eup %3945 }
0x379c   :  { %v2274_v40 = vadd.f32 1.0, %v3946_v29 }
0x379e   :  { %3947 = vrcp.f32 %v2274_v40 }
0x37a8   :  { %v3948_v43 = vpop.eup %3947 }
0x37a9   :  { %v2299_v46 = vmul.f32 %v3948_v43, %v2297_v45 }
0x37fe   :  { %v2302_v31 = vpop.permute.xlu0 %2301 }
0x37ff   :  { %v2304_v34 = vmul.f32 %v3944_v26, %v2302_v31 }
0x3801   :  { %2306 = vrot.lane.b32.xlu0 %v2304_v34, %s4070_s21 }
0x3873   :  { %v2307_v49 = vpop.permute.xlu0 %2306 }
0x3874   :  { %v2309_v50 = vadd.f32 %v2307_v49, %v2299_v46 }
0x3876   :  { %3949 = vtanh.f32 %v2309_v50  ;;  %v2362_v14 = vrot.slane %v2309_v50, 6 }
0x3877   :  { %3951 = vpow2.f32 %v3306_v44 }
0x3880   :  { %v3950_v51 = vpop.eup %3949 }
0x3881   :  { %2312 = vrot.lane.b32.xlu1 %v3950_v51, %s4070_s21  ;;  %v3952_v55 = vpop.eup %3951 }
0x3882   :  { %v2285_v56 = vadd.f32 1.0, %v3952_v55 }
0x3884   :  { %3953 = vrcp.f32 %v2285_v56 }
0x388e   :  { %v3954_v57 = vpop.eup %3953 }
0x38f3   :  { %v2313_v58 = vpop.permute.xlu1 %2312 }
0x38f4   :  { %v4698_v59 = vmul.f32 %v3954_v57, %v2313_v58 }
0x38f6   :  { %v2353_v12 = vmul.f32 %v4698_v59, %v4565_v47  ;;  %v2316_v60 = vmul.f32 %v4698_v59, %v4594_v24  ;;  %v2329_v0 = vmul.f32 %v4698_v59, %v4602_v35  ;;  %v2342_v23 = vmul.f32 %v4535_v15, %v4698_v59 }
0x38f8   :  { %v2355_v53 = vrot.slane %v2353_v12, 6  ;;  %v2318_v22 = vrot.slane %v2316_v60, 6  ;;  %v2331_v30 = vrot.slane %v2329_v0, 6  ;;  %v2344_v26 = vrot.slane %v2342_v23, 6 }
0x38fa   :  { %2356 = vrot.lane.b32.xlu0 %v2355_v53, %s4070_s21  ;;  %2319 = vrot.lane.b32.xlu1 %v2318_v22, %s4071_s24  ;;  %v2346_v31 = vadd.f32 %v2344_v26, %v4575_v54 }
0x38fc   :  { %v3309_v34 = vmul.f32 -1.442695, %v2346_v31 }
0x38fe   :  { %2332 = vrot.lane.b32.xlu1 %v2331_v30, %s4068_s18 }
0x396c   :  { %v2357_v28 = vpop.permute.xlu0 %2356  ;;  %v2320_v62 = vpop.permute.xlu1 %2319 }
0x396d   :  { %v2359_v33 = vadd.f32 %v2357_v28, %v4575_v54  ;;  %v2322_v1 = vadd.f32 %v2320_v62, %v4575_v54 }
0x396f   :  { %3955 = vtanh.f32 %v2359_v33  ;;  %v3307_v2 = vmul.f32 -1.442695, %v2322_v1 }
0x3970   :  { %v2333_v11 = vpop.permute.xlu1 %2332 }
0x3971   :  { %3957 = vpow2.f32 %v3307_v2  ;;  %v2335_v13 = vadd.f32 %v2333_v11, %v4575_v54  ;;  %v4073_v2 = vmov 11  }
0x3972   :  { %3708 = vset.pattern.permute.xlu0 %v4073_v2  ;;  %3706 = vset.pattern.permute.xlu1 %v4073_v2 }
0x3973   :  { %v3308_v25 = vmul.f32 -1.442695, %v2335_v13  ;;  %v2451_v13 = vrot.slane %v4658_v41, 2 }
0x3979   :  { %v3956_v32 = vpop.eup %3955 }
0x397a   :  { %2366 = vrot.lane.b32.xlu0 %v3956_v32, %s4067_s17 }
0x397b   :  { %v3958_v4 = vpop.eup %3957 }
0x397c   :  { %v2326_v7 = vadd.f32 1.0, %v3958_v4 }
0x397e   :  { %3959 = vrcp.f32 %v2326_v7 }
0x397f   :  { %3961 = vpow2.f32 %v3308_v25 }
0x3988   :  { %v3960_v8 = vpop.eup %3959 }
0x3989   :  { %v3962_v18 = vpop.eup %3961 }
0x398a   :  { %v2339_v21 = vadd.f32 1.0, %v3962_v18 }
0x398c   :  { %3963 = vrcp.f32 %v2339_v21  ;;  %v2453_v21 = vmax.f32 %v4638_v48, %v2451_v13 }
0x3996   :  { %v3964_v16 = vpop.eup %3963 }
0x3997   :  { %v2364_v63 = vmul.f32 %v3964_v16, %v2362_v14  ;;  %v2447_v14 = vrot.slane %v4618_v5, 2 }
0x39ec   :  { %v2367_v10 = vpop.permute.xlu0 %2366 }
0x39ed   :  { %v2369_v42 = vmul.f32 %v3960_v8, %v2367_v10 }
0x39ef   :  { %2371 = vrot.lane.b32.xlu0 %v2369_v42, %s4070_s21 }
0x3a61   :  { %v2372_v19 = vpop.permute.xlu0 %2371 }
0x3a62   :  { %v2374_v6 = vadd.f32 %v2372_v19, %v2364_v63  ;;  %v2455_v63 = vrot.slane %v4698_v59, 2  ;;  %v2463_v19 = vrot.slane %v2453_v21, 4 }
0x3a64   :  { %3965 = vtanh.f32 %v2374_v6  ;;  %v2427_v28 = vrot.slane %v2374_v6, 6  ;;  %v2449_v6 = vmax.f32 %v4596_v27, %v2447_v14 }
0x3a65   :  { %3967 = vpow2.f32 %v3309_v34 }
0x3a66   :  { %v2465_v26 = vmax.f32 %v2449_v6, %v2463_v19  ;;  %v2869_v6 = vld [vmem:[%s5062_s3 + $0x80] sm:$0xff] }
0x3a6e   :  { %v3966_v20 = vpop.eup %3965 }
0x3a6f   :  { %2377 = vrot.lane.b32.xlu1 %v3966_v20, %s4070_s21  ;;  %v3968_v36 = vpop.eup %3967  ;;  %v2457_v20 = vmax.f32 %v4678_v9, %v2455_v63 }
0x3a70   :  { %v2350_v37 = vadd.f32 1.0, %v3968_v36 }
0x3a72   :  { %3969 = vrcp.f32 %v2350_v37 }
0x3a7c   :  { %v3970_v38 = vpop.eup %3969 }
0x3ae1   :  { %v2378_v29 = vpop.permute.xlu1 %2377 }
0x3ae2   :  { %v4718_v40 = vmul.f32 %v3970_v38, %v2378_v29 }
0x3ae4   :  { %v2418_v43 = vmul.f32 %v4718_v40, %v4565_v47  ;;  %v2381_v45 = vmul.f32 %v4718_v40, %v4594_v24  ;;  %v2394_v50 = vmul.f32 %v4718_v40, %v4602_v35  ;;  %v2407_v4 = vmul.f32 %v4535_v15, %v4718_v40 }
0x3ae6   :  { %v2420_v46 = vrot.slane %v2418_v43, 6  ;;  %v2383_v49 = vrot.slane %v2381_v45, 6  ;;  %v2396_v51 = vrot.slane %v2394_v50, 6  ;;  %v2409_v7 = vrot.slane %v2407_v4, 6 }
0x3ae8   :  { %2421 = vrot.lane.b32.xlu0 %v2420_v46, %s4070_s21  ;;  %2384 = vrot.lane.b32.xlu1 %v2383_v49, %s4071_s24  ;;  %v2411_v8 = vadd.f32 %v2409_v7, %v4575_v54 }
0x3aea   :  { %v3312_v10 = vmul.f32 -1.442695, %v2411_v8 }
0x3aec   :  { %2397 = vrot.lane.b32.xlu1 %v2396_v51, %s4068_s18 }
0x3b5a   :  { %v2422_v52 = vpop.permute.xlu0 %2421  ;;  %v2385_v24 = vpop.permute.xlu1 %2384 }
0x3b5b   :  { %v2424_v3 = vadd.f32 %v2422_v52, %v4575_v54  ;;  %v2387_v39 = vadd.f32 %v2385_v24, %v4575_v54 }
0x3b5d   :  { %3971 = vtanh.f32 %v2424_v3  ;;  %v3310_v44 = vmul.f32 -1.442695, %v2387_v39 }
0x3b5e   :  { %v2398_v12 = vpop.permute.xlu1 %2397 }
0x3b5f   :  { %3973 = vpow2.f32 %v3310_v44  ;;  %v2400_v60 = vadd.f32 %v2398_v12, %v4575_v54 }
0x3b61   :  { %v3311_v53 = vmul.f32 -1.442695, %v2400_v60 }
0x3b67   :  { %v3972_v47 = vpop.eup %3971 }
0x3b68   :  { %2431 = vrot.lane.b32.xlu0 %v3972_v47, %s4067_s17 }
0x3b69   :  { %v3974_v35 = vpop.eup %3973 }
0x3b6a   :  { %v2391_v55 = vadd.f32 1.0, %v3974_v35 }
0x3b6c   :  { %3975 = vrcp.f32 %v2391_v55 }
0x3b6d   :  { %3977 = vpow2.f32 %v3311_v53 }
0x3b76   :  { %v3976_v56 = vpop.eup %3975 }
0x3b77   :  { %v3978_v22 = vpop.eup %3977 }
0x3b78   :  { %v2404_v0 = vadd.f32 1.0, %v3978_v22 }
0x3b7a   :  { %3979 = vrcp.f32 %v2404_v0 }
0x3b84   :  { %v3980_v30 = vpop.eup %3979 }
0x3b85   :  { %v2429_v33 = vmul.f32 %v3980_v30, %v2427_v28 }
0x3bda   :  { %v2432_v57 = vpop.permute.xlu0 %2431 }
0x3bdb   :  { %v2434_v58 = vmul.f32 %v3976_v56, %v2432_v57 }
0x3bdd   :  { %2436 = vrot.lane.b32.xlu0 %v2434_v58, %s4070_s21 }
0x3c4f   :  { %v2437_v32 = vpop.permute.xlu0 %2436 }
0x3c50   :  { %v2439_v62 = vadd.f32 %v2437_v32, %v2429_v33 }
0x3c52   :  { %3981 = vtanh.f32 %v2439_v62 }
0x3c53   :  { %3983 = vpow2.f32 %v3312_v10 }
0x3c5c   :  { %v3982_v1 = vpop.eup %3981 }
0x3c5d   :  { %2442 = vrot.lane.b32.xlu1 %v3982_v1, %s4070_s21  ;;  %v3984_v42 = vpop.eup %3983 }
0x3c5e   :  { %v2415_v11 = vadd.f32 1.0, %v3984_v42 }
0x3c60   :  { %3985 = vrcp.f32 %v2415_v11 }
0x3c6a   :  { %v3986_v25 = vpop.eup %3985 }
0x3ccf   :  { %v2443_v18 = vpop.permute.xlu1 %2442 }
0x3cd0   :  { %v2445_v16 = vmul.f32 %v3986_v25, %v2443_v18  ;;  %v4074_v25 = vmov 9  }
0x3cd2   :  { %v2459_v15 = vrot.slane %v2445_v16, 2 }
0x3cd4   :  { %v2461_v54 = vmax.f32 %v4718_v40, %v2459_v15  ;;  %v4075_v15 = vmov 8  }
0x3cd6   :  { %v2467_v23 = vrot.slane %v2461_v54, 4  ;;  %v4076_v54 = vmov 10  }
0x3cd8   :  { %v2469_v31 = vmax.f32 %v2457_v20, %v2467_v23  ;;  %v2853_v20 = vld [vmem:[%s5062_s3] sm:$0xff] }
0x3cda   :  { %v2470_v34 = vmax.f32 %v2465_v26, %v2469_v31  ;;  %v2854_v26 = vld [vmem:[%s5062_s3 + $0x8] sm:$0xff]  ;;  %v2871_v31 = vld [vmem:[%s5062_s3 + $0x90] sm:$0xff] }
0x3cdc   :  { %v2475_v36 = vrot.slane %v2470_v34, 6  ;;  %v2480_v37 = vrot.slane %v2470_v34, 4  ;;  %v2485_v38 = vrot.slane %v2470_v34, 2  ;;  %v2471_v50 = vsub.f32 %v4596_v27, %v2470_v34 }
0x3cdd   :  { %v2490_v44 = vsub.f32 %v4678_v9, %v2470_v34  ;;  %v2872_v34 = vld [vmem:[%s5062_s3 + $0x98] sm:$0xff] }
0x3cde   :  { %v2477_v29 = vsub.f32 %v4618_v5, %v2475_v36  ;;  %v2482_v43 = vsub.f32 %v4638_v48, %v2480_v37  ;;  %v2487_v45 = vsub.f32 %v4658_v41, %v2485_v38  ;;  %v2493_v46 = vsub.f32 %v4698_v59, %v2475_v36 }
0x3cdf   :  { %v2499_v49 = vsub.f32 %v2445_v16, %v2485_v38  ;;  %v2496_v47 = vsub.f32 %v4718_v40, %v2480_v37  ;;  %v2472_v5 = vmul.f32 1.442695, %v2471_v50  ;;  %v2491_v41 = vmul.f32 1.442695, %v2490_v44  ;;  %v2855_v38 = vld [vmem:[%s5062_s3 + $0x10] sm:$0xff]  ;;  %v2857_v50 = vld [vmem:[%s5062_s3 + $0x20] sm:$0xff] }
0x3ce0   :  { %v2478_v51 = vmul.f32 1.442695, %v2477_v29  ;;  %v2488_v52 = vmul.f32 1.442695, %v2487_v45  ;;  %v2494_v3 = vmul.f32 1.442695, %v2493_v46  ;;  %v3604_v36 = vpack.c.bf16 %v2854_v26, %v2853_v20 }
0x3ce1   :  { %v2483_v24 = vmul.f32 1.442695, %v2482_v43  ;;  %v2500_v39 = vmul.f32 1.442695, %v2499_v49  ;;  %v2497_v48 = vmul.f32 1.442695, %v2496_v47  ;;  %v3606_v37 = vpack.c.bf16 %v2872_v34, %v2871_v31 }
0x3ce2   :  { %3987 = vpow2.f32 %v2478_v51  ;;  %v2856_v29 = vld [vmem:[%s5062_s3 + $0x18] sm:$0xff]  ;;  %v2873_v43 = vld [vmem:[%s5062_s3 + $0xa0] sm:$0xff]  ;;  %v2874_v45 = vld [vmem:[%s5062_s3 + $0xa8] sm:$0xff] }
0x3ce3   :  { %3989 = vpow2.f32 %v2488_v52  ;;  %v3608_v46 = vpack.c.bf16 %v2856_v29, %v2855_v38  ;;  %v3610_v49 = vpack.c.bf16 %v2874_v45, %v2873_v43  ;;  %v2858_v51 = vld [vmem:[%s5062_s3 + $0x28] sm:$0xff]  ;;  %v2875_v52 = vld [vmem:[%s5062_s3 + $0xb0] sm:$0xff]  ;;  %v2860_v44 = vld [vmem:[%s5062_s3 + $0x38] sm:$0xff] }
0x3ce4   :  { %3991 = vpow2.f32 %v2494_v3  ;;  %v2876_v3 = vld [vmem:[%s5062_s3 + $0xb8] sm:$0xff]  ;;  %v3612_v47 = vpack.c.bf16 %v2858_v51, %v2857_v50  ;;  %v4851_v20 = vld [vmem:[#allocation4] sm:$0x3] }
0x3ce5   :  { %3993 = vpow2.f32 %v2483_v24  ;;  %v3614_v24 = vpack.c.bf16 %v2876_v3, %v2875_v52  ;;  %v2719_v29 = vld [vmem:[#allocation4 + $0xa] sm:$0x3]  ;;  %v2760_v51 = vld [vmem:[#allocation4 + $0xc] sm:$0x3] }
0x3ce6   :  { %3995 = vpow2.f32 %v2500_v39  ;;  %v2859_v39 = vld [vmem:[%s5062_s3 + $0x30] sm:$0xff]  ;;  %v4858_v3 = vrot.slane %v2719_v29, 6 }
0x3ce7   :  { %3997 = vpow2.f32 %v2472_v5  ;;  %v2877_v5 = vld [vmem:[%s5062_s3 + $0xc0] sm:$0xff] }
0x3ce8   :  { %3999 = vpow2.f32 %v2497_v48  ;;  %v2878_v48 = vld [vmem:[%s5062_s3 + $0xc8] sm:$0xff] }
0x3ce9   :  { %4001 = vpow2.f32 %v2491_v41  ;;  %v3616_v41 = vpack.c.bf16 %v2860_v44, %v2859_v39 }
0x3cec   :  { %v3988_v27 = vpop.eup %3987 }
0x3ced   :  { %v3990_v59 = vpop.eup %3989  ;;  %v2503_v56 = vrot.slane %v3988_v27, 2 }
0x3cee   :  { %v3992_v35 = vpop.eup %3991  ;;  %v2507_v55 = vrot.slane %v3990_v59, 2 }
0x3cef   :  { %v3994_v40 = vpop.eup %3993  ;;  %v2511_v60 = vrot.slane %v3992_v35, 2 }
0x3cf0   :  { %v3996_v57 = vpop.eup %3995  ;;  %v2509_v58 = vadd.f32 %v3994_v40, %v2507_v55  ;;  %v2879_v55 = vld [vmem:[%s5062_s3 + $0xd0] sm:$0xff] }
0x3cf1   :  { %v3998_v12 = vpop.eup %3997  ;;  %v2515_v9 = vrot.slane %v3996_v57, 2 }
0x3cf2   :  { %v4000_v53 = vpop.eup %3999  ;;  %v2519_v22 = vrot.slane %v2509_v58, 4  ;;  %v2505_v0 = vadd.f32 %v3998_v12, %v2503_v56  ;;  %v2863_v58 = vld [vmem:[%s5062_s3 + $0x50] sm:$0xff] }
0x3cf3   :  { %v2517_v30 = vadd.f32 %v4000_v53, %v2515_v9  ;;  %v4002_v28 = vpop.eup %4001  ;;  %v2881_v9 = vld [vmem:[%s5062_s3 + $0xe0] sm:$0xff] }
0x3cf4   :  { %v2521_v33 = vadd.f32 %v2519_v22, %v2505_v0  ;;  %v2513_v62 = vadd.f32 %v4002_v28, %v2511_v60  ;;  %v2882_v60 = vld [vmem:[%s5062_s3 + $0xe8] sm:$0xff]  ;;  %v2865_v0 = vld [vmem:[%s5062_s3 + $0x60] sm:$0xff] }
0x3cf5   :  { %v2523_v32 = vrot.slane %v2517_v30, 4  ;;  %v3626_v22 = vpack.c.bf16 %v2882_v60, %v2881_v9  ;;  %v2866_v30 = vld [vmem:[%s5062_s3 + $0x68] sm:$0xff]  ;;  %v2883_v60 = vld [vmem:[%s5062_s3 + $0xf0] sm:$0xff] }
0x3cf7   :  { %v2525_v1 = vadd.f32 %v2523_v32, %v2513_v62 }
0x3cf9   :  { %v2526_v4 = vadd.f32 %v2525_v1, %v2521_v33 }
0x3cfb   :  { %4003 = vrcp.f32 %v2526_v4 }
0x3d05   :  { %v4004_v7 = vpop.eup %4003 }
0x3d06   :  { %v2540_v8 = vmul.f32 %v4004_v7, %v4002_v28  ;;  %v2529_v10 = vmul.f32 %v4004_v7, %v3998_v12  ;;  %v2531_v42 = vrot.slane %v4004_v7, 6  ;;  %v2534_v13 = vrot.slane %v4004_v7, 4  ;;  %v2864_v12 = vld [vmem:[%s5062_s3 + $0x58] sm:$0xff] }
0x3d07   :  { %v2537_v21 = vrot.slane %v4004_v7, 2  ;;  %v3628_v28 = vpack.c.bf16 %v2866_v30, %v2865_v0 }
0x3d08   :  { %2714 = vperm.xlu0 %3708, %v2540_v8   ;;  %2565 = vperm.xlu1 %3706, %v2529_v10   ;;  %v2533_v11 = vmul.f32 %v3988_v27, %v2531_v42  ;;  %v2536_v18 = vmul.f32 %v3994_v40, %v2534_v13  ;;  %v2541_v16 = vmul.f32 %v3992_v35, %v2531_v42  ;;  %v2862_v35 = vld [vmem:[%s5062_s3 + $0x48] sm:$0xff]  ;;  %v2880_v40 = vld [vmem:[%s5062_s3 + $0xd8] sm:$0xff]  ;;  %v2570_v42 = vld [vmem:[#allocation4 + $0x2] sm:$0x3] }
0x3d09   :  { %v2539_v14 = vmul.f32 %v3990_v59, %v2537_v21  ;;  %v2543_v63 = vmul.f32 %v3996_v57, %v2537_v21  ;;  %v2542_v19 = vmul.f32 %v4000_v53, %v2534_v13  ;;  %v3618_v27 = vpack.c.bf16 %v2878_v48, %v2877_v5  ;;  %v2861_v59 = vld [vmem:[%s5062_s3 + $0x40] sm:$0xff] }
0x3d0a   :  { %v3620_v56 = vpack.c.bf16 %v2862_v35, %v2861_v59  ;;  %v3622_v57 = vpack.c.bf16 %v2880_v40, %v2879_v55  ;;  %v3624_v53 = vpack.c.bf16 %v2864_v12, %v2863_v58  ;;  %v4842_v13 = vrot.slane %v2570_v42, 6  ;;  %v4864_v35 = vld [vmem:[#allocation4 + $0x8] sm:$0x3]  ;;  %v2801_v55 = vld [vmem:[#allocation4 + $0xe] sm:$0x3] }
0x3d0c   :  { %2603 = vperm.xlu0 %3708, %v2533_v11   ;;  %3707 = vset.pattern.permute.xlu1 %v4074_v25 }
0x3d0d   :  { %2553 = vperm.xlu1 %3707, %v2529_v10  }
0x3d10   :  { %2644 = vperm.xlu0 %3708, %v2536_v18  }
0x3d11   :  { %2702 = vperm.xlu1 %3707, %v2540_v8  }
0x3d14   :  { %3709 = vset.pattern.permute.xlu0 %v4074_v25 }
0x3d15   :  { %2626 = vperm.xlu0 %3709, %v2536_v18   ;;  %2585 = vperm.xlu1 %3707, %v2533_v11  }
0x3d19   :  { %2734 = vperm.xlu0 %3709, %v2541_v16   ;;  %3710 = vset.pattern.permute.xlu1 %v4073_v2 }
0x3d1a   :  { %2685 = vperm.xlu1 %3710, %v2539_v14  }
0x3d1d   :  { %3714 = vset.pattern.permute.xlu0 %v4073_v2 }
0x3d1e   :  { %2834 = vperm.xlu0 %3714, %v2543_v63   ;;  %3711 = vset.pattern.permute.xlu1 %v4074_v25 }
0x3d1f   :  { %2667 = vperm.xlu1 %3711, %v2539_v14  }
0x3d22   :  { %3716 = vset.pattern.permute.xlu0 %v4075_v15 }
0x3d23   :  { %2547 = vperm.xlu0 %3716, %v2529_v10   ;;  %3712 = vset.pattern.permute.xlu1 %v4073_v2 }
0x3d24   :  { %2752 = vperm.xlu1 %3712, %v2541_v16  }
0x3d27   :  { %2573 = vperm.xlu0 %3716, %v2533_v11  }
0x3d28   :  { %2793 = vperm.xlu1 %3712, %v2542_v19  }
0x3d2b   :  { %3720 = vset.pattern.permute.xlu0 %v4076_v54 }
0x3d2c   :  { %2676 = vperm.xlu0 %3720, %v2539_v14   ;;  %3713 = vset.pattern.permute.xlu1 %v4074_v25  ;;  %v2611_v25 = vld [vmem:[#allocation4 + $0x4] sm:$0x3] }
0x3d2d   :  { %2775 = vperm.xlu1 %3713, %v2542_v19  }
0x3d30   :  { %2743 = vperm.xlu0 %3720, %v2541_v16  }
0x3d31   :  { %2816 = vperm.xlu1 %3713, %v2543_v63  }
0x3d34   :  { %3721 = vset.pattern.permute.xlu0 %v4075_v15 }
0x3d35   :  { %2722 = vperm.xlu0 %3721, %v2541_v16   ;;  %3715 = vset.pattern.permute.xlu1 %v4076_v54  ;;  %v2652_v16 = vld [vmem:[#allocation4 + $0x6] sm:$0x3] }
0x3d36   :  { %2559 = vperm.xlu1 %3715, %v2529_v10  }
0x3d39   :  { %3724 = vset.pattern.permute.xlu0 %v4076_v54 }
0x3d3a   :  { %2825 = vperm.xlu0 %3724, %v2543_v63   ;;  %2708 = vperm.xlu1 %3715, %v2540_v8  }
0x3d3e   :  { %3717 = vset.pattern.permute.xlu1 %v4075_v15  ;;  %3730 = vset.pattern.permute.xlu0 %v4073_v2  ;;  %v2870_v2 = vld [vmem:[%s5062_s3 + $0x88] sm:$0xff] }
0x3d3f   :  { %2696 = vperm.xlu1 %3717, %v2540_v8   ;;  %v3602_v23 = vpack.c.bf16 %v2870_v2, %v2869_v6 }
0x3d41   :  { %3603 = vmatprep.subr.bf16.mxu1 %v3602_v23 }
0x3d42   :  { %3605 = vmatpush3.bf16.msra.mxu1 %v3604_v36 }
0x3d43   :  { %3718 = vset.pattern.permute.xlu1 %v4076_v54  ;;  %3607 = vmatprep.subr.bf16.mxu1 %v3606_v37 }
0x3d44   :  { %2594 = vperm.xlu1 %3718, %v2533_v11  }
0x3d46   :  { %3609 = vmatpush3.bf16.msra.mxu1 %v3608_v46 }
0x3d47   :  { %3611 = vmatprep.subr.bf16.mxu1 %v3610_v49 }
0x3d48   :  { %2635 = vperm.xlu1 %3718, %v2536_v18  }
0x3d4a   :  { %3613 = vmatpush3.bf16.msra.mxu1 %v3612_v47 }
0x3d4b   :  { %3615 = vmatprep.subr.bf16.mxu1 %v3614_v24 }
0x3d4c   :  { %3719 = vset.pattern.permute.xlu1 %v4075_v15 }
0x3d4d   :  { %2614 = vperm.xlu1 %3719, %v2536_v18  }
0x3d4e   :  { %3617 = vmatpush3.bf16.msra.mxu1 %v3616_v41  ;;  %v4862_v41 = vrot.slane %v2760_v51, 4 }
0x3d4f   :  { %3619 = vmatprep.subr.bf16.mxu1 %v3618_v27 }
0x3d51   :  { %2655 = vperm.xlu1 %3719, %v2539_v14  }
0x3d52   :  { %3621 = vmatpush3.bf16.msra.mxu1 %v3620_v56 }
0x3d53   :  { %3623 = vmatprep.subr.bf16.mxu1 %v3622_v57 }
0x3d55   :  { %3722 = vset.pattern.permute.xlu1 %v4076_v54  ;;  %v4849_v54 = vrot.slane %v2652_v16, 2 }
0x3d56   :  { %2784 = vperm.xlu1 %3722, %v2542_v19   ;;  %3625 = vmatpush3.bf16.msra.mxu1 %v3624_v53  ;;  %v2884_v53 = vld [vmem:[%s5062_s3 + $0xf8] sm:$0xff] }
0x3d57   :  { %3627 = vmatprep.subr.bf16.mxu1 %v3626_v22 }
0x3d5a   :  { %3723 = vset.pattern.permute.xlu1 %v4075_v15  ;;  %3629 = vmatpush3.bf16.msra.mxu1 %v3628_v28  ;;  %v3630_v28 = vpack.c.bf16 %v2884_v53, %v2883_v60  ;;  %v3052_v60 = vld [vmem:[%s5062_s3 + $0x170] sm:$0xff] }
0x3d5b   :  { %2763 = vperm.xlu1 %3723, %v2542_v19  }
0x3d5c   :  { %3631 = vmatprep.subr.bf16.mxu1 %v3630_v28 }
0x3d5f   :  { %2804 = vperm.xlu1 %3723, %v2543_v63   ;;  %v4846_v63 = vrot.slane %v2611_v25, 4  ;;  %v2886_v25 = vld [vmem:[%s5062_s3 + $0x108] sm:$0xff] }
0x3d87   :  { %v2715_v33 = vpop.permute.xlu0 %2714  ;;  %v2566_v32 = vpop.permute.xlu1 %2565 }
0x3d88   :  { %v2568_v37 = vmul.f32 %v2566_v32, %v4851_v20  ;;  %v2717_v12 = vmul.f32 %v2715_v33, %v4864_v35  ;;  %v2867_v33 = vld [vmem:[%s5062_s3 + $0x70] sm:$0xff]  ;;  %v2868_v32 = vld [vmem:[%s5062_s3 + $0x78] sm:$0xff] }
0x3d8b   :  { %v2604_v62 = vpop.permute.xlu0 %2603 }
0x3d8c   :  { %v2554_v1 = vpop.permute.xlu1 %2553  ;;  %v2606_v14 = vmul.f32 %v2604_v62, %v4842_v13  ;;  %v4885_v62 = vrot.slane %v2801_v55, 2 }
0x3d8d   :  { %v2556_v31 = vmul.f32 %v2554_v1, %v4851_v20 }
0x3d8e   :  { %v2608_v23 = vrot.slane %v2606_v14, 2 }
0x3d8f   :  { %v2645_v4 = vpop.permute.xlu0 %2644 }
0x3d90   :  { %v2703_v7 = vpop.permute.xlu1 %2702  ;;  %v2647_v19 = vmul.f32 %v2645_v4, %v4846_v63  ;;  %v2610_v49 = vadd.f32 %v2608_v23, %v2568_v37  ;;  %v3632_v4 = vpack.c.bf16 %v2868_v32, %v2867_v33 }
0x3d91   :  { %v2705_v9 = vmul.f32 %v2703_v7, %v4864_v35 }
0x3d92   :  { %v2649_v38 = vrot.slane %v2647_v19, 4  ;;  %3633 = vmatpush3.bf16.msra.mxu1 %v3632_v4 }
0x3d93   :  { %3661 = vmatprep.subr.bf16.mxu1 %v4065_v61 }
0x3d94   :  { %v2627_v8 = vpop.permute.xlu0 %2626  ;;  %v2586_v10 = vpop.permute.xlu1 %2585  ;;  %v2651_v24 = vadd.f32 %v2649_v38, %v2610_v49 }
0x3d95   :  { %v2588_v21 = vmul.f32 %v2586_v10, %v4842_v13  ;;  %v2629_v34 = vmul.f32 %v2627_v8, %v4846_v63 }
0x3d97   :  { %v2590_v2 = vrot.slane %v2588_v21, 2  ;;  %v2631_v52 = vrot.slane %v2629_v34, 4  ;;  %v3042_v34 = vld [vmem:[%s5062_s3 + $0x120] sm:$0xff] }
0x3d98   :  { %v2735_v11 = vpop.permute.xlu0 %2734 }
0x3d99   :  { %v2686_v18 = vpop.permute.xlu1 %2685  ;;  %v2592_v45 = vadd.f32 %v2590_v2, %v2556_v31  ;;  %v2737_v22 = vmul.f32 %v2735_v11, %v4858_v3  ;;  %v2885_v11 = vld [vmem:[%s5062_s3 + $0x100] sm:$0xff]  ;;  %v3041_v2 = vld [vmem:[%s5062_s3 + $0x118] sm:$0xff] }
0x3d9a   :  { %v2688_v26 = vmul.f32 %v2686_v18, %v4849_v54  ;;  %v3635_v18 = vpack.c.bf16 %v2886_v25, %v2885_v11  ;;  %v3638_v37 = vpack.c.bf16 %v3042_v34, %v3041_v2 }
0x3d9b   :  { %v2633_v44 = vadd.f32 %v2631_v52, %v2592_v45  ;;  %v2739_v21 = vrot.slane %v2737_v22, 2  ;;  %v3043_v45 = vld [vmem:[%s5062_s3 + $0x128] sm:$0xff] }
0x3d9c   :  { %v2690_v50 = vrot.slane %v2688_v26, 6  ;;  %3636 = vmatpush3.bf16.msra.mxu0 %v3635_v18 }
0x3d9d   :  { %v2835_v15 = vpop.permute.xlu0 %2834  ;;  %3441 = vmatprep.subr.mxu0 %v4064_v17 }
0x3d9e   :  { %v2668_v6 = vpop.permute.xlu1 %2667  ;;  %v2692_v59 = vadd.f32 %v2690_v50, %v2651_v24  ;;  %v2837_v16 = vmul.f32 %v2835_v15, %v4885_v62  ;;  %v2887_v15 = vld [vmem:[%s5062_s3 + $0x110] sm:$0xf]  ;;  %v3045_v24 = vld [vmem:[%s5062_s3 + $0x138] sm:$0xff] }
0x3d9f   :  { %v2670_v36 = vmul.f32 %v2668_v6, %v4849_v54 }
0x3da0   :  { %v2718_v8 = vadd.f32 %v2717_v12, %v2692_v59  ;;  %v2839_v38 = vrot.slane %v2837_v16, 6  ;;  %3442 = vmatpush3.msk.msra.mxu0 %vm1714_vm8, %v2887_v15 }
0x3da1   :  { %v2672_v47 = vrot.slane %v2670_v36, 6  ;;  %v2842_v36 = vld [vmem:[%s5060_s1] sm:$0x3]  ;;  %3637 = vmatprep.subr.bf16.mxu0 %v4065_v61 }
0x3da2   :  { %v2548_v43 = vpop.permute.xlu0 %2547  ;;  %3444 = vmatmul.mubr.msk.f32.vlgmr.msra.gmra.mrb[34].mxu0 %vm2893_vm10, %v2842_v36 }
0x3da3   :  { %v2753_v46 = vpop.permute.xlu1 %2752  ;;  %v2674_v40 = vadd.f32 %v2672_v47, %v2633_v44  ;;  %v2550_v56 = vmul.f32 %v2548_v43, %v4851_v20  ;;  %3639 = vmatpush3.bf16.msra.mxu0 %v3638_v37  ;;  %3478 = vmatprep.mubr.msk.f32.mxu0 %vm4066_vm7, %v4064_v17 }
0x3da4   :  { %v2755_v5 = vmul.f32 %v2753_v46, %v4858_v3  ;;  %v3044_v46 = vld [vmem:[%s5062_s3 + $0x130] sm:$0xff]  ;;  %3640 = vmatprep.subr.bf16.mxu0 %v4065_v61 }
0x3da5   :  { %v2706_v7 = vadd.f32 %v2705_v9, %v2674_v40  ;;  %v3641_v52 = vpack.c.bf16 %v3044_v46, %v3043_v45  ;;  %v3049_v40 = vld [vmem:[%s5062_s3 + $0x158] sm:$0xff]  ;;  %v3051_v9 = vld [vmem:[%s5062_s3 + $0x168] sm:$0xff] }
0x3da6   :  { %v2574_v39 = vpop.permute.xlu0 %2573  ;;  %v2757_v0 = vrot.slane %v2755_v5, 2  ;;  %v3653_v28 = vpack.c.bf16 %v3052_v60, %v3051_v9  ;;  %v3133_v9 = vld [vmem:[%s5063_s4 + $0x78] sm:$0xff]  ;;  %v3134_v60 = vld [vmem:[%s5063_s4 + $0x80] sm:$0xff] }
0x3da7   :  { %v2579_v48 = vmul.f32 %v4842_v13, %v2574_v39  ;;  %v2794_v27 = vpop.permute.xlu1 %2793  ;;  %v2741_v26 = vadd.f32 %v2739_v21, %v2706_v7  ;;  %v3046_v39 = vld [vmem:[%s5062_s3 + $0x140] sm:$0xff]  ;;  %3642 = vmatpush3.bf16.msra.mxu0 %v3641_v52 }
0x3da8   :  { %v2796_v58 = vmul.f32 %v2794_v27, %v4862_v41  ;;  %v2759_v14 = vadd.f32 %v2757_v0, %v2718_v8  ;;  %v3644_v5 = vpack.c.bf16 %v3046_v39, %v3045_v24  ;;  %3643 = vmatprep.subr.bf16.mxu0 %v4065_v61  ;;  %v3048_v27 = vld [vmem:[%s5062_s3 + $0x150] sm:$0xff] }
0x3da9   :  { %v2581_v57 = vrot.slane %v2579_v48, 2  ;;  %v3047_v48 = vld [vmem:[%s5062_s3 + $0x148] sm:$0xff] }
0x3daa   :  { %v2798_v10 = vrot.slane %v2796_v58, 4  ;;  %v3647_v55 = vpack.c.bf16 %v3048_v27, %v3047_v48 }
0x3dab   :  { %v4877_v30 = vadd.f32 %v2581_v57, %v2550_v56  ;;  %3645 = vmatpush3.bf16.msra.mxu0 %v3644_v5  ;;  %v3050_v56 = vld [vmem:[%s5062_s3 + $0x160] sm:$0xff]  ;;  %v2677_v58 = vpop.permute.xlu0 %2676 }
0x3dac   :  { %v2776_v1 = vpop.permute.xlu1 %2775  ;;  %v2800_v23 = vadd.f32 %v2798_v10, %v2759_v14  ;;  %3646 = vmatprep.subr.bf16.mxu0 %v4065_v61  ;;  %v3650_v57 = vpack.c.bf16 %v3050_v56, %v3049_v40  ;;  %v2679_v32 = vmul.f32 %v2677_v58, %v4849_v54 }
0x3dad   :  { %v2778_v42 = vmul.f32 %v2776_v1, %v4862_v41 }
0x3dae   :  { %v2841_v49 = vadd.f32 %v2839_v38, %v2800_v23  ;;  %v2681_v10 = vrot.slane %v2679_v32, 6  ;;  %v3138_v32 = vld [vmem:[%s5063_s4 + $0xa0] sm:$0xff] }
0x3daf   :  { %v2780_v19 = vrot.slane %v2778_v42, 4  ;;  %3648 = vmatpush3.bf16.msra.mxu0 %v3647_v55  ;;  %v2744_v7 = vpop.permute.xlu0 %2743 }
0x3db0   :  { %v2817_v6 = vpop.permute.xlu1 %2816  ;;  %3649 = vmatprep.subr.bf16.mxu0 %v4065_v61 }
0x3db1   :  { %v2819_v31 = vmul.f32 %v2817_v6, %v4885_v62  ;;  %v2782_v29 = vadd.f32 %v2780_v19, %v2741_v26 }
0x3db3   :  { %v2821_v43 = vrot.slane %v2819_v31, 6  ;;  %3651 = vmatpush3.bf16.msra.mxu0 %v3650_v57  ;;  %v3055_v57 = vld [vmem:[%s5062_s3 + $0x188] sm:$0xff] }
0x3db4   :  { %3652 = vmatprep.subr.bf16.mxu0 %v4065_v61  ;;  %v2723_v14 = vpop.permute.xlu0 %2722 }
0x3db5   :  { %v2823_v50 = vadd.f32 %v2821_v43, %v2782_v29  ;;  %v2560_v51 = vpop.permute.xlu1 %2559  ;;  %v2728_v31 = vmul.f32 %v4858_v3, %v2723_v14 }
0x3db6   :  { %v2562_v22 = vmul.f32 %v2560_v51, %v4851_v20 }
0x3db7   :  { %v3725_v47 = vpack.i.bf16 %v2823_v50, %v2841_v49  ;;  %3654 = vmatpush3.bf16.msra.mxu0 %v3653_v28  ;;  %v2730_v38 = vrot.slane %v2728_v31, 2 }
0x3db8   :  { %3655 = vmatprep.subr.bf16.mxu0 %v4065_v61 }
0x3db9   :  { %3726 = vrot.lane.b32.xlu1 %v3725_v47, %s4062_s14  ;;  %v2709_v44 = vpop.permute.xlu1 %2708  ;;  %v2826_v52 = vpop.permute.xlu0 %2825 }
0x3dba   :  { %v2711_v25 = vmul.f32 %v2709_v44, %v4864_v35 }
0x3dbe   :  { %v2697_v59 = vpop.permute.xlu1 %2696 }
0x3dbf   :  { %v2699_v34 = vmul.f32 %v2697_v59, %v4864_v35  ;;  %v2828_v35 = vmul.f32 %v2826_v52, %v4885_v62 }
0x3dc1   :  { %v2830_v24 = vrot.slane %v2828_v35, 6 }
0x3dc3   :  { %v2595_v12 = vpop.permute.xlu1 %2594 }
0x3dc4   :  { %v2597_v53 = vmul.f32 %v2595_v12, %v4842_v13  ;;  %v2746_v13 = vmul.f32 %v2744_v7, %v4858_v3  ;;  %v3140_v7 = vld [vmem:[%s5063_s4 + $0xb0] sm:$0xff] }
0x3dc6   :  { %v2599_v0 = vrot.slane %v2597_v53, 2  ;;  %v2748_v16 = vrot.slane %v2746_v13, 2  ;;  %v3135_v53 = vld [vmem:[%s5063_s4 + $0x88] sm:$0xff]  ;;  %v3142_v13 = vld [vmem:[%s5063_s4 + $0xc0] sm:$0xff] }
0x3dc7   :  { %v2636_v33 = vpop.permute.xlu1 %2635 }
0x3dc8   :  { %v2601_v1 = vadd.f32 %v2599_v0, %v2562_v22  ;;  %v2638_v4 = vmul.f32 %v2636_v33, %v4846_v63  ;;  %v3662_v22 = vpack.c.bf16 %v3134_v60, %v3133_v9  ;;  %v3136_v0 = vld [vmem:[%s5063_s4 + $0x90] sm:$0xff]  ;;  %v3137_v33 = vld [vmem:[%s5063_s4 + $0x98] sm:$0xff] }
0x3dc9   :  { %v3665_v28 = vpack.c.bf16 %v3136_v0, %v3135_v53 }
0x3dca   :  { %v2640_v8 = vrot.slane %v2638_v4, 4  ;;  %v3139_v4 = vld [vmem:[%s5063_s4 + $0xa8] sm:$0xff] }
0x3dcc   :  { %v2642_v20 = vadd.f32 %v2640_v8, %v2601_v1  ;;  %v2615_v42 = vpop.permute.xlu1 %2614  ;;  %v3668_v1 = vpack.c.bf16 %v3138_v32, %v3137_v33  ;;  %v3671_v8 = vpack.c.bf16 %v3140_v7, %v3139_v4 }
0x3dcd   :  { %v2620_v11 = vmul.f32 %v4846_v63, %v2615_v42  ;;  %v3143_v42 = vld [vmem:[%s5063_s4 + $0xc8] sm:$0xff] }
0x3dce   :  { %v2683_v18 = vadd.f32 %v2681_v10, %v2642_v20  ;;  %v3141_v10 = vld [vmem:[%s5063_s4 + $0xb8] sm:$0xff] }
0x3dcf   :  { %v2622_v21 = vrot.slane %v2620_v11, 4  ;;  %v3674_v20 = vpack.c.bf16 %v3142_v13, %v3141_v10  ;;  %v3144_v11 = vld [vmem:[%s5063_s4 + $0xd0] sm:$0xff] }
0x3dd0   :  { %v2656_v19 = vpop.permute.xlu1 %2655  ;;  %v2712_v6 = vadd.f32 %v2711_v25, %v2683_v18  ;;  %v3677_v25 = vpack.c.bf16 %v3144_v11, %v3143_v42  ;;  %v3145_v18 = vld [vmem:[%s5063_s4 + $0xd8] sm:$0xff] }
0x3dd1   :  { %v2624_v2 = vadd.f32 %v2622_v21, %v4877_v30  ;;  %v2661_v23 = vmul.f32 %v4849_v54, %v2656_v19  ;;  %v3146_v21 = vld [vmem:[%s5063_s4 + $0xe0] sm:$0xff] }
0x3dd2   :  { %v2750_v26 = vadd.f32 %v2748_v16, %v2712_v6  ;;  %v3680_v16 = vpack.c.bf16 %v3146_v21, %v3145_v18  ;;  %v3313_v6 = vld [vmem:[%s5062_s3 + $0x198] ss:$0 sm:$0xff] }
0x3dd3   :  { %v2663_v15 = vrot.slane %v2661_v23, 6 }
0x3dd5   :  { %v2665_v36 = vadd.f32 %v2663_v15, %v2624_v2  ;;  %v2785_v63 = vpop.permute.xlu1 %2784  ;;  %v3147_v15 = vld [vmem:[%s5063_s4 + $0xe8] sm:$0xff] }
0x3dd6   :  { %v2787_v37 = vmul.f32 %v2785_v63, %v4862_v41 }
0x3dd7   :  { %v2700_v29 = vadd.f32 %v2699_v34, %v2665_v36  ;;  %v3148_v34 = vld [vmem:[%s5063_s4 + $0xf0] sm:$0xff]  ;;  %v3316_v36 = vld [vmem:[%s5062_s3 + $0x1a0] ss:$0 sm:$0xff] }
0x3dd8   :  { %v2789_v43 = vrot.slane %v2787_v37, 4 }
0x3dd9   :  { %v2732_v45 = vadd.f32 %v2730_v38, %v2700_v29 }
0x3dda   :  { %v2791_v46 = vadd.f32 %v2789_v43, %v2750_v26  ;;  %v2764_v49 = vpop.permute.xlu1 %2763  ;;  %v3317_v43 = vld [vmem:[%s5063_s4 + $0xf8] ss:$0 sm:$0xff] }
0x3ddb   :  { %v2769_v30 = vmul.f32 %v4862_v41, %v2764_v49  ;;  %v3053_v41 = vld [vmem:[%s5062_s3 + $0x178] sm:$0xff] }
0x3ddc   :  { %v2832_v44 = vadd.f32 %v2830_v24, %v2791_v46 }
0x3ddd   :  { %v2771_v50 = vrot.slane %v2769_v30, 4 }
0x3dde   :  { %v2805_v51 = vpop.permute.xlu1 %2804 }
0x3ddf   :  { %v2773_v54 = vadd.f32 %v2771_v50, %v2732_v45  ;;  %v2810_v3 = vmul.f32 %v4885_v62, %v2805_v51  ;;  %v3054_v62 = vld [vmem:[%s5062_s3 + $0x180] sm:$0xff] }
0x3de0   :  { %v3656_v40 = vpack.c.bf16 %v3054_v62, %v3053_v41 }
0x3de1   :  { %v2812_v47 = vrot.slane %v2810_v3, 6 }
0x3de2   :  { %3657 = vmatpush3.bf16.msra.mxu0 %v3656_v40 }
0x3de3   :  { %v2814_v5 = vadd.f32 %v2812_v47, %v2773_v54  ;;  %3658 = vmatprep.subr.bf16.mxu0 %v4065_v61 }
0x3e2b   :  { %v3727_v39 = vpop.permute.xlu1 %3726 }
0x3e2c   :  { %v3729_v48 = vunpack.i.h.bf16 %v3727_v39  ;;  %v3728_v27 = vunpack.i.l.bf16 %v3727_v39 }
0x3e2e   :  { %v2852_v59 = vsel %vm927_vm6, %v2832_v44, %v3728_v27  ;;  %v2851_v55 = vsel %vm927_vm6, %v2814_v5, %v3729_v48 }
0x3e2f   :  { %2964 = vmatprep.mubr.f32.mxu1 %v2852_v59 }
0x3e30   :  { %2965 = vmatmul.mubr.f32.vlgmr.msra.gmra.mrb[42].mxu1 %v2851_v55 }
0x3e31   :  { %3513 = vmatprep.mubr.msk.f32.mxu1 %vm4066_vm7, %v4064_v17  ;;  %v3056_v17 = vld [vmem:[%s5062_s3 + $0x190] sm:$0xff]  ;;  %3663 = vmatpush3.bf16.msra.mxu1 %v3662_v22  ;;  %s4031_s3 = scalar_lea.vmem %s3239_s8, 32 }
0x3e32   :  { %v3659_v12 = vpack.c.bf16 %v3056_v17, %v3055_v57  ;;  %3664 = vmatprep.subr.bf16.mxu1 %v4065_v61  ;;  %p4032_p8 = scmp.ne.s32.totalorder %s3239_s8, %s4031_s3  ;;  %p4037_p10 = scmp.lt.s32.totalorder %s4031_s3, %s4031_s3 }
0x3e34   :  { %3660 = vmatpush3.bf16.msra.mxu0 %v3659_v12  ;;  %p4038_p11 = por %p4037_p10, %p4036_p9 }
0x3e35   :  { %3666 = vmatpush3.bf16.msra.mxu1 %v3665_v28 }
0x3e36   :  { %3667 = vmatprep.subr.bf16.mxu1 %v4065_v61  ;;  %p4039_p12 = pnand %p4038_p11, %p4032_p8 }
0x3e39   :  { %3669 = vmatpush3.bf16.msra.mxu1 %v3668_v1 }
0x3e3a   :  { %3670 = vmatprep.subr.bf16.mxu1 %v4065_v61 }
0x3e3d   :  { %3672 = vmatpush3.bf16.msra.mxu1 %v3671_v8 }
0x3e3e   :  { %3673 = vmatprep.subr.bf16.mxu1 %v4065_v61 }
0x3e41   :  { %3675 = vmatpush3.bf16.msra.mxu1 %v3674_v20 }
0x3e42   :  { %3676 = vmatprep.subr.bf16.mxu1 %v4065_v61 }
0x3e45   :  { %3678 = vmatpush3.bf16.msra.mxu1 %v3677_v25 }
0x3e46   :  { %3679 = vmatprep.subr.bf16.mxu1 %v4065_v61 }
0x3e49   :  { %3681 = vmatpush3.bf16.msra.mxu1 %v3680_v16 }
0x3e4a   :  { %3682 = vmatprep.subr.bf16.mxu1 %v4065_v61  ;;  %v3683_v61 = vpack.c.bf16 %v3148_v34, %v3147_v15 }
0x3e4d   :  { %3684 = vmatpush3.bf16.msra.mxu1 %v3683_v61 }
0x3e75   :  { %v3036_v56 = vpop.f32.mrb[34].mxu0 }
0x3e76   :  { %v3445_v58 = vpop.f32.mrb[35].mxu0 }
0x3f03   :  { %v3366_v14 = vpop.f32.mrb[42].mxu1 }
0x3f04   :  { %v3367_v19 = vpop.f32.mrb[43].mxu1 }
0x3f05   :  { %v3368_v2 = vadd.f32 %v3367_v19, %v3366_v14 }
0x3f07   :  { %v2967_v23 = vadd.f32 %v3368_v2, %v3313_v6 }
0x3f09   :  { %v3037_v26 = vadd.f32 %v3036_v56, %v2967_v23 }
0x3f0b   :  { %v3040_v31 = vmax.f32 %v3037_v26, 0.0 }
0x3f0d   :  { %3479 = vmatmul.mubr.f32.vlgmr.msra.gmra.mrb[36].mxu0 %v3040_v31 }
0x3fe0   :  { %v3128_v63 = vpop.f32.mrb[36].mxu0 }
0x3fe1   :  { %v3129_v37 = vadd.f32 %v3316_v36, %v3128_v63  ;;  %v3480_v38 = vpop.f32.mrb[37].mxu0 }
0x3fe3   :  { %v3132_v29 = vmax.f32 %v3129_v37, 0.0 }
0x3fe5   :  { %3514 = vmatmul.mubr.f32.vlgmr.msra.gmra.mrb[44].mxu1 %v3132_v29 }
0x40b8   :  { %v3220_v45 = vpop.f32.mrb[44].mxu1 }
0x40b9   :  { %v3221_v46 = vadd.f32 %v3317_v43, %v3220_v45  ;;  %v3515_v49 = vpop.f32.mrb[45].mxu1 }
0x40bb   :  { %v3318_v30 = vmul.f32 -1.442695, %v3221_v46 }
0x40bd   :  { %4005 = vpow2.f32 %v3318_v30 }
0x40c7   :  { %v4006_v50 = vpop.eup %4005 }
0x40c8   :  { %v3227_v54 = vadd.f32 1.0, %v4006_v50 }
0x40ca   :  { %4007 = vrcp.f32 %v3227_v54 }
0x40d4   :  { %v4008_v51 = vpop.eup %4007 }
0x40d5   :  { %3231 = vst.msk [vmem:[#allocation8] sm:$0x3] %vm3230_vm11, %v4008_v51 }
0x40d6   :  { %4042 = shalt.err (!%p4039_p12)
}
0x40d7   :  { %s4043_s14 = scalar_lea.hbm %s5064_s5, 32 }
0x40d8   :  { %p4044_p13 = scmp.ne.s32.totalorder %s5064_s5, %s4043_s14  ;;  %p4047_p0 = scmp.lt.u32.totalorder %s4043_s14, %s5064_s5 }
0x40da   :  { %p4049_p1 = pnand %p4047_p0, %p4044_p13 }
0x40dc   :  { %4052 = shalt.err (!%p4049_p1)
}
0x40dd   :  { %3241 = dma.vmem_to_hbm [thread:$0]  %s3239_s8, 32, %s5064_s5, [#allocation7]  }
0x40de   :  { %4055 = dma.done.wait [#allocation7], 32  }
0x40df   :  { %4056 = vsyncadd [#allocation7], 4294967264 }
0x40e0   :  { %3245 = vsyncpa [#allocation6], 1 }
0x40e1   :  { %3246 = vsyncpa [#allocation7], 1 }

</bundles_post_ra>
